<compile_context>
chip_gen: v5e
topology: v5e:2x2
jax: 0.10.0
libtpu: 0.0.40
codegen_flags: <defaults>
</compile_context>

<pallas_src>
import jax
import jax.numpy as jnp
from jax.experimental import pallas as pl
from jax.experimental.pallas import tpu as pltpu


_KPRE = 64  # prefire im2col contraction (49 taps zero-padded to 64)


# ------------------------------ fused Pallas kernel ------------------------------ #

def _fused_kernel(patches_ref, w_pre_ref, b_pre_ref,
                  wsq1_ref, bsq1_ref, wf1_ref, bf1_ref,
                  wsq2_ref, bsq2_ref, wf2_ref, bf2_ref,
                  wsq3_ref, bsq3_ref, wf3_ref, bf3_ref,
                  f1_ref, f2_ref, f3_ref,
                  conv_s, pool_s, p144_s, p288_s):
    # ---- prefire: Conv2d(1, 96->128pad, k=7, s=2) + ReLU as one bf16 MXU matmul ----
    patches = patches_ref[...].reshape(4 * 64, _KPRE)                 # bf16
    conv = jnp.dot(patches, w_pre_ref[...], preferred_element_type=jnp.float32)
    conv = jnp.maximum(conv + b_pre_ref[...], 0.0)                    # [256, 128] f32
    conv_s[...] = conv.reshape(4, 8, 8, 128)

    # ---- MaxPool2d(3, 2, ceil_mode=True) as 9 unit-stride shifted maxima ----------
    # parity group t = 2*p + q holds conv pixels (2*oy+p, 2*ox+q) (clamped dups at 7),
    # so the ceil-mode pool window is exactly the (p, dp) x (q, dq) combos below.
    m = None
    for p, dp in ((0, 0), (1, 0), (0, 1)):
        for q, dq in ((0, 0), (1, 0), (0, 1)):
            t = 2 * p + q
            w = conv_s[t, dp:dp + 7, dq:dq + 7, :]                    # [7, 7, 128]
            m = w if m is None else jnp.maximum(m, w)
    pool_s[...] = jnp.zeros_like(pool_s)
    pool_s[0:7, 0:7, :] = m                                           # row/col 7 = junk
    x1 = pool_s[...].reshape(64, 128).astype(jnp.bfloat16)

    # ---- fire modules: squeeze 1x1, then ONE im2col matmul for expand1x1||expand3x3
    p144_s[...] = jnp.zeros_like(p144_s)   # zero borders of the im2col buffers
    p288_s[...] = jnp.zeros_like(p288_s)

    def fire(xb, wsq_ref, bsq_ref, wf_ref, bf_ref, sq, patch_ref):
        s = jnp.dot(xb, wsq_ref[...], preferred_element_type=jnp.float32)
        s = jnp.maximum(s + bsq_ref[...], 0.0).astype(jnp.bfloat16)   # [64, sq]
        s3 = s.reshape(8, 8, sq)
        for t in range(9):                 # scatter the 9 shifted (SAME-pad) windows
            dy, dx = t // 3, t % 3
            oy0, oy1 = max(0, 1 - dy), 8 - dy
            ox0, ox1 = max(0, 1 - dx), 8 - dx
            patch_ref[oy0:oy1, ox0:ox1, t * sq:(t + 1) * sq] = (
                s3[oy0 + dy - 1:oy1 + dy - 1, ox0 + dx - 1:ox1 + dx - 1, :])
        pat = patch_ref[...].reshape(64, 9 * sq)                      # bf16, K = 9*sq
        f = jnp.dot(pat, wf_ref[...], preferred_element_type=jnp.float32)
        return jnp.maximum(f + bf_ref[...], 0.0)                      # [64, E1+E3] f32

    f1 = fire(x1, wsq1_ref, bsq1_ref, wf1_ref, bf1_ref, 16, p144_s)
    f1_ref[...] = f1.reshape(1, 8, 8, 128)
    f2 = fire(f1.astype(jnp.bfloat16), wsq2_ref, bsq2_ref, wf2_ref, bf2_ref, 16, p144_s)
    f2_ref[...] = f2.reshape(1, 8, 8, 128)
    f3 = fire(f2.astype(jnp.bfloat16), wsq3_ref, bsq3_ref, wf3_ref, bf3_ref, 32, p288_s)
    f3_ref[...] = f3.reshape(1, 8, 8, 256)


def _fused_forward(patches, params, n_batch):
    N = n_batch
    args = (patches,
            params["prefire_w"], params["prefire_b"],
            params["fire1_sq_w"], params["fire1_sq_b"],
            params["fire1_ex_w"], params["fire1_ex_b"],
            params["fire2_sq_w"], params["fire2_sq_b"],
            params["fire2_ex_w"], params["fire2_ex_b"],
            params["fire3_sq_w"], params["fire3_sq_b"],
            params["fire3_ex_w"], params["fire3_ex_b"])

    def rep_spec(a):            # whole (small) array resident in VMEM every step
        nd = a.ndim
        return pl.BlockSpec(a.shape, lambda n: (0,) * nd)

    in_specs = [pl.BlockSpec((4, 1, 64, _KPRE), lambda n: (0, n, 0, 0))]
    in_specs += [rep_spec(a) for a in args[1:]]
    out_specs = (pl.BlockSpec((1, 8, 8, 128), lambda n: (n, 0, 0, 0)),
                 pl.BlockSpec((1, 8, 8, 128), lambda n: (n, 0, 0, 0)),
                 pl.BlockSpec((1, 8, 8, 256), lambda n: (n, 0, 0, 0)))

    per_step_flops = 2 * (256 * _KPRE * 128
                          + 64 * (128 * 16 + 144 * 128)
                          + 64 * (128 * 16 + 144 * 128)
                          + 64 * (128 * 32 + 288 * 256))
    bytes_accessed = (sum(int(a.size) * a.dtype.itemsize for a in args)
                      + 4 * N * 64 * (128 + 128 + 256))

    return pl.pallas_call(
        _fused_kernel,
        grid=(N,),
        out_shape=(jax.ShapeDtypeStruct((N, 8, 8, 128), jnp.float32),
                   jax.ShapeDtypeStruct((N, 8, 8, 128), jnp.float32),
                   jax.ShapeDtypeStruct((N, 8, 8, 256), jnp.float32)),
        in_specs=in_specs,
        out_specs=out_specs,
        scratch_shapes=[
            pltpu.VMEM((4, 8, 8, 128), jnp.float32),   # prefire conv map (parity-split)
            pltpu.VMEM((8, 8, 128), jnp.float32),      # pooled map on the 8x8 grid
            pltpu.VMEM((8, 8, 144), jnp.bfloat16),     # fire1/2 expand im2col (9*16)
            pltpu.VMEM((8, 8, 288), jnp.bfloat16),     # fire3 expand im2col (9*32)
        ],
        compiler_params=pltpu.CompilerParams(dimension_semantics=("parallel",)),
        cost_estimate=pl.CostEstimate(flops=N * per_step_flops, transcendentals=0,
                                      bytes_accessed=bytes_accessed),
    )(*args)


# --------------------------------- JAX glue --------------------------------------- #

def _prefire_patches(x_nchw):
    """Gather-free prefire im2col, rows ordered (parity p, q | n | oy, ox) on 8x8 grids.

    Grid positions past the last conv pixel are edge-duplicates (harmless for the
    following ceil-mode max-pool window); the 49 taps are zero-padded to 64.
    """
    N = x_nchw.shape[0]
    img = x_nchw[:, 0].astype(jnp.float32)                            # [N, H, W]
    taps = [img[:, dy:dy + 27:2, dx:dx + 27:2]                        # [N, 14, 14] each
            for dy in range(7) for dx in range(7)]
    pf = jnp.stack(taps, axis=-1)                                     # [N, 14, 14, 49]
    pf = jnp.pad(pf, ((0, 0), (0, 2), (0, 2), (0, 0)), mode="edge")   # spatial -> 16x16
    pf = jnp.pad(pf, ((0, 0), (0, 0), (0, 0), (0, _KPRE - 49)))       # K 49 -> 64
    pf = pf.reshape(N, 8, 2, 8, 2, _KPRE)                             # (n, oy, p, ox, q, k)
    pf = jnp.transpose(pf, (2, 4, 0, 1, 3, 5))                        # (p, q, n, oy, ox, k)
    return pf.reshape(4, N, 64, _KPRE).astype(jnp.bfloat16)


@jax.jit
def feat_squeezenet_light_forward(x_nchw, params):
    """x_nchw: [N, 1, H, W] float32 -> [fire1, fire2, fire3] feature maps in NCHW."""
    N, C, H, W = x_nchw.shape
    assert C == 1
    # TODO(synk): geometry is specialised to conv-out 14x14 / pool-out 7x7 (33x33 inputs
    # as used by squeezeCFnet_track); generalise the 8x8 fire grid if needed.
    assert (H - 7) // 2 + 1 == 14 and (W - 7) // 2 + 1 == 14, (H, W)
    patches = _prefire_patches(x_nchw)
    f1, f2, f3 = _fused_forward(patches, params, N)

    def to_nchw(f):
        return jnp.transpose(f[:, :7, :7, :], (0, 3, 1, 2))

    return [to_nchw(f1), to_nchw(f2), to_nchw(f3)]


# ----------------------------- parameter creation ---------------------------------- #

def _kaiming_uniform(key, shape):
    # mimics init.kaiming_uniform_ (a=0): bound = sqrt(6 / fan_in), fan_in = kh*kw*cin
    kh, kw, cin, _ = shape
    bound = (6.0 / (kh * kw * cin)) ** 0.5
    return jax.random.uniform(key, shape, jnp.float32, -bound, bound)


def _fuse_expand(w1_hwio, w3_hwio, b1, b3):
    """Fold expand1x1 + expand3x3 into one [9*Sq, E1+E3] matrix over 3x3 patch rows."""
    sq, e1 = w1_hwio.shape[2], w1_hwio.shape[3]
    e3 = w3_hwio.shape[3]
    wf = jnp.zeros((9 * sq, e1 + e3), jnp.float32)
    wf = wf.at[4 * sq:5 * sq, :e1].set(w1_hwio.reshape(sq, e1))       # centre tap only
    wf = wf.at[:, e1:].set(w3_hwio.reshape(9 * sq, e3))
    bf = jnp.concatenate([b1, b3]).reshape(1, e1 + e3)
    return wf.astype(jnp.bfloat16), bf


def init_params(key):
    k0, k1, k2, k3 = jax.random.split(key, 4)
    w_pre = _kaiming_uniform(k0, (7, 7, 1, 96)).reshape(49, 96)
    w_pre = jnp.zeros((_KPRE, 128), jnp.float32).at[:49, :96].set(w_pre)
    p = {"prefire_w": w_pre.astype(jnp.bfloat16),
         "prefire_b": jnp.zeros((1, 128), jnp.float32)}
    for name, kk, cin, cin_pad, sq, e1, e3 in (("fire1", k1, 96, 128, 16, 64, 64),
                                               ("fire2", k2, 128, 128, 16, 64, 64),
                                               ("fire3", k3, 128, 128, 32, 128, 128)):
        ka, kb, kc = jax.random.split(kk, 3)
        wsq = _kaiming_uniform(ka, (1, 1, cin, sq)).reshape(cin, sq)
        wsq = jnp.zeros((cin_pad, sq), jnp.float32).at[:cin, :].set(wsq)
        w1 = _kaiming_uniform(kb, (1, 1, sq, e1))
        w3 = _kaiming_uniform(kc, (3, 3, sq, e3))
        wf, bf = _fuse_expand(w1, w3, jnp.zeros((e1,), jnp.float32),
                              jnp.zeros((e3,), jnp.float32))
        p[f"{name}_sq_w"] = wsq.astype(jnp.bfloat16)
        p[f"{name}_sq_b"] = jnp.zeros((1, sq), jnp.float32)
        p[f"{name}_ex_w"] = wf
        p[f"{name}_ex_b"] = bf
    return p


# ------------------------- pure-XLA reference (self-check) ------------------------- #

def _reference_forward(x_nchw, params):
    hp = jax.lax.Precision.HIGHEST
    f32 = jnp.float32

    def conv_relu(x, w_hwio, b, stride=1, pad="VALID"):
        y = jax.lax.conv_general_dilated(
            x, w_hwio, (stride, stride), pad,
            dimension_numbers=("NHWC", "HWIO", "NHWC"), precision=hp)
        return jnp.maximum(y + b, 0.0)

    def maxpool_ceil(x):
        return jax.lax.reduce_window(
            x, -jnp.inf, jax.lax.max, (1, 3, 3, 1), (1, 2, 2, 1),
            ((0, 0), (0, 1), (0, 1), (0, 0)))

    def fire_ref(x, name, cin, sq, e1, e3):
        wsq = params[f"{name}_sq_w"][:cin].astype(f32).reshape(1, 1, cin, sq)
        bsq = params[f"{name}_sq_b"][0].astype(f32)
        wf = params[f"{name}_ex_w"].astype(f32)
        bf = params[f"{name}_ex_b"][0].astype(f32)
        s = conv_relu(x, wsq, bsq)
        y1 = conv_relu(s, wf[4 * sq:5 * sq, :e1].reshape(1, 1, sq, e1), bf[:e1])
        y3 = conv_relu(s, wf[:, e1:].reshape(3, 3, sq, e3), bf[e1:],
                       pad=((1, 1), (1, 1)))
        return jnp.concatenate([y1, y3], axis=-1)

    x = jnp.transpose(x_nchw, (0, 2, 3, 1)).astype(f32)
    w_pre = params["prefire_w"][:49, :96].astype(f32).reshape(7, 7, 1, 96)
    b_pre = params["prefire_b"][0, :96].astype(f32)
    x = conv_relu(x, w_pre, b_pre, stride=2)
    x = maxpool_ceil(x)
    f1 = x = fire_ref(x, "fire1", 96, 16, 64, 64)
    f2 = x = fire_ref(x, "fire2", 128, 16, 64, 64)
    f3 = x = fire_ref(x, "fire3", 128, 32, 128, 128)
    return [jnp.transpose(t, (0, 3, 1, 2)) for t in (f1, f2, f3)]


# ------------------------------------- main ---------------------------------------- #

if __name__ == "__main__":
    key = jax.random.PRNGKey(0)
    pkey, xkey = jax.random.split(key)
    params = init_params(pkey)
    # [N=2, C=1, H=33, W=33]: conv7/s2 -> 14x14, maxpool3/s2(ceil) -> 7x7
    x = jax.random.normal(xkey, (2, 1, 33, 33), dtype=jnp.float32)

    feats = feat_squeezenet_light_forward(x, params)
    feats = jax.block_until_ready(feats)

    assert feats[0].shape == (2, 128, 7, 7), feats[0].shape
    assert feats[1].shape == (2, 128, 7, 7), feats[1].shape
    assert feats[2].shape == (2, 256, 7, 7), feats[2].shape
    assert all(bool(jnp.all(jnp.isfinite(f))) for f in feats)

    ref = _reference_forward(x, params)
    for got, want in zip(feats, ref):
        err = float(jnp.max(jnp.abs(got - want)))
        scale = float(jnp.max(jnp.abs(want)))
        assert err <= 5e-2 * (scale + 1.0), ("mismatch vs reference", err, scale)

    print("KERNEL_OK")
</pallas_src>

<mosaic_0001>
module attributes {stable_mosaic.version = 11 : i64} {
  func.func @_fused_kernel(%arg0: i32, %arg1: memref<4x1x64x64xbf16, #tpu.memory_space<vmem>>, %arg2: memref<64x128xbf16, #tpu.memory_space<vmem>>, %arg3: memref<1x128xf32, #tpu.memory_space<vmem>>, %arg4: memref<128x16xbf16, #tpu.memory_space<vmem>>, %arg5: memref<1x16xf32, #tpu.memory_space<vmem>>, %arg6: memref<144x128xbf16, #tpu.memory_space<vmem>>, %arg7: memref<1x128xf32, #tpu.memory_space<vmem>>, %arg8: memref<128x16xbf16, #tpu.memory_space<vmem>>, %arg9: memref<1x16xf32, #tpu.memory_space<vmem>>, %arg10: memref<144x128xbf16, #tpu.memory_space<vmem>>, %arg11: memref<1x128xf32, #tpu.memory_space<vmem>>, %arg12: memref<128x32xbf16, #tpu.memory_space<vmem>>, %arg13: memref<1x32xf32, #tpu.memory_space<vmem>>, %arg14: memref<288x256xbf16, #tpu.memory_space<vmem>>, %arg15: memref<1x256xf32, #tpu.memory_space<vmem>>, %arg16: memref<1x8x8x128xf32, #tpu.memory_space<vmem>>, %arg17: memref<1x8x8x128xf32, #tpu.memory_space<vmem>>, %arg18: memref<1x8x8x256xf32, #tpu.memory_space<vmem>>, %arg19: memref<4x8x8x128xf32, #tpu.memory_space<vmem>>, %arg20: memref<8x8x128xf32, #tpu.memory_space<vmem>>, %arg21: memref<8x8x144xbf16, #tpu.memory_space<vmem>>, %arg22: memref<8x8x288xbf16, #tpu.memory_space<vmem>>) attributes {dimension_semantics = [#tpu.dimension_semantics<parallel>], iteration_bounds = array<i64: 2>, scalar_prefetch = 0 : i64, scratch_operands = 4 : i64, tpu.core_type = #tpu.core_type<tc>, window_params = [{transform_indices = @transform_0, window_bounds = array<i64: 4, 1, 64, 64>}, {pipeline_mode = #tpu.pipeline_mode<synchronous>, transform_indices = @transform_1, window_bounds = array<i64: 64, 128>}, {pipeline_mode = #tpu.pipeline_mode<synchronous>, transform_indices = @transform_2, window_bounds = array<i64: 1, 128>}, {pipeline_mode = #tpu.pipeline_mode<synchronous>, transform_indices = @transform_3, window_bounds = array<i64: 128, 16>}, {pipeline_mode = #tpu.pipeline_mode<synchronous>, transform_indices = @transform_4, window_bounds = array<i64: 1, 16>}, {pipeline_mode = #tpu.pipeline_mode<synchronous>, transform_indices = @transform_5, window_bounds = array<i64: 144, 128>}, {pipeline_mode = #tpu.pipeline_mode<synchronous>, transform_indices = @transform_6, window_bounds = array<i64: 1, 128>}, {pipeline_mode = #tpu.pipeline_mode<synchronous>, transform_indices = @transform_7, window_bounds = array<i64: 128, 16>}, {pipeline_mode = #tpu.pipeline_mode<synchronous>, transform_indices = @transform_8, window_bounds = array<i64: 1, 16>}, {pipeline_mode = #tpu.pipeline_mode<synchronous>, transform_indices = @transform_9, window_bounds = array<i64: 144, 128>}, {pipeline_mode = #tpu.pipeline_mode<synchronous>, transform_indices = @transform_10, window_bounds = array<i64: 1, 128>}, {pipeline_mode = #tpu.pipeline_mode<synchronous>, transform_indices = @transform_11, window_bounds = array<i64: 128, 32>}, {pipeline_mode = #tpu.pipeline_mode<synchronous>, transform_indices = @transform_12, window_bounds = array<i64: 1, 32>}, {pipeline_mode = #tpu.pipeline_mode<synchronous>, transform_indices = @transform_13, window_bounds = array<i64: 288, 256>}, {pipeline_mode = #tpu.pipeline_mode<synchronous>, transform_indices = @transform_14, window_bounds = array<i64: 1, 256>}, {transform_indices = @transform_15, window_bounds = array<i64: 1, 8, 8, 128>}, {transform_indices = @transform_16, window_bounds = array<i64: 1, 8, 8, 128>}, {transform_indices = @transform_17, window_bounds = array<i64: 1, 8, 8, 256>}]} {
    %c0 = arith.constant 0 : index
    %c0_0 = arith.constant 0 : index
    %c0_1 = arith.constant 0 : index
    %c0_2 = arith.constant 0 : index
    %0 = vector.load %arg1[%c0, %c0_0, %c0_1, %c0_2] : memref<4x1x64x64xbf16, #tpu.memory_space<vmem>>, vector<4x1x64x64xbf16>
    %1 = vector.shape_cast %0 : vector<4x1x64x64xbf16> to vector<256x64xbf16>
    %c0_3 = arith.constant 0 : index
    %c0_4 = arith.constant 0 : index
    %2 = vector.load %arg2[%c0_3, %c0_4] : memref<64x128xbf16, #tpu.memory_space<vmem>>, vector<64x128xbf16>
    %cst = arith.constant dense<0.000000e+00> : vector<256x128xf32>
    %3 = tpu.matmul %1, %2, %cst {dimension_numbers = #tpu.dot_dimension_numbers<[1], [0], [0], [1], [0, 0, 1, 1], [], []>} : vector<256x64xbf16>, vector<64x128xbf16>, vector<256x128xf32> -> vector<256x128xf32>
    %c0_5 = arith.constant 0 : index
    %c0_6 = arith.constant 0 : index
    %4 = vector.load %arg3[%c0_5, %c0_6] : memref<1x128xf32, #tpu.memory_space<vmem>>, vector<1x128xf32>
    %5 = vector.broadcast %4 : vector<1x128xf32> to vector<256x128xf32>
    %6 = arith.addf %3, %5 : vector<256x128xf32>
    %cst_7 = arith.constant 0.000000e+00 : f32
    %7 = vector.broadcast %cst_7 : f32 to vector<256x128xf32>
    %8 = arith.maximumf %6, %7 : vector<256x128xf32>
    %9 = vector.shape_cast %8 : vector<256x128xf32> to vector<4x8x8x128xf32>
    %c0_8 = arith.constant 0 : index
    %c0_9 = arith.constant 0 : index
    %c0_10 = arith.constant 0 : index
    %c0_11 = arith.constant 0 : index
    %10 = vector.load %arg19[%c0_8, %c0_9, %c0_10, %c0_11] : memref<4x8x8x128xf32, #tpu.memory_space<vmem>>, vector<4x8x8x128xf32>
    tpu.vector_store %arg19[%c0_8, %c0_9, %c0_10, %c0_11], %9 {strides = array<i32>} : memref<4x8x8x128xf32, #tpu.memory_space<vmem>>, vector<4x8x8x128xf32>,
    %c0_12 = arith.constant 0 : index
    %c0_13 = arith.constant 0 : index
    %c0_14 = arith.constant 0 : index
    %c0_15 = arith.constant 0 : index
    %11 = vector.load %arg19[%c0_12, %c0_13, %c0_14, %c0_15] : memref<4x8x8x128xf32, #tpu.memory_space<vmem>>, vector<1x7x7x128xf32>
    %12 = vector.shape_cast %11 : vector<1x7x7x128xf32> to vector<7x7x128xf32>
    %c1 = arith.constant 1 : index
    %c0_16 = arith.constant 0 : index
    %c0_17 = arith.constant 0 : index
    %c0_18 = arith.constant 0 : index
    %13 = vector.load %arg19[%c1, %c0_16, %c0_17, %c0_18] : memref<4x8x8x128xf32, #tpu.memory_space<vmem>>, vector<1x7x7x128xf32>
    %14 = vector.shape_cast %13 : vector<1x7x7x128xf32> to vector<7x7x128xf32>
    %15 = arith.maximumf %12, %14 : vector<7x7x128xf32>
    %c0_19 = arith.constant 0 : index
    %c0_20 = arith.constant 0 : index
    %c1_21 = arith.constant 1 : index
    %c0_22 = arith.constant 0 : index
    %16 = vector.load %arg19[%c0_19, %c0_20, %c1_21, %c0_22] : memref<4x8x8x128xf32, #tpu.memory_space<vmem>>, vector<1x7x7x128xf32>
    %17 = vector.shape_cast %16 : vector<1x7x7x128xf32> to vector<7x7x128xf32>
    %18 = arith.maximumf %15, %17 : vector<7x7x128xf32>
    %c2 = arith.constant 2 : index
    %c0_23 = arith.constant 0 : index
    %c0_24 = arith.constant 0 : index
    %c0_25 = arith.constant 0 : index
    %19 = vector.load %arg19[%c2, %c0_23, %c0_24, %c0_25] : memref<4x8x8x128xf32, #tpu.memory_space<vmem>>, vector<1x7x7x128xf32>
    %20 = vector.shape_cast %19 : vector<1x7x7x128xf32> to vector<7x7x128xf32>
    %21 = arith.maximumf %18, %20 : vector<7x7x128xf32>
    %c3 = arith.constant 3 : index
    %c0_26 = arith.constant 0 : index
    %c0_27 = arith.constant 0 : index
    %c0_28 = arith.constant 0 : index
    %22 = vector.load %arg19[%c3, %c0_26, %c0_27, %c0_28] : memref<4x8x8x128xf32, #tpu.memory_space<vmem>>, vector<1x7x7x128xf32>
    %23 = vector.shape_cast %22 : vector<1x7x7x128xf32> to vector<7x7x128xf32>
    %24 = arith.maximumf %21, %23 : vector<7x7x128xf32>
    %c2_29 = arith.constant 2 : index
    %c0_30 = arith.constant 0 : index
    %c1_31 = arith.constant 1 : index
    %c0_32 = arith.constant 0 : index
    %25 = vector.load %arg19[%c2_29, %c0_30, %c1_31, %c0_32] : memref<4x8x8x128xf32, #tpu.memory_space<vmem>>, vector<1x7x7x128xf32>
    %26 = vector.shape_cast %25 : vector<1x7x7x128xf32> to vector<7x7x128xf32>
    %27 = arith.maximumf %24, %26 : vector<7x7x128xf32>
    %c0_33 = arith.constant 0 : index
    %c1_34 = arith.constant 1 : index
    %c0_35 = arith.constant 0 : index
    %c0_36 = arith.constant 0 : index
    %28 = vector.load %arg19[%c0_33, %c1_34, %c0_35, %c0_36] : memref<4x8x8x128xf32, #tpu.memory_space<vmem>>, vector<1x7x7x128xf32>
    %29 = vector.shape_cast %28 : vector<1x7x7x128xf32> to vector<7x7x128xf32>
    %30 = arith.maximumf %27, %29 : vector<7x7x128xf32>
    %c1_37 = arith.constant 1 : index
    %c1_38 = arith.constant 1 : index
    %c0_39 = arith.constant 0 : index
    %c0_40 = arith.constant 0 : index
    %31 = vector.load %arg19[%c1_37, %c1_38, %c0_39, %c0_40] : memref<4x8x8x128xf32, #tpu.memory_space<vmem>>, vector<1x7x7x128xf32>
    %32 = vector.shape_cast %31 : vector<1x7x7x128xf32> to vector<7x7x128xf32>
    %33 = arith.maximumf %30, %32 : vector<7x7x128xf32>
    %c0_41 = arith.constant 0 : index
    %c1_42 = arith.constant 1 : index
    %c1_43 = arith.constant 1 : index
    %c0_44 = arith.constant 0 : index
    %34 = vector.load %arg19[%c0_41, %c1_42, %c1_43, %c0_44] : memref<4x8x8x128xf32, #tpu.memory_space<vmem>>, vector<1x7x7x128xf32>
    %35 = vector.shape_cast %34 : vector<1x7x7x128xf32> to vector<7x7x128xf32>
    %36 = arith.maximumf %33, %35 : vector<7x7x128xf32>
    %cst_45 = arith.constant 0.000000e+00 : f32
    %37 = vector.broadcast %cst_45 : f32 to vector<8x8x128xf32>
    %c0_46 = arith.constant 0 : index
    %c0_47 = arith.constant 0 : index
    %c0_48 = arith.constant 0 : index
    %38 = vector.load %arg20[%c0_46, %c0_47, %c0_48] : memref<8x8x128xf32, #tpu.memory_space<vmem>>, vector<8x8x128xf32>
    tpu.vector_store %arg20[%c0_46, %c0_47, %c0_48], %37 {strides = array<i32>} : memref<8x8x128xf32, #tpu.memory_space<vmem>>, vector<8x8x128xf32>,
    %c0_49 = arith.constant 0 : index
    %c0_50 = arith.constant 0 : index
    %c0_51 = arith.constant 0 : index
    %39 = vector.load %arg20[%c0_49, %c0_50, %c0_51] : memref<8x8x128xf32, #tpu.memory_space<vmem>>, vector<7x7x128xf32>
    tpu.vector_store %arg20[%c0_49, %c0_50, %c0_51], %36 {strides = array<i32>} : memref<8x8x128xf32, #tpu.memory_space<vmem>>, vector<7x7x128xf32>,
    %c0_52 = arith.constant 0 : index
    %c0_53 = arith.constant 0 : index
    %c0_54 = arith.constant 0 : index
    %40 = vector.load %arg20[%c0_52, %c0_53, %c0_54] : memref<8x8x128xf32, #tpu.memory_space<vmem>>, vector<8x8x128xf32>
    %41 = vector.shape_cast %40 : vector<8x8x128xf32> to vector<64x128xf32>
    %42 = arith.truncf %41 : vector<64x128xf32> to vector<64x128xbf16>
    %cst_55 = arith.constant 0.000000e+00 : bf16
    %43 = vector.broadcast %cst_55 : bf16 to vector<8x8x144xbf16>
    %c0_56 = arith.constant 0 : index
    %c0_57 = arith.constant 0 : index
    %c0_58 = arith.constant 0 : index
    %44 = vector.load %arg21[%c0_56, %c0_57, %c0_58] : memref<8x8x144xbf16, #tpu.memory_space<vmem>>, vector<8x8x144xbf16>
    tpu.vector_store %arg21[%c0_56, %c0_57, %c0_58], %43 {strides = array<i32>} : memref<8x8x144xbf16, #tpu.memory_space<vmem>>, vector<8x8x144xbf16>,
    %cst_59 = arith.constant 0.000000e+00 : bf16
    %45 = vector.broadcast %cst_59 : bf16 to vector<8x8x288xbf16>
    %c0_60 = arith.constant 0 : index
    %c0_61 = arith.constant 0 : index
    %c0_62 = arith.constant 0 : index
    %46 = vector.load %arg22[%c0_60, %c0_61, %c0_62] : memref<8x8x288xbf16, #tpu.memory_space<vmem>>, vector<8x8x288xbf16>
    tpu.vector_store %arg22[%c0_60, %c0_61, %c0_62], %45 {strides = array<i32>} : memref<8x8x288xbf16, #tpu.memory_space<vmem>>, vector<8x8x288xbf16>,
    %c0_63 = arith.constant 0 : index
    %c0_64 = arith.constant 0 : index
    %47 = vector.load %arg4[%c0_63, %c0_64] : memref<128x16xbf16, #tpu.memory_space<vmem>>, vector<128x16xbf16>
    %cst_65 = arith.constant dense<0.000000e+00> : vector<64x16xf32>
    %48 = tpu.matmul %42, %47, %cst_65 {dimension_numbers = #tpu.dot_dimension_numbers<[1], [0], [0], [1], [0, 0, 1, 1], [], []>} : vector<64x128xbf16>, vector<128x16xbf16>, vector<64x16xf32> -> vector<64x16xf32>
    %c0_66 = arith.constant 0 : index
    %c0_67 = arith.constant 0 : index
    %49 = vector.load %arg5[%c0_66, %c0_67] : memref<1x16xf32, #tpu.memory_space<vmem>>, vector<1x16xf32>
    %50 = vector.broadcast %49 : vector<1x16xf32> to vector<64x16xf32>
    %51 = arith.addf %48, %50 : vector<64x16xf32>
    %cst_68 = arith.constant 0.000000e+00 : f32
    %52 = vector.broadcast %cst_68 : f32 to vector<64x16xf32>
    %53 = arith.maximumf %51, %52 : vector<64x16xf32>
    %54 = arith.truncf %53 : vector<64x16xf32> to vector<64x16xbf16>
    %55 = vector.shape_cast %54 : vector<64x16xbf16> to vector<8x8x16xbf16>
    %56 = vector.extract_strided_slice %55 {offsets = [0, 0, 0], sizes = [7, 7, 16], strides = [1, 1, 1]} : vector<8x8x16xbf16> to vector<7x7x16xbf16>
    %c1_69 = arith.constant 1 : index
    %c1_70 = arith.constant 1 : index
    %c0_71 = arith.constant 0 : index
    %57 = vector.load %arg21[%c1_69, %c1_70, %c0_71] : memref<8x8x144xbf16, #tpu.memory_space<vmem>>, vector<7x7x16xbf16>
    tpu.vector_store %arg21[%c1_69, %c1_70, %c0_71], %56 {strides = array<i32>} : memref<8x8x144xbf16, #tpu.memory_space<vmem>>, vector<7x7x16xbf16>,
    %58 = vector.extract_strided_slice %55 {offsets = [0, 0, 0], sizes = [7, 7, 16], strides = [1, 1, 1]} : vector<8x8x16xbf16> to vector<7x7x16xbf16>
    %c1_72 = arith.constant 1 : index
    %c0_73 = arith.constant 0 : index
    %c16 = arith.constant 16 : index
    %59 = vector.load %arg21[%c1_72, %c0_73, %c16] : memref<8x8x144xbf16, #tpu.memory_space<vmem>>, vector<7x7x16xbf16>
    tpu.vector_store %arg21[%c1_72, %c0_73, %c16], %58 {strides = array<i32>} : memref<8x8x144xbf16, #tpu.memory_space<vmem>>, vector<7x7x16xbf16>,
    %60 = vector.extract_strided_slice %55 {offsets = [0, 1, 0], sizes = [7, 6, 16], strides = [1, 1, 1]} : vector<8x8x16xbf16> to vector<7x6x16xbf16>
    %c1_74 = arith.constant 1 : index
    %c0_75 = arith.constant 0 : index
    %c32 = arith.constant 32 : index
    %61 = vector.load %arg21[%c1_74, %c0_75, %c32] : memref<8x8x144xbf16, #tpu.memory_space<vmem>>, vector<7x6x16xbf16>
    tpu.vector_store %arg21[%c1_74, %c0_75, %c32], %60 {strides = array<i32>} : memref<8x8x144xbf16, #tpu.memory_space<vmem>>, vector<7x6x16xbf16>,
    %62 = vector.extract_strided_slice %55 {offsets = [0, 0, 0], sizes = [7, 7, 16], strides = [1, 1, 1]} : vector<8x8x16xbf16> to vector<7x7x16xbf16>
    %c0_76 = arith.constant 0 : index
    %c1_77 = arith.constant 1 : index
    %c48 = arith.constant 48 : index
    %63 = vector.load %arg21[%c0_76, %c1_77, %c48] : memref<8x8x144xbf16, #tpu.memory_space<vmem>>, vector<7x7x16xbf16>
    tpu.vector_store %arg21[%c0_76, %c1_77, %c48], %62 {strides = array<i32>} : memref<8x8x144xbf16, #tpu.memory_space<vmem>>, vector<7x7x16xbf16>,
    %64 = vector.extract_strided_slice %55 {offsets = [0, 0, 0], sizes = [7, 7, 16], strides = [1, 1, 1]} : vector<8x8x16xbf16> to vector<7x7x16xbf16>
    %c0_78 = arith.constant 0 : index
    %c0_79 = arith.constant 0 : index
    %c64 = arith.constant 64 : index
    %65 = vector.load %arg21[%c0_78, %c0_79, %c64] : memref<8x8x144xbf16, #tpu.memory_space<vmem>>, vector<7x7x16xbf16>
    tpu.vector_store %arg21[%c0_78, %c0_79, %c64], %64 {strides = array<i32>} : memref<8x8x144xbf16, #tpu.memory_space<vmem>>, vector<7x7x16xbf16>,
    %66 = vector.extract_strided_slice %55 {offsets = [0, 1, 0], sizes = [7, 6, 16], strides = [1, 1, 1]} : vector<8x8x16xbf16> to vector<7x6x16xbf16>
    %c0_80 = arith.constant 0 : index
    %c0_81 = arith.constant 0 : index
    %c80 = arith.constant 80 : index
    %67 = vector.load %arg21[%c0_80, %c0_81, %c80] : memref<8x8x144xbf16, #tpu.memory_space<vmem>>, vector<7x6x16xbf16>
    tpu.vector_store %arg21[%c0_80, %c0_81, %c80], %66 {strides = array<i32>} : memref<8x8x144xbf16, #tpu.memory_space<vmem>>, vector<7x6x16xbf16>,
    %68 = vector.extract_strided_slice %55 {offsets = [1, 0, 0], sizes = [6, 7, 16], strides = [1, 1, 1]} : vector<8x8x16xbf16> to vector<6x7x16xbf16>
    %c0_82 = arith.constant 0 : index
    %c1_83 = arith.constant 1 : index
    %c96 = arith.constant 96 : index
    %69 = vector.load %arg21[%c0_82, %c1_83, %c96] : memref<8x8x144xbf16, #tpu.memory_space<vmem>>, vector<6x7x16xbf16>
    tpu.vector_store %arg21[%c0_82, %c1_83, %c96], %68 {strides = array<i32>} : memref<8x8x144xbf16, #tpu.memory_space<vmem>>, vector<6x7x16xbf16>,
    %70 = vector.extract_strided_slice %55 {offsets = [1, 0, 0], sizes = [6, 7, 16], strides = [1, 1, 1]} : vector<8x8x16xbf16> to vector<6x7x16xbf16>
    %c0_84 = arith.constant 0 : index
    %c0_85 = arith.constant 0 : index
    %c112 = arith.constant 112 : index
    %71 = vector.load %arg21[%c0_84, %c0_85, %c112] : memref<8x8x144xbf16, #tpu.memory_space<vmem>>, vector<6x7x16xbf16>
    tpu.vector_store %arg21[%c0_84, %c0_85, %c112], %70 {strides = array<i32>} : memref<8x8x144xbf16, #tpu.memory_space<vmem>>, vector<6x7x16xbf16>,
    %72 = vector.extract_strided_slice %55 {offsets = [1, 1, 0], sizes = [6, 6, 16], strides = [1, 1, 1]} : vector<8x8x16xbf16> to vector<6x6x16xbf16>
    %c0_86 = arith.constant 0 : index
    %c0_87 = arith.constant 0 : index
    %c128 = arith.constant 128 : index
    %73 = vector.load %arg21[%c0_86, %c0_87, %c128] : memref<8x8x144xbf16, #tpu.memory_space<vmem>>, vector<6x6x16xbf16>
    tpu.vector_store %arg21[%c0_86, %c0_87, %c128], %72 {strides = array<i32>} : memref<8x8x144xbf16, #tpu.memory_space<vmem>>, vector<6x6x16xbf16>,
    %c0_88 = arith.constant 0 : index
    %c0_89 = arith.constant 0 : index
    %c0_90 = arith.constant 0 : index
    %74 = vector.load %arg21[%c0_88, %c0_89, %c0_90] : memref<8x8x144xbf16, #tpu.memory_space<vmem>>, vector<8x8x144xbf16>
    %75 = vector.shape_cast %74 : vector<8x8x144xbf16> to vector<64x144xbf16>
    %c0_91 = arith.constant 0 : index
    %c0_92 = arith.constant 0 : index
    %76 = vector.load %arg6[%c0_91, %c0_92] : memref<144x128xbf16, #tpu.memory_space<vmem>>, vector<144x128xbf16>
    %cst_93 = arith.constant dense<0.000000e+00> : vector<64x128xf32>
    %77 = tpu.matmul %75, %76, %cst_93 {dimension_numbers = #tpu.dot_dimension_numbers<[1], [0], [0], [1], [0, 0, 1, 1], [], []>} : vector<64x144xbf16>, vector<144x128xbf16>, vector<64x128xf32> -> vector<64x128xf32>
    %c0_94 = arith.constant 0 : index
    %c0_95 = arith.constant 0 : index
    %78 = vector.load %arg7[%c0_94, %c0_95] : memref<1x128xf32, #tpu.memory_space<vmem>>, vector<1x128xf32>
    %79 = vector.broadcast %78 : vector<1x128xf32> to vector<64x128xf32>
    %80 = arith.addf %77, %79 : vector<64x128xf32>
    %cst_96 = arith.constant 0.000000e+00 : f32
    %81 = vector.broadcast %cst_96 : f32 to vector<64x128xf32>
    %82 = arith.maximumf %80, %81 : vector<64x128xf32>
    %83 = vector.shape_cast %82 : vector<64x128xf32> to vector<1x8x8x128xf32>
    %c0_97 = arith.constant 0 : index
    %c0_98 = arith.constant 0 : index
    %c0_99 = arith.constant 0 : index
    %c0_100 = arith.constant 0 : index
    %84 = vector.load %arg16[%c0_97, %c0_98, %c0_99, %c0_100] : memref<1x8x8x128xf32, #tpu.memory_space<vmem>>, vector<1x8x8x128xf32>
    tpu.vector_store %arg16[%c0_97, %c0_98, %c0_99, %c0_100], %83 {strides = array<i32>} : memref<1x8x8x128xf32, #tpu.memory_space<vmem>>, vector<1x8x8x128xf32>,
    %85 = arith.truncf %82 : vector<64x128xf32> to vector<64x128xbf16>
    %c0_101 = arith.constant 0 : index
    %c0_102 = arith.constant 0 : index
    %86 = vector.load %arg8[%c0_101, %c0_102] : memref<128x16xbf16, #tpu.memory_space<vmem>>, vector<128x16xbf16>
    %cst_103 = arith.constant dense<0.000000e+00> : vector<64x16xf32>
    %87 = tpu.matmul %85, %86, %cst_103 {dimension_numbers = #tpu.dot_dimension_numbers<[1], [0], [0], [1], [0, 0, 1, 1], [], []>} : vector<64x128xbf16>, vector<128x16xbf16>, vector<64x16xf32> -> vector<64x16xf32>
    %c0_104 = arith.constant 0 : index
    %c0_105 = arith.constant 0 : index
    %88 = vector.load %arg9[%c0_104, %c0_105] : memref<1x16xf32, #tpu.memory_space<vmem>>, vector<1x16xf32>
    %89 = vector.broadcast %88 : vector<1x16xf32> to vector<64x16xf32>
    %90 = arith.addf %87, %89 : vector<64x16xf32>
    %cst_106 = arith.constant 0.000000e+00 : f32
    %91 = vector.broadcast %cst_106 : f32 to vector<64x16xf32>
    %92 = arith.maximumf %90, %91 : vector<64x16xf32>
    %93 = arith.truncf %92 : vector<64x16xf32> to vector<64x16xbf16>
    %94 = vector.shape_cast %93 : vector<64x16xbf16> to vector<8x8x16xbf16>
    %95 = vector.extract_strided_slice %94 {offsets = [0, 0, 0], sizes = [7, 7, 16], strides = [1, 1, 1]} : vector<8x8x16xbf16> to vector<7x7x16xbf16>
    %c1_107 = arith.constant 1 : index
    %c1_108 = arith.constant 1 : index
    %c0_109 = arith.constant 0 : index
    %96 = vector.load %arg21[%c1_107, %c1_108, %c0_109] : memref<8x8x144xbf16, #tpu.memory_space<vmem>>, vector<7x7x16xbf16>
    tpu.vector_store %arg21[%c1_107, %c1_108, %c0_109], %95 {strides = array<i32>} : memref<8x8x144xbf16, #tpu.memory_space<vmem>>, vector<7x7x16xbf16>,
    %97 = vector.extract_strided_slice %94 {offsets = [0, 0, 0], sizes = [7, 7, 16], strides = [1, 1, 1]} : vector<8x8x16xbf16> to vector<7x7x16xbf16>
    %c1_110 = arith.constant 1 : index
    %c0_111 = arith.constant 0 : index
    %c16_112 = arith.constant 16 : index
    %98 = vector.load %arg21[%c1_110, %c0_111, %c16_112] : memref<8x8x144xbf16, #tpu.memory_space<vmem>>, vector<7x7x16xbf16>
    tpu.vector_store %arg21[%c1_110, %c0_111, %c16_112], %97 {strides = array<i32>} : memref<8x8x144xbf16, #tpu.memory_space<vmem>>, vector<7x7x16xbf16>,
    %99 = vector.extract_strided_slice %94 {offsets = [0, 1, 0], sizes = [7, 6, 16], strides = [1, 1, 1]} : vector<8x8x16xbf16> to vector<7x6x16xbf16>
    %c1_113 = arith.constant 1 : index
    %c0_114 = arith.constant 0 : index
    %c32_115 = arith.constant 32 : index
    %100 = vector.load %arg21[%c1_113, %c0_114, %c32_115] : memref<8x8x144xbf16, #tpu.memory_space<vmem>>, vector<7x6x16xbf16>
    tpu.vector_store %arg21[%c1_113, %c0_114, %c32_115], %99 {strides = array<i32>} : memref<8x8x144xbf16, #tpu.memory_space<vmem>>, vector<7x6x16xbf16>,
    %101 = vector.extract_strided_slice %94 {offsets = [0, 0, 0], sizes = [7, 7, 16], strides = [1, 1, 1]} : vector<8x8x16xbf16> to vector<7x7x16xbf16>
    %c0_116 = arith.constant 0 : index
    %c1_117 = arith.constant 1 : index
    %c48_118 = arith.constant 48 : index
    %102 = vector.load %arg21[%c0_116, %c1_117, %c48_118] : memref<8x8x144xbf16, #tpu.memory_space<vmem>>, vector<7x7x16xbf16>
    tpu.vector_store %arg21[%c0_116, %c1_117, %c48_118], %101 {strides = array<i32>} : memref<8x8x144xbf16, #tpu.memory_space<vmem>>, vector<7x7x16xbf16>,
    %103 = vector.extract_strided_slice %94 {offsets = [0, 0, 0], sizes = [7, 7, 16], strides = [1, 1, 1]} : vector<8x8x16xbf16> to vector<7x7x16xbf16>
    %c0_119 = arith.constant 0 : index
    %c0_120 = arith.constant 0 : index
    %c64_121 = arith.constant 64 : index
    %104 = vector.load %arg21[%c0_119, %c0_120, %c64_121] : memref<8x8x144xbf16, #tpu.memory_space<vmem>>, vector<7x7x16xbf16>
    tpu.vector_store %arg21[%c0_119, %c0_120, %c64_121], %103 {strides = array<i32>} : memref<8x8x144xbf16, #tpu.memory_space<vmem>>, vector<7x7x16xbf16>,
    %105 = vector.extract_strided_slice %94 {offsets = [0, 1, 0], sizes = [7, 6, 16], strides = [1, 1, 1]} : vector<8x8x16xbf16> to vector<7x6x16xbf16>
    %c0_122 = arith.constant 0 : index
    %c0_123 = arith.constant 0 : index
    %c80_124 = arith.constant 80 : index
    %106 = vector.load %arg21[%c0_122, %c0_123, %c80_124] : memref<8x8x144xbf16, #tpu.memory_space<vmem>>, vector<7x6x16xbf16>
    tpu.vector_store %arg21[%c0_122, %c0_123, %c80_124], %105 {strides = array<i32>} : memref<8x8x144xbf16, #tpu.memory_space<vmem>>, vector<7x6x16xbf16>,
    %107 = vector.extract_strided_slice %94 {offsets = [1, 0, 0], sizes = [6, 7, 16], strides = [1, 1, 1]} : vector<8x8x16xbf16> to vector<6x7x16xbf16>
    %c0_125 = arith.constant 0 : index
    %c1_126 = arith.constant 1 : index
    %c96_127 = arith.constant 96 : index
    %108 = vector.load %arg21[%c0_125, %c1_126, %c96_127] : memref<8x8x144xbf16, #tpu.memory_space<vmem>>, vector<6x7x16xbf16>
    tpu.vector_store %arg21[%c0_125, %c1_126, %c96_127], %107 {strides = array<i32>} : memref<8x8x144xbf16, #tpu.memory_space<vmem>>, vector<6x7x16xbf16>,
    %109 = vector.extract_strided_slice %94 {offsets = [1, 0, 0], sizes = [6, 7, 16], strides = [1, 1, 1]} : vector<8x8x16xbf16> to vector<6x7x16xbf16>
    %c0_128 = arith.constant 0 : index
    %c0_129 = arith.constant 0 : index
    %c112_130 = arith.constant 112 : index
    %110 = vector.load %arg21[%c0_128, %c0_129, %c112_130] : memref<8x8x144xbf16, #tpu.memory_space<vmem>>, vector<6x7x16xbf16>
    tpu.vector_store %arg21[%c0_128, %c0_129, %c112_130], %109 {strides = array<i32>} : memref<8x8x144xbf16, #tpu.memory_space<vmem>>, vector<6x7x16xbf16>,
    %111 = vector.extract_strided_slice %94 {offsets = [1, 1, 0], sizes = [6, 6, 16], strides = [1, 1, 1]} : vector<8x8x16xbf16> to vector<6x6x16xbf16>
    %c0_131 = arith.constant 0 : index
    %c0_132 = arith.constant 0 : index
    %c128_133 = arith.constant 128 : index
    %112 = vector.load %arg21[%c0_131, %c0_132, %c128_133] : memref<8x8x144xbf16, #tpu.memory_space<vmem>>, vector<6x6x16xbf16>
    tpu.vector_store %arg21[%c0_131, %c0_132, %c128_133], %111 {strides = array<i32>} : memref<8x8x144xbf16, #tpu.memory_space<vmem>>, vector<6x6x16xbf16>,
    %c0_134 = arith.constant 0 : index
    %c0_135 = arith.constant 0 : index
    %c0_136 = arith.constant 0 : index
    %113 = vector.load %arg21[%c0_134, %c0_135, %c0_136] : memref<8x8x144xbf16, #tpu.memory_space<vmem>>, vector<8x8x144xbf16>
    %114 = vector.shape_cast %113 : vector<8x8x144xbf16> to vector<64x144xbf16>
    %c0_137 = arith.constant 0 : index
    %c0_138 = arith.constant 0 : index
    %115 = vector.load %arg10[%c0_137, %c0_138] : memref<144x128xbf16, #tpu.memory_space<vmem>>, vector<144x128xbf16>
    %cst_139 = arith.constant dense<0.000000e+00> : vector<64x128xf32>
    %116 = tpu.matmul %114, %115, %cst_139 {dimension_numbers = #tpu.dot_dimension_numbers<[1], [0], [0], [1], [0, 0, 1, 1], [], []>} : vector<64x144xbf16>, vector<144x128xbf16>, vector<64x128xf32> -> vector<64x128xf32>
    %c0_140 = arith.constant 0 : index
    %c0_141 = arith.constant 0 : index
    %117 = vector.load %arg11[%c0_140, %c0_141] : memref<1x128xf32, #tpu.memory_space<vmem>>, vector<1x128xf32>
    %118 = vector.broadcast %117 : vector<1x128xf32> to vector<64x128xf32>
    %119 = arith.addf %116, %118 : vector<64x128xf32>
    %cst_142 = arith.constant 0.000000e+00 : f32
    %120 = vector.broadcast %cst_142 : f32 to vector<64x128xf32>
    %121 = arith.maximumf %119, %120 : vector<64x128xf32>
    %122 = vector.shape_cast %121 : vector<64x128xf32> to vector<1x8x8x128xf32>
    %c0_143 = arith.constant 0 : index
    %c0_144 = arith.constant 0 : index
    %c0_145 = arith.constant 0 : index
    %c0_146 = arith.constant 0 : index
    %123 = vector.load %arg17[%c0_143, %c0_144, %c0_145, %c0_146] : memref<1x8x8x128xf32, #tpu.memory_space<vmem>>, vector<1x8x8x128xf32>
    tpu.vector_store %arg17[%c0_143, %c0_144, %c0_145, %c0_146], %122 {strides = array<i32>} : memref<1x8x8x128xf32, #tpu.memory_space<vmem>>, vector<1x8x8x128xf32>,
    %124 = arith.truncf %121 : vector<64x128xf32> to vector<64x128xbf16>
    %c0_147 = arith.constant 0 : index
    %c0_148 = arith.constant 0 : index
    %125 = vector.load %arg12[%c0_147, %c0_148] : memref<128x32xbf16, #tpu.memory_space<vmem>>, vector<128x32xbf16>
    %cst_149 = arith.constant dense<0.000000e+00> : vector<64x32xf32>
    %126 = tpu.matmul %124, %125, %cst_149 {dimension_numbers = #tpu.dot_dimension_numbers<[1], [0], [0], [1], [0, 0, 1, 1], [], []>} : vector<64x128xbf16>, vector<128x32xbf16>, vector<64x32xf32> -> vector<64x32xf32>
    %c0_150 = arith.constant 0 : index
    %c0_151 = arith.constant 0 : index
    %127 = vector.load %arg13[%c0_150, %c0_151] : memref<1x32xf32, #tpu.memory_space<vmem>>, vector<1x32xf32>
    %128 = vector.broadcast %127 : vector<1x32xf32> to vector<64x32xf32>
    %129 = arith.addf %126, %128 : vector<64x32xf32>
    %cst_152 = arith.constant 0.000000e+00 : f32
    %130 = vector.broadcast %cst_152 : f32 to vector<64x32xf32>
    %131 = arith.maximumf %129, %130 : vector<64x32xf32>
    %132 = arith.truncf %131 : vector<64x32xf32> to vector<64x32xbf16>
    %133 = vector.shape_cast %132 : vector<64x32xbf16> to vector<8x8x32xbf16>
    %134 = vector.extract_strided_slice %133 {offsets = [0, 0, 0], sizes = [7, 7, 32], strides = [1, 1, 1]} : vector<8x8x32xbf16> to vector<7x7x32xbf16>
    %c1_153 = arith.constant 1 : index
    %c1_154 = arith.constant 1 : index
    %c0_155 = arith.constant 0 : index
    %135 = vector.load %arg22[%c1_153, %c1_154, %c0_155] : memref<8x8x288xbf16, #tpu.memory_space<vmem>>, vector<7x7x32xbf16>
    tpu.vector_store %arg22[%c1_153, %c1_154, %c0_155], %134 {strides = array<i32>} : memref<8x8x288xbf16, #tpu.memory_space<vmem>>, vector<7x7x32xbf16>,
    %136 = vector.extract_strided_slice %133 {offsets = [0, 0, 0], sizes = [7, 7, 32], strides = [1, 1, 1]} : vector<8x8x32xbf16> to vector<7x7x32xbf16>
    %c1_156 = arith.constant 1 : index
    %c0_157 = arith.constant 0 : index
    %c32_158 = arith.constant 32 : index
    %137 = vector.load %arg22[%c1_156, %c0_157, %c32_158] : memref<8x8x288xbf16, #tpu.memory_space<vmem>>, vector<7x7x32xbf16>
    tpu.vector_store %arg22[%c1_156, %c0_157, %c32_158], %136 {strides = array<i32>} : memref<8x8x288xbf16, #tpu.memory_space<vmem>>, vector<7x7x32xbf16>,
    %138 = vector.extract_strided_slice %133 {offsets = [0, 1, 0], sizes = [7, 6, 32], strides = [1, 1, 1]} : vector<8x8x32xbf16> to vector<7x6x32xbf16>
    %c1_159 = arith.constant 1 : index
    %c0_160 = arith.constant 0 : index
    %c64_161 = arith.constant 64 : index
    %139 = vector.load %arg22[%c1_159, %c0_160, %c64_161] : memref<8x8x288xbf16, #tpu.memory_space<vmem>>, vector<7x6x32xbf16>
    tpu.vector_store %arg22[%c1_159, %c0_160, %c64_161], %138 {strides = array<i32>} : memref<8x8x288xbf16, #tpu.memory_space<vmem>>, vector<7x6x32xbf16>,
    %140 = vector.extract_strided_slice %133 {offsets = [0, 0, 0], sizes = [7, 7, 32], strides = [1, 1, 1]} : vector<8x8x32xbf16> to vector<7x7x32xbf16>
    %c0_162 = arith.constant 0 : index
    %c1_163 = arith.constant 1 : index
    %c96_164 = arith.constant 96 : index
    %141 = vector.load %arg22[%c0_162, %c1_163, %c96_164] : memref<8x8x288xbf16, #tpu.memory_space<vmem>>, vector<7x7x32xbf16>
    tpu.vector_store %arg22[%c0_162, %c1_163, %c96_164], %140 {strides = array<i32>} : memref<8x8x288xbf16, #tpu.memory_space<vmem>>, vector<7x7x32xbf16>,
    %142 = vector.extract_strided_slice %133 {offsets = [0, 0, 0], sizes = [7, 7, 32], strides = [1, 1, 1]} : vector<8x8x32xbf16> to vector<7x7x32xbf16>
    %c0_165 = arith.constant 0 : index
    %c0_166 = arith.constant 0 : index
    %c128_167 = arith.constant 128 : index
    %143 = vector.load %arg22[%c0_165, %c0_166, %c128_167] : memref<8x8x288xbf16, #tpu.memory_space<vmem>>, vector<7x7x32xbf16>
    tpu.vector_store %arg22[%c0_165, %c0_166, %c128_167], %142 {strides = array<i32>} : memref<8x8x288xbf16, #tpu.memory_space<vmem>>, vector<7x7x32xbf16>,
    %144 = vector.extract_strided_slice %133 {offsets = [0, 1, 0], sizes = [7, 6, 32], strides = [1, 1, 1]} : vector<8x8x32xbf16> to vector<7x6x32xbf16>
    %c0_168 = arith.constant 0 : index
    %c0_169 = arith.constant 0 : index
    %c160 = arith.constant 160 : index
    %145 = vector.load %arg22[%c0_168, %c0_169, %c160] : memref<8x8x288xbf16, #tpu.memory_space<vmem>>, vector<7x6x32xbf16>
    tpu.vector_store %arg22[%c0_168, %c0_169, %c160], %144 {strides = array<i32>} : memref<8x8x288xbf16, #tpu.memory_space<vmem>>, vector<7x6x32xbf16>,
    %146 = vector.extract_strided_slice %133 {offsets = [1, 0, 0], sizes = [6, 7, 32], strides = [1, 1, 1]} : vector<8x8x32xbf16> to vector<6x7x32xbf16>
    %c0_170 = arith.constant 0 : index
    %c1_171 = arith.constant 1 : index
    %c192 = arith.constant 192 : index
    %147 = vector.load %arg22[%c0_170, %c1_171, %c192] : memref<8x8x288xbf16, #tpu.memory_space<vmem>>, vector<6x7x32xbf16>
    tpu.vector_store %arg22[%c0_170, %c1_171, %c192], %146 {strides = array<i32>} : memref<8x8x288xbf16, #tpu.memory_space<vmem>>, vector<6x7x32xbf16>,
    %148 = vector.extract_strided_slice %133 {offsets = [1, 0, 0], sizes = [6, 7, 32], strides = [1, 1, 1]} : vector<8x8x32xbf16> to vector<6x7x32xbf16>
    %c0_172 = arith.constant 0 : index
    %c0_173 = arith.constant 0 : index
    %c224 = arith.constant 224 : index
    %149 = vector.load %arg22[%c0_172, %c0_173, %c224] : memref<8x8x288xbf16, #tpu.memory_space<vmem>>, vector<6x7x32xbf16>
    tpu.vector_store %arg22[%c0_172, %c0_173, %c224], %148 {strides = array<i32>} : memref<8x8x288xbf16, #tpu.memory_space<vmem>>, vector<6x7x32xbf16>,
    %150 = vector.extract_strided_slice %133 {offsets = [1, 1, 0], sizes = [6, 6, 32], strides = [1, 1, 1]} : vector<8x8x32xbf16> to vector<6x6x32xbf16>
    %c0_174 = arith.constant 0 : index
    %c0_175 = arith.constant 0 : index
    %c256 = arith.constant 256 : index
    %151 = vector.load %arg22[%c0_174, %c0_175, %c256] : memref<8x8x288xbf16, #tpu.memory_space<vmem>>, vector<6x6x32xbf16>
    tpu.vector_store %arg22[%c0_174, %c0_175, %c256], %150 {strides = array<i32>} : memref<8x8x288xbf16, #tpu.memory_space<vmem>>, vector<6x6x32xbf16>,
    %c0_176 = arith.constant 0 : index
    %c0_177 = arith.constant 0 : index
    %c0_178 = arith.constant 0 : index
    %152 = vector.load %arg22[%c0_176, %c0_177, %c0_178] : memref<8x8x288xbf16, #tpu.memory_space<vmem>>, vector<8x8x288xbf16>
    %153 = vector.shape_cast %152 : vector<8x8x288xbf16> to vector<64x288xbf16>
    %c0_179 = arith.constant 0 : index
    %c0_180 = arith.constant 0 : index
    %154 = vector.load %arg14[%c0_179, %c0_180] : memref<288x256xbf16, #tpu.memory_space<vmem>>, vector<288x256xbf16>
    %cst_181 = arith.constant dense<0.000000e+00> : vector<64x256xf32>
    %155 = tpu.matmul %153, %154, %cst_181 {dimension_numbers = #tpu.dot_dimension_numbers<[1], [0], [0], [1], [0, 0, 1, 1], [], []>} : vector<64x288xbf16>, vector<288x256xbf16>, vector<64x256xf32> -> vector<64x256xf32>
    %c0_182 = arith.constant 0 : index
    %c0_183 = arith.constant 0 : index
    %156 = vector.load %arg15[%c0_182, %c0_183] : memref<1x256xf32, #tpu.memory_space<vmem>>, vector<1x256xf32>
    %157 = vector.broadcast %156 : vector<1x256xf32> to vector<64x256xf32>
    %158 = arith.addf %155, %157 : vector<64x256xf32>
    %cst_184 = arith.constant 0.000000e+00 : f32
    %159 = vector.broadcast %cst_184 : f32 to vector<64x256xf32>
    %160 = arith.maximumf %158, %159 : vector<64x256xf32>
    %161 = vector.shape_cast %160 : vector<64x256xf32> to vector<1x8x8x256xf32>
    %c0_185 = arith.constant 0 : index
    %c0_186 = arith.constant 0 : index
    %c0_187 = arith.constant 0 : index
    %c0_188 = arith.constant 0 : index
    %162 = vector.load %arg18[%c0_185, %c0_186, %c0_187, %c0_188] : memref<1x8x8x256xf32, #tpu.memory_space<vmem>>, vector<1x8x8x256xf32>
    tpu.vector_store %arg18[%c0_185, %c0_186, %c0_187, %c0_188], %161 {strides = array<i32>} : memref<1x8x8x256xf32, #tpu.memory_space<vmem>>, vector<1x8x8x256xf32>,
    return
  }
  func.func @transform_0(%arg0: i32) -> (i32, i32, i32, i32) {
    %c0_i32 = arith.constant 0 : i32
    %c0_i32_0 = arith.constant 0 : i32
    %c0_i32_1 = arith.constant 0 : i32
    %c0_i32_2 = arith.constant 0 : i32
    return %c0_i32, %arg0, %c0_i32_0, %c0_i32_1 : i32, i32, i32, i32
  }
  func.func @transform_1(%arg0: i32) -> (i32, i32) {
    %c0_i32 = arith.constant 0 : i32
    %c0_i32_0 = arith.constant 0 : i32
    %c0_i32_1 = arith.constant 0 : i32
    return %c0_i32, %c0_i32_0 : i32, i32
  }
  func.func @transform_2(%arg0: i32) -> (i32, i32) {
    %c0_i32 = arith.constant 0 : i32
    %c0_i32_0 = arith.constant 0 : i32
    %c0_i32_1 = arith.constant 0 : i32
    return %c0_i32, %c0_i32_0 : i32, i32
  }
  func.func @transform_3(%arg0: i32) -> (i32, i32) {
    %c0_i32 = arith.constant 0 : i32
    %c0_i32_0 = arith.constant 0 : i32
    %c0_i32_1 = arith.constant 0 : i32
    return %c0_i32, %c0_i32_0 : i32, i32
  }
  func.func @transform_4(%arg0: i32) -> (i32, i32) {
    %c0_i32 = arith.constant 0 : i32
    %c0_i32_0 = arith.constant 0 : i32
    %c0_i32_1 = arith.constant 0 : i32
    return %c0_i32, %c0_i32_0 : i32, i32
  }
  func.func @transform_5(%arg0: i32) -> (i32, i32) {
    %c0_i32 = arith.constant 0 : i32
    %c0_i32_0 = arith.constant 0 : i32
    %c0_i32_1 = arith.constant 0 : i32
    return %c0_i32, %c0_i32_0 : i32, i32
  }
  func.func @transform_6(%arg0: i32) -> (i32, i32) {
    %c0_i32 = arith.constant 0 : i32
    %c0_i32_0 = arith.constant 0 : i32
    %c0_i32_1 = arith.constant 0 : i32
    return %c0_i32, %c0_i32_0 : i32, i32
  }
  func.func @transform_7(%arg0: i32) -> (i32, i32) {
    %c0_i32 = arith.constant 0 : i32
    %c0_i32_0 = arith.constant 0 : i32
    %c0_i32_1 = arith.constant 0 : i32
    return %c0_i32, %c0_i32_0 : i32, i32
  }
  func.func @transform_8(%arg0: i32) -> (i32, i32) {
    %c0_i32 = arith.constant 0 : i32
    %c0_i32_0 = arith.constant 0 : i32
    %c0_i32_1 = arith.constant 0 : i32
    return %c0_i32, %c0_i32_0 : i32, i32
  }
  func.func @transform_9(%arg0: i32) -> (i32, i32) {
    %c0_i32 = arith.constant 0 : i32
    %c0_i32_0 = arith.constant 0 : i32
    %c0_i32_1 = arith.constant 0 : i32
    return %c0_i32, %c0_i32_0 : i32, i32
  }
  func.func @transform_10(%arg0: i32) -> (i32, i32) {
    %c0_i32 = arith.constant 0 : i32
    %c0_i32_0 = arith.constant 0 : i32
    %c0_i32_1 = arith.constant 0 : i32
    return %c0_i32, %c0_i32_0 : i32, i32
  }
  func.func @transform_11(%arg0: i32) -> (i32, i32) {
    %c0_i32 = arith.constant 0 : i32
    %c0_i32_0 = arith.constant 0 : i32
    %c0_i32_1 = arith.constant 0 : i32
    return %c0_i32, %c0_i32_0 : i32, i32
  }
  func.func @transform_12(%arg0: i32) -> (i32, i32) {
    %c0_i32 = arith.constant 0 : i32
    %c0_i32_0 = arith.constant 0 : i32
    %c0_i32_1 = arith.constant 0 : i32
    return %c0_i32, %c0_i32_0 : i32, i32
  }
  func.func @transform_13(%arg0: i32) -> (i32, i32) {
    %c0_i32 = arith.constant 0 : i32
    %c0_i32_0 = arith.constant 0 : i32
    %c0_i32_1 = arith.constant 0 : i32
    return %c0_i32, %c0_i32_0 : i32, i32
  }
  func.func @transform_14(%arg0: i32) -> (i32, i32) {
    %c0_i32 = arith.constant 0 : i32
    %c0_i32_0 = arith.constant 0 : i32
    %c0_i32_1 = arith.constant 0 : i32
    return %c0_i32, %c0_i32_0 : i32, i32
  }
  func.func @transform_15(%arg0: i32) -> (i32, i32, i32, i32) {
    %c0_i32 = arith.constant 0 : i32
    %c0_i32_0 = arith.constant 0 : i32
    %c0_i32_1 = arith.constant 0 : i32
    %c0_i32_2 = arith.constant 0 : i32
    return %arg0, %c0_i32, %c0_i32_0, %c0_i32_1 : i32, i32, i32, i32
  }
  func.func @transform_16(%arg0: i32) -> (i32, i32, i32, i32) {
    %c0_i32 = arith.constant 0 : i32
    %c0_i32_0 = arith.constant 0 : i32
    %c0_i32_1 = arith.constant 0 : i32
    %c0_i32_2 = arith.constant 0 : i32
    return %arg0, %c0_i32, %c0_i32_0, %c0_i32_1 : i32, i32, i32, i32
  }
  func.func @transform_17(%arg0: i32) -> (i32, i32, i32, i32) {
    %c0_i32 = arith.constant 0 : i32
    %c0_i32_0 = arith.constant 0 : i32
    %c0_i32_1 = arith.constant 0 : i32
    %c0_i32_2 = arith.constant 0 : i32
    return %arg0, %c0_i32, %c0_i32_0, %c0_i32_1 : i32, i32, i32, i32
  }
}

</mosaic_0001>

<bundles_post_ra>
// kernel: feat_squeezenet_light_forward.1
= control target key start
LH: loop header
LB: loop body
LE: loop exit
PB: predicated region body
PF: predicated region fallthrough
CT: control target
= control target key end

     0   :  { %s5962_s0 = inlined_call_operand.vmem [shape: bf16[4,2,64,64], index: 0, kind: input, shape index: {}]   ;;  %s5963_s1 = inlined_call_operand.vmem [shape: bf16[64,128], index: 1, kind: input, shape index: {}]   ;;  %s5964_s2 = inlined_call_operand.vmem [shape: f32[1,128], index: 2, kind: input, shape index: {}]   ;;  %s5965_s3 = inlined_call_operand.vmem [shape: bf16[128,16], index: 3, kind: input, shape index: {}]   ;;  %s5966_s4 = inlined_call_operand.vmem [shape: f32[1,16], index: 4, kind: input, shape index: {}]   ;;  %s5967_s5 = inlined_call_operand.vmem [shape: bf16[144,128], index: 5, kind: input, shape index: {}]   ;;  %s5968_s6 = inlined_call_operand.vmem [shape: f32[1,128], index: 6, kind: input, shape index: {}]   ;;  %s5969_s7 = inlined_call_operand.vmem [shape: bf16[128,16], index: 7, kind: input, shape index: {}]   ;;  %s5970_s8 = inlined_call_operand.vmem [shape: f32[1,16], index: 8, kind: input, shape index: {}]   ;;  %s5971_s9 = inlined_call_operand.vmem [shape: bf16[144,128], index: 9, kind: input, shape index: {}]   ;;  %s5972_s10 = inlined_call_operand.vmem [shape: f32[1,128], index: 10, kind: input, shape index: {}]   ;;  %s5973_s11 = inlined_call_operand.vmem [shape: bf16[128,32], index: 11, kind: input, shape index: {}]   ;;  %s5974_s12 = inlined_call_operand.vmem [shape: f32[1,32], index: 12, kind: input, shape index: {}]   ;;  %s5975_s13 = inlined_call_operand.vmem [shape: bf16[288,256], index: 13, kind: input, shape index: {}]   ;;  %s5976_s14 = inlined_call_operand.vmem [shape: f32[1,256], index: 14, kind: input, shape index: {}]   ;;  %s5977_s15 = inlined_call_operand.vmem [shape: f32[2,8,8,128], index: 15, kind: output, shape index: {0}]   ;;  %s5978_s16 = inlined_call_operand.vmem [shape: f32[2,8,8,128], index: 16, kind: output, shape index: {1}]   ;;  %s5979_s17 = inlined_call_operand.vmem [shape: f32[2,8,8,256], index: 17, kind: output, shape index: {2}]  }
   0x1   :  { %5996 = sst [smem:[#allocation8_spill]] %s5962_s0 }
   0x2   :  { %5997 = sst [smem:[#allocation9_spill]] %s5963_s1 }
   0x3   :  { %5998 = sst [smem:[#allocation10_spill]] %s5964_s2 }
   0x4   :  { %5999 = sst [smem:[#allocation11_spill]] %s5965_s3 }
   0x5   :  { %s4659_s24 = smov 0   ;;  %s4661_s25 = smov 0  }
   0x6   :  { %s4663_s26 = smov 0  }
   0x7 LB: > { %s4676_s28 = sadd.s32 1, %s4558_s26   ;;  %s35_s0 = sadd.s32 1, %s4554_s25  ;;  %s4558_s26 = sphi %s4663_s26, %s6042_s26   ;;  %s4554_s25 = sphi %s4661_s25, %s6041_s25   ;;  %s4550_s24 = sphi %s4659_s24, %s6040_s24  }
   0x8   : > { %s32_s29 = ssub.s32 %s4558_s26, %s4676_s28  ;;  %p42_p1 = scmp.ne.s32.totalorder %s4554_s25, %s4550_s24 }
   0x9   : > { %p33_p0 = scmp.eq.s32.totalorder %s32_s29, 0  ;;  %p43_p2 = scmp.eq.s32.totalorder %s4558_s26, 0 }
   0xa   : > { %p3815_p4 = scmp.ge.s32.totalorder %s4558_s26, 2 }
   0xb   : > { %s4685_s30 = scalar_select %p33_p0, %s4554_s25, %s35_s0  }
   0xc   : > { %p44_p3 = por %p43_p2, %p42_p1  ;;  %482 = sbr.rel (%p3815_p4) target bundleno = 43 (0x2b), region = 72 }
   0xd   : > { %6000 = sst [smem:[#allocation7_spill]] %s4685_s30 }
  0x11   : > { %485 = sbr.rel (!%p44_p3) target bundleno = 43 (0x2b), region = 76  ;;  %s487_s18 = sand.u32 (%p44_p3), 1, %s4554_s25  }
  0x12   : > { %s4365_s19 = sshll.u32 (%p44_p3), %s4558_s26, 5  ;;  %s3816_s1 = sshll.u32 (%p44_p3), %s487_s18, 7 }
  0x13   : > { %s6001_s22 = sld [smem:[#allocation8_spill]] (%p44_p3)  ;;  %s489_s29 = scalar_lea.vmem (%p44_p3), [#allocation6], %s3816_s1 }
  0x19   : > { %s4693_s23 = scalar_lea.vmem %s6001_s22, %s4365_s19 }
  0x1a   : > { %v509_v0 = vld [vmem:[%s4693_s23] sm:$0xff]   ;;  %v513_v1 = vld [vmem:[%s4693_s23 + $0x8] sm:$0xff]   ;;  %v517_v2 = vld [vmem:[%s4693_s23 + $0x10] sm:$0xff]  }
  0x1b   : > { %510 = vst [vmem:[%s489_s29] sm:$0xff] %v509_v0   ;;  %v521_v3 = vld [vmem:[%s4693_s23 + $0x18] sm:$0xff]   ;;  %v525_v4 = vld [vmem:[%s4693_s23 + $0x40] sm:$0xff]   ;;  %v529_v5 = vld [vmem:[%s4693_s23 + $0x48] sm:$0xff]  }
  0x1c   : > { %514 = vst [vmem:[%s489_s29 + $0x8] sm:$0xff] %v513_v1   ;;  %v533_v6 = vld [vmem:[%s4693_s23 + $0x50] sm:$0xff]   ;;  %v537_v7 = vld [vmem:[%s4693_s23 + $0x58] sm:$0xff]   ;;  %v541_v8 = vld [vmem:[%s4693_s23 + $0x80] sm:$0xff]  }
  0x1d   : > { %518 = vst [vmem:[%s489_s29 + $0x10] sm:$0xff] %v517_v2   ;;  %v545_v9 = vld [vmem:[%s4693_s23 + $0x88] sm:$0xff]   ;;  %v549_v10 = vld [vmem:[%s4693_s23 + $0x90] sm:$0xff]   ;;  %v553_v11 = vld [vmem:[%s4693_s23 + $0x98] sm:$0xff]  }
  0x1e   : > { %522 = vst [vmem:[%s489_s29 + $0x18] sm:$0xff] %v521_v3   ;;  %v557_v12 = vld [vmem:[%s4693_s23 + $0xc0] sm:$0xff]   ;;  %v561_v13 = vld [vmem:[%s4693_s23 + $0xc8] sm:$0xff]   ;;  %v565_v14 = vld [vmem:[%s4693_s23 + $0xd0] sm:$0xff]  }
  0x1f   : > { %526 = vst [vmem:[%s489_s29 + $0x20] sm:$0xff] %v525_v4   ;;  %v569_v15 = vld [vmem:[%s4693_s23 + $0xd8] sm:$0xff]  }
  0x20   : > { %530 = vst [vmem:[%s489_s29 + $0x28] sm:$0xff] %v529_v5  }
  0x21   : > { %534 = vst [vmem:[%s489_s29 + $0x30] sm:$0xff] %v533_v6  }
  0x22   : > { %538 = vst [vmem:[%s489_s29 + $0x38] sm:$0xff] %v537_v7  }
  0x23   : > { %542 = vst [vmem:[%s489_s29 + $0x40] sm:$0xff] %v541_v8  }
  0x24   : > { %546 = vst [vmem:[%s489_s29 + $0x48] sm:$0xff] %v545_v9  }
  0x25   : > { %550 = vst [vmem:[%s489_s29 + $0x50] sm:$0xff] %v549_v10  }
  0x26   : > { %554 = vst [vmem:[%s489_s29 + $0x58] sm:$0xff] %v553_v11  }
  0x27   : > { %558 = vst [vmem:[%s489_s29 + $0x60] sm:$0xff] %v557_v12  }
  0x28   : > { %562 = vst [vmem:[%s489_s29 + $0x68] sm:$0xff] %v561_v13  }
  0x29   : > { %566 = vst [vmem:[%s489_s29 + $0x70] sm:$0xff] %v565_v14  }
  0x2a   : > { %570 = vst [vmem:[%s489_s29 + $0x78] sm:$0xff] %v569_v15  }
  0x2b PF: > { %p3819_p5 = scmp.ge.s32.totalorder %s4558_s26, 1  ;;  %p659_p6 = scmp.lt.s32.totalorder %s4558_s26, 3 }
  0x2d   : > { %p660_p7 = pnand %p3819_p5, %p659_p6 }
  0x2e   : > { %s6002_s19 = sld [smem:[#allocation9_spill]] (!%p660_p7)  ;;  %s666_s21 = sand.u32 (!%p660_p7), 1, %s4550_s24  }
  0x2f   : > { %663 = sbr.rel (%p660_p7) target bundleno = 1965 (0x7ad), region = 117  ;;  %s3820_s29 = sshll.u32 (!%p660_p7), %s666_s21, 7 }
  0x30   : > { %s4726_s0 = scalar_lea.vmem (!%p660_p7), [#allocation6], %s3820_s29  ;;  %s6003_s2 = sld [smem:[#allocation10_spill]] (!%p660_p7) }
  0x31   : > { %s6004_s3 = sld [smem:[#allocation11_spill]] (!%p660_p7)  ;;  %s5994_s24 = smov (!%p660_p7), 64  }
  0x32   : > { %s5991_s27 = smov (!%p660_p7), 16   ;;  %s5987_s30 = smov (!%p660_p7), 48  }
  0x33   : > { %s5989_s18 = smov (!%p660_p7), 32   ;;  %s5981_s1 = smov (!%p660_p7), 80  }
  0x34   : > { %v4388_v16 = vld [vmem:[%s6002_s19 + $0x18] sm:$0xff]  ;;  %v4387_v17 = vld [vmem:[%s6002_s19 + $0x10] sm:$0xff]  ;;  %v4386_v18 = vld [vmem:[%s6002_s19 + $0x8] sm:$0xff]  ;;  %vm891_vm0 = vcmask 523264   ;;  %vm1244_vm1 = vcmask 1043456   ;;  %vm1245_vm2 = vcmask 130052  }
  0x35   : > { %944 = vmatpush.bf16.msra.mxu0 %v4388_v16  ;;  %v4385_v19 = vld [vmem:[%s6002_s19] sm:$0xff]  ;;  %v4370_v21 = vld [vmem:[%s4726_s0 + $0x8] sm:$0xff]  ;;  %v4371_v22 = vld [vmem:[%s4726_s0 + $0x10] sm:$0xff]  ;;  %vm1439_vm4 = vcmask 125952   ;;  %vm1440_vm5 = vsmask.f32 7938 }
  0x36   : > { %v4369_v20 = vld [vmem:[%s4726_s0] sm:$0xff]  ;;  %v4372_v23 = vld [vmem:[%s4726_s0 + $0x18] sm:$0xff]  ;;  %v4374_v25 = vld [vmem:[%s4726_s0 + $0x28] sm:$0xff]  ;;  %vm1771_vm7 = vcmask 124928   ;;  %s5983_s20 = smov 96   ;;  %s5985_s21 = smov 112  }
  0x37   : > { %v4373_v24 = vld [vmem:[%s4726_s0 + $0x20] sm:$0xff]  ;;  %v4375_v26 = vld [vmem:[%s4726_s0 + $0x30] sm:$0xff]  ;;  %v4376_v27 = vld [vmem:[%s4726_s0 + $0x38] sm:$0xff]  ;;  %vm1898_vm8 = vcmask 130048   ;;  %vm1491_vm9 = vcmask 257152   ;;  %vm1593_vm12 = vcmask 519552  }
  0x38   : > { %v4747_v28 = vld [vmem:[%s6003_s2] ss:$0 sm:$0xff]  ;;  %v4378_v36 = vld [vmem:[%s4726_s0 + $0x48] sm:$0xff]  ;;  %v4379_v43 = vld [vmem:[%s4726_s0 + $0x50] sm:$0xff]  ;;  %vm1492_vm10 = vsmask.f32 3328 }
  0x39   : > { %945 = vmatpush.bf16.msra.mxu0 %v4387_v17  ;;  %v4377_v29 = vld [vmem:[%s4726_s0 + $0x40] sm:$0xff]  ;;  %v4380_v50 = vld [vmem:[%s4726_s0 + $0x58] sm:$0xff]  ;;  %v4382_v0 = vld [vmem:[%s4726_s0 + $0x68] sm:$0xff]  ;;  %vm1564_vm14 = vcmask 387328   ;;  %vm1637_vm15 = vcmask 650752   ;;  %s6020_s23 = smov 32  }
  0x3a   : > { %v4381_v57 = vld [vmem:[%s4726_s0 + $0x60] sm:$0xff]  ;;  %v4383_v7 = vld [vmem:[%s4726_s0 + $0x70] sm:$0xff]  ;;  %v4384_v14 = vld [vmem:[%s4726_s0 + $0x78] sm:$0xff]  ;;  %s6021_s29 = smov 48   ;;  %s6022_s0 = smov 112  }
  0x3b   : > { %vm1246_vm3 = vmor %vm1245_vm2, %vm1244_vm1  ;;  %vm1681_vm1 = vcmask 780928   ;;  %vm1707_vm2 = vcmask 913152  }
  0x3c   : > { %vm4832_vm6 = vmand %vm1439_vm4, %vm1440_vm5  ;;  %vm1745_vm4 = vcmask 1044352  }
  0x3d   : > { %946 = vmatpush.bf16.msra.mxu0 %v4386_v18  ;;  %vm4955_vm11 = vmand %vm1491_vm9, %vm1492_vm10 }
  0x3e   : > { %vm4977_vm13 = vmand %vm1593_vm12, %vm1440_vm5  ;;  %vm3466_vm12 = vcmask 261120  }
  0x3f   : > { %vm5031_vm9 = vmand %vm1745_vm4, %vm1492_vm10 }
  0x41   : > { %947 = vmatpush.bf16.msra.mxu0 %v4385_v19 }
  0x44   : > { %3907 = vmatmul.msk.bf16.vlgmr.msra.gmra.mxu0 %vm891_vm0, %v4369_v20 }
  0x54   : > { %3908 = vmatmul.msk.bf16.gmra.mxu0 %vm891_vm0, %v4370_v21 }
  0x64   : > { %3909 = vmatmul.msk.bf16.gmra.mxu0 %vm891_vm0, %v4371_v22 }
  0x74   : > { %3910 = vmatmul.msk.bf16.gmra.mxu0 %vm891_vm0, %v4372_v23 }
  0x84   : > { %3911 = vmatmul.msk.bf16.gmra.mxu0 %vm891_vm0, %v4373_v24 }
  0x94   : > { %3912 = vmatmul.msk.bf16.gmra.mxu0 %vm891_vm0, %v4374_v25 }
  0xa4   : > { %3913 = vmatmul.msk.bf16.gmra.mxu0 %vm891_vm0, %v4375_v26 }
  0xb4   : > { %3914 = vmatmul.msk.bf16.gmra.mxu0 %vm891_vm0, %v4376_v27 }
  0xc1   : > { %v949_v30 = vpop.f32.mrf.mxu0 }
  0xc2   : > { %v950_v31 = vadd.f32 %v4747_v28, %v949_v30 }
  0xc4   : > { %v1029_v32 = vmax.f32 %v950_v31, 0.0  ;;  %3915 = vmatmul.msk.bf16.gmra.mxu0 %vm891_vm0, %v4377_v29 }
  0xc6   : > { %1061 = vst [vmem:[#allocation2] sm:$0xff] %v1029_v32 }
  0xc9   : > { %v951_v33 = vpop.f32.mrf.mxu0 }
  0xca   : > { %v952_v34 = vadd.f32 %v4747_v28, %v951_v33 }
  0xcc   : > { %v1030_v35 = vmax.f32 %v952_v34, 0.0 }
  0xce   : > { %1062 = vst [vmem:[#allocation2 + $0x8] sm:$0xff] %v1030_v35 }
  0xd1   : > { %v954_v37 = vpop.f32.mrf.mxu0 }
  0xd2   : > { %v955_v38 = vadd.f32 %v4747_v28, %v954_v37 }
  0xd4   : > { %v1031_v39 = vmax.f32 %v955_v38, 0.0  ;;  %3916 = vmatmul.msk.bf16.gmra.mxu0 %vm891_vm0, %v4378_v36 }
  0xd6   : > { %1063 = vst [vmem:[#allocation2 + $0x10] sm:$0xff] %v1031_v39  ;;  %v4396_v39 = vld [vmem:[%s6004_s3 + $0x38] sm:$0xff] }
  0xd7   : > { %1340 = vmatpush.bf16.msra.mxu1 %v4396_v39 }
  0xd9   : > { %v956_v40 = vpop.f32.mrf.mxu0 }
  0xda   : > { %v957_v41 = vadd.f32 %v4747_v28, %v956_v40 }
  0xdc   : > { %v1032_v42 = vmax.f32 %v957_v41, 0.0  ;;  %v4395_v41 = vld [vmem:[%s6004_s3 + $0x30] sm:$0xff] }
  0xdd   : > { %1341 = vmatpush.bf16.msra.mxu1 %v4395_v41 }
  0xde   : > { %1064 = vst [vmem:[#allocation2 + $0x18] sm:$0xff] %v1032_v42 }
  0xe1   : > { %v959_v44 = vpop.f32.mrf.mxu0 }
  0xe2   : > { %v960_v45 = vadd.f32 %v4747_v28, %v959_v44  ;;  %v4394_v44 = vld [vmem:[%s6004_s3 + $0x28] sm:$0xff] }
  0xe3   : > { %1342 = vmatpush.bf16.msra.mxu1 %v4394_v44 }
  0xe4   : > { %v1033_v46 = vmax.f32 %v960_v45, 0.0  ;;  %3917 = vmatmul.msk.bf16.gmra.mxu0 %vm891_vm0, %v4379_v43 }
  0xe6   : > { %1065 = vst [vmem:[#allocation2 + $0x20] sm:$0xff] %v1033_v46  ;;  %v4393_v46 = vld [vmem:[%s6004_s3 + $0x20] sm:$0xff] }
  0xe7   : > { %1343 = vmatpush.bf16.msra.mxu1 %v4393_v46 }
  0xe9   : > { %v961_v47 = vpop.f32.mrf.mxu0 }
  0xea   : > { %v962_v48 = vadd.f32 %v4747_v28, %v961_v47  ;;  %v4560_v47 = vmov 0.0  }
  0xeb   : > { %1217 = vst [vmem:[#allocation3 + $0x30] sm:$0xff] %v4560_v47 }
  0xec   : > { %v1034_v49 = vmax.f32 %v962_v48, 0.0  ;;  %1218 = vst [vmem:[#allocation3] sm:$0xff] %v4560_v47 }
  0xed   : > { %1219 = vst [vmem:[#allocation3 + $0x18] sm:$0xff] %v4560_v47 }
  0xee   : > { %1066 = vst [vmem:[#allocation2 + $0x28] sm:$0xff] %v1034_v49  ;;  %v4392_v49 = vld [vmem:[%s6004_s3 + $0x18] sm:$0xff] }
  0xef   : > { %1220 = vst [vmem:[#allocation3 + $0x10] sm:$0xff] %v4560_v47  ;;  %1344 = vmatpush.bf16.msra.mxu1 %v4392_v49 }
  0xf0   : > { %1221 = vst [vmem:[#allocation3 + $0x8] sm:$0xff] %v4560_v47 }
  0xf1   : > { %v964_v51 = vpop.f32.mrf.mxu0  ;;  %1222 = vst [vmem:[#allocation3 + $0x20] sm:$0xff] %v4560_v47 }
  0xf2   : > { %v965_v52 = vadd.f32 %v4747_v28, %v964_v51  ;;  %1223 = vst [vmem:[#allocation3 + $0x28] sm:$0xff] %v4560_v47 }
  0xf4   : > { %v1035_v53 = vmax.f32 %v965_v52, 0.0  ;;  %3918 = vmatmul.msk.bf16.gmra.mxu0 %vm891_vm0, %v4380_v50  ;;  %v4391_v50 = vld [vmem:[%s6004_s3 + $0x10] sm:$0xff] }
  0xf5   : > { %1345 = vmatpush.bf16.msra.mxu1 %v4391_v50  ;;  %v1118_v50 = vld [vmem:[#allocation2 + $0x19] sm:$0x7f] }
  0xf6   : > { %1067 = vst [vmem:[#allocation2 + $0x30] sm:$0xff] %v1035_v53  ;;  %v4390_v53 = vld [vmem:[%s6004_s3 + $0x8] sm:$0xff] }
  0xf9   : > { %v966_v54 = vpop.f32.mrf.mxu0  ;;  %1346 = vmatpush.bf16.msra.mxu1 %v4390_v53 }
  0xfa   : > { %v967_v55 = vadd.f32 %v4747_v28, %v966_v54 }
  0xfc   : > { %v1036_v56 = vmax.f32 %v967_v55, 0.0 }
  0xfe   : > { %1068 = vst [vmem:[#allocation2 + $0x38] sm:$0xff] %v1036_v56  ;;  %v1093_v56 = vld [vmem:[#allocation2] sm:$0x7f] }
 0x101   : > { %v969_v58 = vpop.f32.mrf.mxu0 }
 0x102   : > { %v970_v59 = vadd.f32 %v4747_v28, %v969_v58  ;;  %v4389_v58 = vld [vmem:[%s6004_s3] sm:$0xff] }
 0x103   : > { %1347 = vmatpush.bf16.msra.mxu1 %v4389_v58 }
 0x104   : > { %v1037_v60 = vmax.f32 %v970_v59, 0.0  ;;  %3919 = vmatmul.msk.bf16.gmra.mxu0 %vm891_vm0, %v4381_v57  ;;  %v1115_v59 = vld [vmem:[#allocation2 + $0x1] sm:$0x7f] }
 0x106   : > { %1069 = vst [vmem:[#allocation2 + $0x40] sm:$0xff] %v1037_v60 }
 0x109   : > { %v971_v61 = vpop.f32.mrf.mxu0 }
 0x10a   : > { %v972_v62 = vadd.f32 %v4747_v28, %v971_v61 }
 0x10c   : > { %v1038_v63 = vmax.f32 %v972_v62, 0.0 }
 0x10d   : > { %v1101_v54 = vld [vmem:[#allocation2 + $0x40] sm:$0x7f] }
 0x10e   : > { %1070 = vst [vmem:[#allocation2 + $0x48] sm:$0xff] %v1038_v63  ;;  %v1108_v57 = vmax.f32 %v1093_v56, %v1101_v54 }
 0x110   : > { %v1122_v62 = vmax.f32 %v1108_v57, %v1115_v59 }
 0x111   : > { %v974_v1 = vpop.f32.mrf.mxu0 }
 0x112   : > { %v975_v2 = vadd.f32 %v4747_v28, %v974_v1 }
 0x114   : > { %v1039_v3 = vmax.f32 %v975_v2, 0.0  ;;  %3920 = vmatmul.msk.bf16.gmra.mxu0 %vm891_vm0, %v4382_v0 }
 0x115   : > { %v1102_v0 = vld [vmem:[#allocation2 + $0x48] sm:$0x7f] }
 0x116   : > { %1071 = vst [vmem:[#allocation2 + $0x50] sm:$0xff] %v1039_v3  ;;  %v1094_v3 = vld [vmem:[#allocation2 + $0x8] sm:$0x7f] }
 0x119   : > { %v976_v4 = vpop.f32.mrf.mxu0 }
 0x11a   : > { %v977_v5 = vadd.f32 %v4747_v28, %v976_v4 }
 0x11c   : > { %v1040_v6 = vmax.f32 %v977_v5, 0.0  ;;  %v1109_v5 = vmax.f32 %v1094_v3, %v1102_v0 }
 0x11e   : > { %1072 = vst [vmem:[#allocation2 + $0x58] sm:$0xff] %v1040_v6 }
 0x121   : > { %v979_v8 = vpop.f32.mrf.mxu0 }
 0x122   : > { %v980_v9 = vadd.f32 %v4747_v28, %v979_v8 }
 0x124   : > { %v1041_v10 = vmax.f32 %v980_v9, 0.0  ;;  %3921 = vmatmul.msk.bf16.gmra.mxu0 %vm891_vm0, %v4383_v7  ;;  %v1116_v9 = vld [vmem:[#allocation2 + $0x9] sm:$0x7f] }
 0x125   : > { %v1191_v57 = vld [vmem:[#allocation2 + $0x58] sm:$0x7f] }
 0x126   : > { %1073 = vst [vmem:[#allocation2 + $0x60] sm:$0xff] %v1041_v10  ;;  %v1174_v10 = vld [vmem:[#allocation2 + $0x8] sm:$0x7f] }
 0x129   : > { %v981_v11 = vpop.f32.mrf.mxu0 }
 0x12a   : > { %v982_v12 = vadd.f32 %v4747_v28, %v981_v11 }
 0x12c   : > { %v1042_v13 = vmax.f32 %v982_v12, 0.0 }
 0x12d   : > { %v1105_v58 = vld [vmem:[#allocation2 + $0x60] sm:$0x7f] }
 0x12e   : > { %1074 = vst [vmem:[#allocation2 + $0x68] sm:$0xff] %v1042_v13  ;;  %v1123_v13 = vmax.f32 %v1109_v5, %v1116_v9  ;;  %v1119_v9 = vld [vmem:[#allocation2 + $0x21] sm:$0x7f] }
 0x131   : > { %v984_v15 = vpop.f32.mrf.mxu0 }
 0x132   : > { %v985_v16 = vadd.f32 %v4747_v28, %v984_v15 }
 0x134   : > { %v1043_v17 = vmax.f32 %v985_v16, 0.0  ;;  %3922 = vmatmul.msk.bf16.gmra.mxu0 %vm891_vm0, %v4384_v14  ;;  %v1189_v16 = vld [vmem:[#allocation2 + $0x48] sm:$0x7f]  ;;  %vm4995_vm0 = vmand %vm1637_vm15, %vm1492_vm10  ;;  %vm3006_vm15 = vcmask 1044224  }
 0x136   : > { %1075 = vst [vmem:[#allocation2 + $0x70] sm:$0xff] %v1043_v17  ;;  %v1103_v17 = vld [vmem:[#allocation2 + $0x50] sm:$0x7f] }
 0x139   : > { %v986_v18 = vpop.f32.mrf.mxu0 }
 0x13a   : > { %v987_v19 = vadd.f32 %v4747_v28, %v986_v18 }
 0x13c   : > { %v1044_v20 = vmax.f32 %v987_v19, 0.0 }
 0x13e   : > { %1076 = vst [vmem:[#allocation2 + $0x78] sm:$0xff] %v1044_v20 }
 0x141   : > { %v989_v21 = vpop.f32.mrf.mxu0 }
 0x142   : > { %v990_v22 = vadd.f32 %v4747_v28, %v989_v21  ;;  %v1203_v21 = vld [vmem:[#allocation2 + $0x9] sm:$0x7f] }
 0x144   : > { %v1045_v23 = vmax.f32 %v990_v22, 0.0  ;;  %v1095_v22 = vld [vmem:[#allocation2 + $0x10] sm:$0x7f] }
 0x146   : > { %1077 = vst [vmem:[#allocation2 + $0x80] sm:$0xff] %v1045_v23 }
 0x149   : > { %v991_v24 = vpop.f32.mrf.mxu0 }
 0x14a   : > { %v992_v25 = vadd.f32 %v4747_v28, %v991_v24  ;;  %v1110_v24 = vmax.f32 %v1095_v22, %v1103_v17  ;;  %v1106_v17 = vld [vmem:[#allocation2 + $0x68] sm:$0x7f] }
 0x14b   : > { %v1098_v22 = vld [vmem:[#allocation2 + $0x28] sm:$0x7f] }
 0x14c   : > { %v1046_v26 = vmax.f32 %v992_v25, 0.0 }
 0x14d   : > { %v1130_v60 = vld [vmem:[#allocation2 + $0x80] sm:$0x7f] }
 0x14e   : > { %1078 = vst [vmem:[#allocation2 + $0x88] sm:$0xff] %v1046_v26  ;;  %v1137_v1 = vmax.f32 %v1122_v62, %v1130_v60  ;;  %v1159_v7 = vld [vmem:[#allocation2 + $0x81] sm:$0x7f]  ;;  %v1205_v62 = vld [vmem:[#allocation2 + $0x19] sm:$0x7f] }
 0x151   : > { %v994_v27 = vpop.f32.mrf.mxu0 }
 0x152   : > { %v995_v29 = vadd.f32 %v4747_v28, %v994_v27 }
 0x154   : > { %v1047_v30 = vmax.f32 %v995_v29, 0.0 }
 0x155   : > { %v1131_v11 = vld [vmem:[#allocation2 + $0x88] sm:$0x7f] }
 0x156   : > { %1079 = vst [vmem:[#allocation2 + $0x90] sm:$0xff] %v1047_v30  ;;  %v1138_v18 = vmax.f32 %v1123_v13, %v1131_v11  ;;  %v1160_v27 = vld [vmem:[#allocation2 + $0x89] sm:$0x7f]  ;;  %v1117_v30 = vld [vmem:[#allocation2 + $0x11] sm:$0x7f] }
 0x159   : > { %v996_v31 = vpop.f32.mrf.mxu0 }
 0x15a   : > { %v997_v32 = vadd.f32 %v4747_v28, %v996_v31  ;;  %v1175_v31 = vld [vmem:[#allocation2 + $0x10] sm:$0x7f] }
 0x15c   : > { %v1048_v33 = vmax.f32 %v997_v32, 0.0 }
 0x15d   : > { %v1132_v32 = vld [vmem:[#allocation2 + $0x90] sm:$0x7f] }
 0x15e   : > { %1080 = vst [vmem:[#allocation2 + $0x98] sm:$0xff] %v1048_v33 }
 0x161   : > { %v999_v34 = vpop.f32.mrf.mxu0 }
 0x162   : > { %v1000_v35 = vadd.f32 %v4747_v28, %v999_v34  ;;  %v1124_v34 = vmax.f32 %v1110_v24, %v1117_v30  ;;  %v1113_v24 = vmax.f32 %v1098_v22, %v1106_v17  ;;  %v1120_v30 = vld [vmem:[#allocation2 + $0x29] sm:$0x7f] }
 0x164   : > { %v1049_v36 = vmax.f32 %v1000_v35, 0.0  ;;  %v1139_v39 = vmax.f32 %v1124_v34, %v1132_v32  ;;  %v1127_v34 = vmax.f32 %v1113_v24, %v1120_v30 }
 0x166   : > { %1081 = vst [vmem:[#allocation2 + $0xa0] sm:$0xff] %v1049_v36 }
 0x169   : > { %v1001_v37 = vpop.f32.mrf.mxu0 }
 0x16a   : > { %v1002_v38 = vadd.f32 %v4747_v28, %v1001_v37  ;;  %v1190_v37 = vld [vmem:[#allocation2 + $0x50] sm:$0x7f] }
 0x16c   : > { %v1050_v40 = vmax.f32 %v1002_v38, 0.0  ;;  %v1104_v38 = vld [vmem:[#allocation2 + $0x58] sm:$0x7f] }
 0x16d   : > { %v1134_v11 = vld [vmem:[#allocation2 + $0xa0] sm:$0x7f] }
 0x16e   : > { %1082 = vst [vmem:[#allocation2 + $0xa8] sm:$0xff] %v1050_v40 }
 0x171   : > { %v1004_v42 = vpop.f32.mrf.mxu0 }
 0x172   : > { %v1005_v43 = vadd.f32 %v4747_v28, %v1004_v42  ;;  %v1204_v42 = vld [vmem:[#allocation2 + $0x11] sm:$0x7f] }
 0x174   : > { %v1051_v45 = vmax.f32 %v1005_v43, 0.0  ;;  %v1096_v43 = vld [vmem:[#allocation2 + $0x18] sm:$0x7f] }
 0x175   : > { %v1135_v32 = vld [vmem:[#allocation2 + $0xa8] sm:$0x7f] }
 0x176   : > { %1083 = vst [vmem:[#allocation2 + $0xb0] sm:$0xff] %v1051_v45  ;;  %v1111_v45 = vmax.f32 %v1096_v43, %v1104_v38  ;;  %v1107_v38 = vld [vmem:[#allocation2 + $0x70] sm:$0x7f] }
 0x177   : > { %v1099_v43 = vld [vmem:[#allocation2 + $0x30] sm:$0x7f] }
 0x178   : > { %v1125_v54 = vmax.f32 %v1111_v45, %v1118_v50  ;;  %v1114_v45 = vmax.f32 %v1099_v43, %v1107_v38 }
 0x179   : > { %v1006_v48 = vpop.f32.mrf.mxu0 }
 0x17a   : > { %v1161_v48 = vld [vmem:[#allocation2 + $0x91] sm:$0x7f] }
 0x181   : > { %v1009_v51 = vpop.f32.mrf.mxu0 }
 0x182   : > { %v1010_v52 = vadd.f32 %v4747_v28, %v1009_v51  ;;  %v1176_v51 = vld [vmem:[#allocation2 + $0x18] sm:$0x7f] }
 0x184   : > { %v1053_v55 = vmax.f32 %v1010_v52, 0.0  ;;  %v1133_v52 = vld [vmem:[#allocation2 + $0x98] sm:$0x7f] }
 0x185   : > { %v1140_v59 = vmax.f32 %v1125_v54, %v1133_v52  ;;  %v1136_v54 = vld [vmem:[#allocation2 + $0xb0] sm:$0x7f] }
 0x186   : > { %1085 = vst [vmem:[#allocation2 + $0xc0] sm:$0xff] %v1053_v55 }
 0x189   : > { %v1011_v61 = vpop.f32.mrf.mxu0 }
 0x18a   : > { %v1012_v63 = vadd.f32 %v4747_v28, %v1011_v61 }
 0x18c   : > { %v1054_v2 = vmax.f32 %v1012_v63, 0.0  ;;  %v1097_v63 = vld [vmem:[#allocation2 + $0x20] sm:$0x7f] }
 0x18d   : > { %v1145_v4 = vld [vmem:[#allocation2 + $0xc0] sm:$0x7f] }
 0x18e   : > { %v1152_v6 = vmax.f32 %v1137_v1, %v1145_v4  ;;  %1086 = vst [vmem:[#allocation2 + $0xc8] sm:$0xff] %v1054_v2  ;;  %v1112_v1 = vmax.f32 %v1097_v63, %v1105_v58  ;;  %v1162_v4 = vld [vmem:[#allocation2 + $0x99] sm:$0x7f]  ;;  %v4413_v58 = vld [vmem:[%s5967_s5 + $0x40] sm:$0xff] }
 0x18f   : > { %1947 = vmatpush.bf16.msrb.mxu0 %v4413_v58  ;;  %4495 = vmatpush.bf16.msra.mxu3 %v4413_v58 }
 0x190   : > { %v1166_v8 = vmax.f32 %v1152_v6, %v1159_v7  ;;  %v1126_v13 = vmax.f32 %v1112_v1, %v1119_v9 }
 0x191   : > { %v1014_v12 = vpop.f32.mrf.mxu0 }
 0x192   : > { %v1181_v14 = vmax.f32 %v1166_v8, %v1174_v10  ;;  %v1015_v15 = vadd.f32 %v4747_v28, %v1014_v12  ;;  %v1177_v10 = vld [vmem:[#allocation2 + $0x20] sm:$0x7f] }
 0x194   : > { %v1055_v19 = vmax.f32 %v1015_v15, 0.0  ;;  %v1196_v20 = vmax.f32 %v1181_v14, %v1189_v16  ;;  %v1192_v16 = vld [vmem:[#allocation2 + $0x60] sm:$0x7f] }
 0x195   : > { %v1146_v23 = vld [vmem:[#allocation2 + $0xc8] sm:$0x7f] }
 0x196   : > { %v1153_v25 = vmax.f32 %v1138_v18, %v1146_v23  ;;  %1087 = vst [vmem:[#allocation2 + $0xd0] sm:$0xff] %v1055_v19  ;;  %v1210_v26 = vmax.f32 %v1196_v20, %v1203_v21  ;;  %v1141_v18 = vmax.f32 %v1126_v13, %v1134_v11  ;;  %v1206_v21 = vld [vmem:[#allocation2 + $0x21] sm:$0x7f] }
 0x198   : > { %v1167_v29 = vmax.f32 %v1153_v25, %v1160_v27  ;;  %1225 = vst [vmem:[#allocation3 + $0x30] sm:$0x7f] %v1210_v26  ;;  %v1163_v27 = vld [vmem:[#allocation2 + $0xa1] sm:$0x7f] }
 0x199   : > { %v1016_v33 = vpop.f32.mrf.mxu0 }
 0x19a   : > { %v1182_v35 = vmax.f32 %v1167_v29, %v1175_v31  ;;  %v1017_v36 = vadd.f32 %v4747_v28, %v1016_v33  ;;  %v1178_v31 = vld [vmem:[#allocation2 + $0x28] sm:$0x7f] }
 0x19c   : > { %v1056_v40 = vmax.f32 %v1017_v36, 0.0  ;;  %v1197_v41 = vmax.f32 %v1182_v35, %v1190_v37  ;;  %v1193_v37 = vld [vmem:[#allocation2 + $0x68] sm:$0x7f] }
 0x19d   : > { %v1147_v44 = vld [vmem:[#allocation2 + $0xd0] sm:$0x7f] }
 0x19e   : > { %v1154_v46 = vmax.f32 %v1139_v39, %v1147_v44  ;;  %1088 = vst [vmem:[#allocation2 + $0xd8] sm:$0xff] %v1056_v40  ;;  %v1211_v47 = vmax.f32 %v1197_v41, %v1204_v42  ;;  %v1142_v39 = vmax.f32 %v1127_v34, %v1135_v32  ;;  %v1207_v42 = vld [vmem:[#allocation2 + $0x29] sm:$0x7f] }
 0x19f   : > { %v1232_v5 = vld [vmem:[#allocation3 + $0x30] sm:$0xff] }
 0x1a0   : > { %v1168_v49 = vmax.f32 %v1154_v46, %v1161_v48  ;;  %1226 = vst [vmem:[#allocation3] sm:$0x7f] %v1211_v47  ;;  %v1164_v48 = vld [vmem:[#allocation2 + $0xa9] sm:$0x7f] }
 0x1a1   : > { %v1019_v53 = vpop.f32.mrf.mxu0 }
 0x1a2   : > { %v1183_v55 = vmax.f32 %v1168_v49, %v1176_v51  ;;  %v1020_v56 = vadd.f32 %v4747_v28, %v1019_v53  ;;  %v1121_v53 = vld [vmem:[#allocation2 + $0x31] sm:$0x7f] }
 0x1a4   : > { %v1057_v60 = vmax.f32 %v1020_v56, 0.0  ;;  %v1198_v61 = vmax.f32 %v1183_v55, %v1191_v57  ;;  %v1128_v55 = vmax.f32 %v1114_v45, %v1121_v53 }
 0x1a5   : > { %v1148_v0 = vld [vmem:[#allocation2 + $0xd8] sm:$0x7f] }
 0x1a6   : > { %v1155_v2 = vmax.f32 %v1140_v59, %v1148_v0  ;;  %1089 = vst [vmem:[#allocation2 + $0xe0] sm:$0xff] %v1057_v60  ;;  %v1212_v3 = vmax.f32 %v1198_v61, %v1205_v62  ;;  %v1194_v59 = vld [vmem:[#allocation2 + $0x70] sm:$0x7f]  ;;  %v1143_v60 = vmax.f32 %v1128_v55, %v1136_v54 }
 0x1a7   : > { %v1233_v6 = vld [vmem:[#allocation3] sm:$0xff]  ;;  %v1208_v62 = vld [vmem:[#allocation2 + $0x31] sm:$0x7f] }
 0x1a8   : > { %v1169_v7 = vmax.f32 %v1155_v2, %v1162_v4  ;;  %v1240_v8 = vpack.c.bf16 %v1233_v6, %v1232_v5  ;;  %1227 = vst [vmem:[#allocation3 + $0x18] sm:$0x7f] %v1212_v3  ;;  %v1165_v2 = vld [vmem:[#allocation2 + $0xb1] sm:$0x7f]  ;;  %v1180_v4 = vld [vmem:[#allocation2 + $0x38] sm:$0x7f] }
 0x1a9   : > { %v1021_v12 = vpop.f32.mrf.mxu0  ;;  %v1195_v6 = vld [vmem:[#allocation2 + $0x78] sm:$0x7f] }
 0x1aa   : > { %v1184_v14 = vmax.f32 %v1169_v7, %v1177_v10  ;;  %v1022_v15 = vadd.f32 %v4747_v28, %v1021_v12  ;;  %1348 = vmatmul.bf16.vlgmr.msra.gmra.mxu1 %v1240_v8  ;;  %v1209_v8 = vld [vmem:[#allocation2 + $0x39] sm:$0x7f] }
 0x1ac   : > { %v1058_v19 = vmax.f32 %v1022_v15, 0.0  ;;  %v1199_v20 = vmax.f32 %v1184_v14, %v1192_v16  ;;  %v4561_v15 = vmov 0   ;;  %v4825_v16 = vld [vmem:[%s5966_s4] ss:$0 sm:$0xff] }
 0x1ad   : > { %v1149_v23 = vld [vmem:[#allocation2 + $0xe0] sm:$0x7f]  ;;  %1248 = vst.msk [vmem:[#allocation4 + $0x8] sm:$0xff] %vm1246_vm3, %v4561_v15 }
 0x1ae   : > { %v1156_v25 = vmax.f32 %v1141_v18, %v1149_v23  ;;  %1090 = vst [vmem:[#allocation2 + $0xe8] sm:$0xff] %v1058_v19  ;;  %v1213_v26 = vmax.f32 %v1199_v20, %v1206_v21 }
 0x1af   : > { %v1234_v49 = vld [vmem:[#allocation3 + $0x18] sm:$0xff]  ;;  %1247 = vst.msk [vmem:[#allocation4] sm:$0xff] %vm1246_vm3, %v4561_v15 }
 0x1b0   : > { %v1170_v29 = vmax.f32 %v1156_v25, %v1163_v27  ;;  %1228 = vst [vmem:[#allocation3 + $0x10] sm:$0x7f] %v1213_v26 }
 0x1b1   : > { %v1024_v33 = vpop.f32.mrf.mxu0  ;;  %1249 = vst.msk [vmem:[#allocation4 + $0x10] sm:$0xff] %vm1246_vm3, %v4561_v15 }
 0x1b2   : > { %v1185_v35 = vmax.f32 %v1170_v29, %v1178_v31  ;;  %v1025_v36 = vadd.f32 %v4747_v28, %v1024_v33  ;;  %v1179_v28 = vld [vmem:[#allocation2 + $0x30] sm:$0x7f]  ;;  %1250 = vst.msk [vmem:[#allocation4 + $0x18] sm:$0xff] %vm1246_vm3, %v4561_v15 }
 0x1b3   : > { %1251 = vst.msk [vmem:[#allocation4 + $0x20] sm:$0xff] %vm1246_vm3, %v4561_v15 }
 0x1b4   : > { %v1059_v40 = vmax.f32 %v1025_v36, 0.0  ;;  %v1200_v41 = vmax.f32 %v1185_v35, %v1193_v37  ;;  %1252 = vst.msk [vmem:[#allocation4 + $0x28] sm:$0xff] %vm1246_vm3, %v4561_v15  ;;  %v1442_v30 = vld [vmem:[#allocation4 + $0x8] sm:$0xf] }
 0x1b5   : > { %v1150_v44 = vld [vmem:[#allocation2 + $0xe8] sm:$0x7f]  ;;  %1253 = vst.msk [vmem:[#allocation4 + $0x30] sm:$0xff] %vm1246_vm3, %v4561_v15 }
 0x1b6   : > { %v1157_v46 = vmax.f32 %v1142_v39, %v1150_v44  ;;  %1091 = vst [vmem:[#allocation2 + $0xf0] sm:$0xff] %v1059_v40  ;;  %v1214_v47 = vmax.f32 %v1200_v41, %v1207_v42 }
 0x1b7   : > { %v1235_v50 = vld [vmem:[#allocation3 + $0x10] sm:$0xff]  ;;  %1254 = vst.msk [vmem:[#allocation4 + $0x38] sm:$0xff] %vm1246_vm3, %v4561_v15  ;;  %vm5012_vm3 = vmand %vm1707_vm2, %vm1440_vm5  ;;  %vm2977_vm2 = vcmask 780800  }
 0x1b8   : > { %v1171_v51 = vmax.f32 %v1157_v46, %v1164_v48  ;;  %v1241_v52 = vpack.c.bf16 %v1235_v50, %v1234_v49  ;;  %1229 = vst [vmem:[#allocation3 + $0x8] sm:$0x7f] %v1214_v47  ;;  %v1445_v44 = vld [vmem:[#allocation4 + $0x10] sm:$0xf] }
 0x1b9   : > { %v1026_v57 = vpop.f32.mrf.mxu0  ;;  %1255 = vst [vmem:[#allocation5] sm:$0xff] %v4561_v15 }
 0x1ba   : > { %v1186_v56 = vmax.f32 %v1171_v51, %v1179_v28  ;;  %1353 = vmatmul.bf16.gmra.mxu1 %v1241_v52  ;;  %1258 = vst [vmem:[#allocation5 + $0xc] sm:$0xff] %v4561_v15  ;;  %v1448_v57 = vld [vmem:[#allocation4 + $0x18] sm:$0xf] }
 0x1bb   : > { %1260 = vst [vmem:[#allocation5 + $0x18] sm:$0xff] %v4561_v15 }
 0x1bc   : > { %v1201_v61 = vmax.f32 %v1186_v56, %v1194_v59  ;;  %1262 = vst [vmem:[#allocation5 + $0x24] sm:$0xff] %v4561_v15 }
 0x1bd   : > { %v1151_v63 = vld [vmem:[#allocation2 + $0xf0] sm:$0x7f]  ;;  %1264 = vst [vmem:[#allocation5 + $0x30] sm:$0xff] %v4561_v15 }
 0x1be   : > { %v1158_v0 = vmax.f32 %v1143_v60, %v1151_v63  ;;  %v1215_v1 = vmax.f32 %v1201_v61, %v1208_v62  ;;  %1266 = vst [vmem:[#allocation5 + $0x3c] sm:$0xff] %v4561_v15 }
 0x1bf   : > { %v1236_v10 = vld [vmem:[#allocation3 + $0x8] sm:$0xff]  ;;  %1268 = vst [vmem:[#allocation5 + $0x48] sm:$0xff] %v4561_v15 }
 0x1c0   : > { %v1172_v3 = vmax.f32 %v1158_v0, %v1165_v2  ;;  %1230 = vst [vmem:[#allocation3 + $0x20] sm:$0x7f] %v1215_v1 }
 0x1c1   : > { %1270 = vst [vmem:[#allocation5 + $0x54] sm:$0xff] %v4561_v15 }
 0x1c2   : > { %v1187_v5 = vmax.f32 %v1172_v3, %v1180_v4 }
 0x1c4   : > { %v1202_v7 = vmax.f32 %v1187_v5, %v1195_v6 }
 0x1c6   : > { %v1216_v9 = vmax.f32 %v1202_v7, %v1209_v8  ;;  %v1451_v7 = vld [vmem:[#allocation4 + $0x20] sm:$0xf] }
 0x1c7   : > { %v1237_v11 = vld [vmem:[#allocation3 + $0x20] sm:$0xff] }
 0x1c8   : > { %v1242_v12 = vpack.c.bf16 %v1237_v11, %v1236_v10  ;;  %1231 = vst [vmem:[#allocation3 + $0x28] sm:$0x7f] %v1216_v9 }
 0x1ca   : > { %1358 = vmatmul.bf16.gmra.mxu1 %v1242_v12 }
 0x1cf   : > { %v1238_v13 = vld [vmem:[#allocation3 + $0x28] sm:$0xff] }
 0x1d0   : > { %v1243_v14 = vpack.c.bf16 0.0, %v1238_v13 }
 0x1da   : > { %1363 = vmatmul.bf16.gmra.mxu1 %v1243_v14 }
 0x227   : > { %v1349_v17 = vpop.f32.mrf.mxu1 }
 0x228   : > { %v1350_v18 = vadd.f32 %v4825_v16, %v1349_v17 }
 0x22a   : > { %v1368_v19 = vmax.f32 %v1350_v18, 0.0 }
 0x22c   : > { %v1375_v20 = vpack.c.bf16 %v1368_v19, %v1368_v19 }
 0x22e   : > { %1616 = vrot.lane.b32.xlu2 %v1375_v20, %s5994_s24  ;;  %1470 = vrot.lane.b32.xlu0 %v1375_v20, %s5991_s27  ;;  %v1383_v21 = vshrl.u32 %v1375_v20, 16  ;;  %v1386_v22 = vshll.u32 %v1375_v20, 16 }
 0x22f   : > { %v1351_v23 = vpop.f32.mrf.mxu1 }
 0x230   : > { %v1352_v24 = vadd.f32 %v4825_v16, %v1351_v23  ;;  %v1385_v25 = vrot.slane %v1383_v21, 7  ;;  %v1516_v26 = vrot.slane %v1386_v22, 5  ;;  %v1515_v27 = vrot.slane %v1383_v21, 4 }
 0x232   : > { %v1369_v31 = vmax.f32 %v1352_v24, 0.0  ;;  %v1388_v32 = vor.u32 %v1386_v22, %v1385_v25  ;;  %v1517_v33 = vor.u32 %v1516_v26, %v1515_v27  ;;  %v1454_v25 = vld [vmem:[#allocation4 + $0x28] sm:$0xf] }
 0x234   : > { %v1376_v34 = vpack.c.bf16 %v1369_v31, %v1369_v31  ;;  %1572 = vrot.lane.b32.xlu1 %v1388_v32, %s5987_s30  ;;  %v1443_v35 = vsel %vm4832_vm6, %v1388_v32, %v1442_v30  ;;  %v1518_v36 = vrot.slane %v1517_v33, 4 }
 0x235   : > { %1444 = vst [vmem:[#allocation4 + $0x8] sm:$0xf] %v1443_v35 }
 0x236   : > { %1472 = vrot.lane.b32.xlu2 %v1376_v34, %s5991_s27  ;;  %1543 = vrot.lane.b32.xlu0 %v1518_v36, %s5989_s18  ;;  %v1390_v37 = vshrl.u32 %v1376_v34, 16  ;;  %v1393_v38 = vshll.u32 %v1376_v34, 16 }
 0x237   : > { %v1354_v39 = vpop.f32.mrf.mxu1 }
 0x238   : > { %v1355_v40 = vadd.f32 %v4825_v16, %v1354_v39  ;;  %v1392_v41 = vrot.slane %v1390_v37, 7  ;;  %v1519_v42 = vrot.slane %v1390_v37, 4  ;;  %v1520_v43 = vrot.slane %v1393_v38, 5 }
 0x23a   : > { %v1370_v45 = vmax.f32 %v1355_v40, 0.0  ;;  %v1395_v46 = vor.u32 %v1393_v38, %v1392_v41  ;;  %v1521_v47 = vor.u32 %v1520_v43, %v1519_v42  ;;  %v1457_v41 = vld [vmem:[#allocation4 + $0x30] sm:$0xf] }
 0x23c   : > { %v4842_v48 = vpack.c.bf16 %v1370_v45, %v1370_v45  ;;  %1660 = vrot.lane.b32.xlu1 %v1518_v36, %s5981_s1  ;;  %v1446_v49 = vsel %vm4832_vm6, %v1395_v46, %v1445_v44  ;;  %v1522_v50 = vrot.slane %v1521_v47, 4 }
 0x23d   : > { %1447 = vst [vmem:[#allocation4 + $0x10] sm:$0xf] %v1446_v49 }
 0x23e   : > { %v1397_v51 = vshrl.u32 %v4842_v48, 16  ;;  %v1400_v52 = vshll.u32 %v4842_v48, 16  ;;  %1689 = vrot.lane.b32.xlu2 %v1395_v46, %s5983_s20  ;;  %1618 = vrot.lane.b32.xlu0 %v1376_v34, %s5994_s24  ;;  %1772 = vst.msk [vmem:[#allocation4 + $0x4] sm:$0x7] %vm1771_vm7, %v1522_v50 }
 0x23f   : > { %v1356_v53 = vpop.f32.mrf.mxu1 }
 0x240   : > { %v1523_v28 = vrot.slane %v1397_v51, 4  ;;  %v1524_v54 = vrot.slane %v1400_v52, 5  ;;  %v1357_v55 = vadd.f32 %v4825_v16, %v1356_v53  ;;  %v1399_v56 = vrot.slane %v1397_v51, 7 }
 0x242   : > { %v1525_v58 = vor.u32 %v1524_v54, %v1523_v28  ;;  %v1371_v59 = vmax.f32 %v1357_v55, 0.0  ;;  %v4853_v60 = vor.u32 %v1400_v52, %v1399_v56  ;;  %v1460_v55 = vld [vmem:[#allocation4 + $0x38] sm:$0xf] }
 0x244   : > { %v4855_v61 = vrot.slane %v1525_v58, 4  ;;  %v4857_v62 = vpack.c.bf16 %v1371_v59, %v1371_v59  ;;  %1574 = vrot.lane.b32.xlu1 %v1395_v46, %s5987_s30  ;;  %v1449_v63 = vsel %vm4832_vm6, %v4853_v60, %v1448_v57 }
 0x245   : > { %1450 = vst [vmem:[#allocation4 + $0x18] sm:$0xf] %v1449_v63  ;;  %v4397_v14 = vld [vmem:[#allocation4 + $0x4] sm:$0xf] }
 0x246   : > { %1773 = vst.msk [vmem:[#allocation4 + $0xc] sm:$0x7] %vm1771_vm7, %v4855_v61  ;;  %v1404_v0 = vshrl.u32 %v4857_v62, 16  ;;  %v1407_v1 = vshll.u32 %v4857_v62, 16  ;;  %1474 = vrot.lane.b32.xlu2 %v4842_v48, %s5991_s27  ;;  %1727 = vrot.lane.b32.xlu0 %v1376_v34, %s5985_s21 }
 0x247   : > { %v1359_v2 = vpop.f32.mrf.mxu1 }
 0x248   : > { %v1527_v3 = vrot.slane %v1404_v0, 4  ;;  %v1528_v4 = vrot.slane %v1407_v1, 5  ;;  %v1360_v5 = vadd.f32 %v4825_v16, %v1359_v2  ;;  %v1406_v6 = vrot.slane %v1404_v0, 7  ;;  %v1497_v2 = vld [vmem:[#allocation4 + $0x10] sm:$0xf] }
 0x24a   : > { %v1529_v8 = vor.u32 %v1528_v4, %v1527_v3  ;;  %v1372_v9 = vmax.f32 %v1360_v5, 0.0  ;;  %v4871_v10 = vor.u32 %v1407_v1, %v1406_v6  ;;  %v1494_v5 = vld [vmem:[#allocation4 + $0x8] sm:$0xf] }
 0x24c   : > { %v4873_v11 = vrot.slane %v1529_v8, 4  ;;  %v4875_v12 = vpack.c.bf16 %v1372_v9, %v1372_v9  ;;  %1729 = vrot.lane.b32.xlu1 %v4842_v48, %s5985_s21  ;;  %v1452_v13 = vsel %vm4832_vm6, %v4871_v10, %v1451_v7  ;;  %v1500_v6 = vld [vmem:[#allocation4 + $0x18] sm:$0xf] }
 0x24d   : > { %v3959_v15 = vld [vmem:[#allocation4 + $0x8] sm:$0xf0]  ;;  %1453 = vst [vmem:[#allocation4 + $0x20] sm:$0xf] %v1452_v13 }
 0x24e   : > { %1774 = vst.msk [vmem:[#allocation4 + $0x14] sm:$0x7] %vm1771_vm7, %v4873_v11  ;;  %v1411_v17 = vshrl.u32 %v4875_v12, 16  ;;  %v1414_v18 = vshll.u32 %v4875_v12, 16  ;;  %1662 = vrot.lane.b32.xlu2 %v1522_v50, %s5981_s1  ;;  %1545 = vrot.lane.b32.xlu0 %v1522_v50, %s5989_s18  ;;  %v3962_v19 = vor.u32 %v4397_v14, %v3959_v15  ;;  %v4412_v14 = vld [vmem:[%s5967_s5 + $0x38] sm:$0xff] }
 0x24f   : > { %v1361_v20 = vpop.f32.mrf.mxu1  ;;  %1911 = vmatpush.bf16.msra.mxu2 %v4412_v14 }
 0x250   : > { %v1531_v21 = vrot.slane %v1411_v17, 4  ;;  %v1532_v22 = vrot.slane %v1414_v18, 5  ;;  %v1362_v23 = vadd.f32 %v4825_v16, %v1361_v20  ;;  %4023 = vmatmul.msk.bf16.vlgmr.msrb.gmra.mxu0 %vm1898_vm8, %v3962_v19  ;;  %v1413_v24 = vrot.slane %v1411_v17, 7  ;;  %v4411_v19 = vld [vmem:[%s5967_s5 + $0x30] sm:$0xff] }
 0x251   : > { %v4441_v20 = vld [vmem:[%s5973_s11 + $0x10] sm:$0xff] }
 0x252   : > { %v1533_v26 = vor.u32 %v1532_v22, %v1531_v21  ;;  %v1373_v27 = vmax.f32 %v1362_v23, 0.0  ;;  %v1416_v30 = vor.u32 %v1414_v18, %v1413_v24  ;;  %v4410_v22 = vld [vmem:[%s5967_s5 + $0x28] sm:$0xff] }
 0x253   : > { %1912 = vmatpush.bf16.msra.mxu2 %v4411_v19 }
 0x254   : > { %v1534_v31 = vrot.slane %v1533_v26, 4  ;;  %v4890_v32 = vpack.c.bf16 %v1373_v27, %v1373_v27  ;;  %1547 = vrot.lane.b32.xlu1 %v4855_v61, %s5989_s18  ;;  %v1455_v33 = vsel %vm4832_vm6, %v1416_v30, %v1454_v25  ;;  %v4409_v27 = vld [vmem:[%s5967_s5 + $0x20] sm:$0xff] }
 0x255   : > { %1456 = vst [vmem:[#allocation4 + $0x28] sm:$0xf] %v1455_v33 }
 0x256   : > { %1775 = vst.msk [vmem:[#allocation4 + $0x1c] sm:$0x7] %vm1771_vm7, %v1534_v31  ;;  %v1418_v34 = vshrl.u32 %v4890_v32, 16  ;;  %v1421_v35 = vshll.u32 %v4890_v32, 16  ;;  %1620 = vrot.lane.b32.xlu2 %v4842_v48, %s5994_s24  ;;  %1576 = vrot.lane.b32.xlu0 %v4853_v60, %s5987_s30  ;;  %v4399_v48 = vld [vmem:[#allocation4 + $0x14] sm:$0xf] }
 0x257   : > { %v1364_v36 = vpop.f32.mrf.mxu1  ;;  %1913 = vmatpush.bf16.msra.mxu2 %v4410_v22 }
 0x258   : > { %v1535_v37 = vrot.slane %v1418_v34, 4  ;;  %v1536_v38 = vrot.slane %v1421_v35, 5  ;;  %v1365_v39 = vadd.f32 %v4825_v16, %v1364_v36  ;;  %v1420_v40 = vrot.slane %v1418_v34, 7 }
 0x25a   : > { %v1537_v42 = vor.u32 %v1536_v38, %v1535_v37  ;;  %v1374_v43 = vmax.f32 %v1365_v39, 0.0  ;;  %v1423_v44 = vor.u32 %v1421_v35, %v1420_v40 }
 0x25b   : > { %1914 = vmatpush.bf16.msra.mxu2 %v4409_v27 }
 0x25c   : > { %v1538_v45 = vrot.slane %v1537_v42, 4  ;;  %v4904_v46 = vpack.c.bf16 %v1374_v43, %v1374_v43  ;;  %1476 = vrot.lane.b32.xlu1 %v4857_v62, %s5991_s27  ;;  %v1458_v47 = vsel %vm4832_vm6, %v1423_v44, %v1457_v41  ;;  %v1506_v35 = vld [vmem:[#allocation4 + $0x28] sm:$0xf]  ;;  %v4407_v41 = vld [vmem:[%s5967_s5 + $0x10] sm:$0xff] }
 0x25d   : > { %v3967_v49 = vld [vmem:[#allocation4 + $0x18] sm:$0xf0]  ;;  %1459 = vst [vmem:[#allocation4 + $0x30] sm:$0xf] %v1458_v47  ;;  %v4406_v42 = vld [vmem:[%s5967_s5 + $0x8] sm:$0xff] }
 0x25e   : > { %1776 = vst.msk [vmem:[#allocation4 + $0x24] sm:$0x7] %vm1771_vm7, %v1538_v45  ;;  %v1425_v16 = vshrl.u32 %v4904_v46, 16  ;;  %v1428_v50 = vshll.u32 %v4904_v46, 16  ;;  %1478 = vrot.lane.b32.xlu2 %v4875_v12, %s5991_s27  ;;  %1691 = vrot.lane.b32.xlu0 %v4853_v60, %s5983_s20  ;;  %v3970_v51 = vor.u32 %v4399_v48, %v3967_v49  ;;  %v4405_v49 = vld [vmem:[%s5967_s5] sm:$0xff] }
 0x25f   : > { %v1366_v52 = vpop.f32.mrf.mxu1 }
 0x260   : > { %v1539_v53 = vrot.slane %v1425_v16, 4  ;;  %v1540_v28 = vrot.slane %v1428_v50, 5  ;;  %4024 = vmatmul.msk.bf16.gmra.mxu0 %vm1898_vm8, %v3970_v51  ;;  %v1427_v54 = vrot.slane %v1425_v16, 7 }
 0x262   : > { %v1541_v56 = vor.u32 %v1540_v28, %v1539_v53  ;;  %v1430_v57 = vor.u32 %v1428_v50, %v1427_v54  ;;  %v1503_v28 = vld [vmem:[#allocation4 + $0x20] sm:$0xf] }
 0x264   : > { %v4918_v58 = vrot.slane %v1541_v56, 4  ;;  %1664 = vrot.lane.b32.xlu1 %v4855_v61, %s5981_s1  ;;  %v1461_v59 = vsel %vm4832_vm6, %v1430_v57, %v1460_v55 }
 0x265   : > { %1462 = vst [vmem:[#allocation4 + $0x38] sm:$0xf] %v1461_v59  ;;  %v4401_v60 = vld [vmem:[#allocation4 + $0x24] sm:$0xf] }
 0x266   : > { %1777 = vst.msk [vmem:[#allocation4 + $0x2c] sm:$0x7] %vm1771_vm7, %v4918_v58  ;;  %1666 = vrot.lane.b32.xlu2 %v4873_v11, %s5981_s1  ;;  %1622 = vrot.lane.b32.xlu0 %v4857_v62, %s5994_s24 }
 0x26c   : > { %1578 = vrot.lane.b32.xlu1 %v4871_v10, %s5987_s30 }
 0x26d   : > { %v3975_v63 = vld [vmem:[#allocation4 + $0x28] sm:$0xf0] }
 0x26e   : > { %1580 = vrot.lane.b32.xlu2 %v1416_v30, %s5987_s30  ;;  %1549 = vrot.lane.b32.xlu0 %v4873_v11, %s5989_s18  ;;  %v3978_v61 = vor.u32 %v4401_v60, %v3975_v63 }
 0x270   : > { %4025 = vmatmul.msk.bf16.vlgmr.msra.gmra.mxu3 %vm1898_vm8, %v3978_v61 }
 0x274   : > { %1551 = vrot.lane.b32.xlu1 %v1534_v31, %s5989_s18 }
 0x276   : > { %1695 = vrot.lane.b32.xlu2 %v1416_v30, %s5983_s20  ;;  %1582 = vrot.lane.b32.xlu0 %v1423_v44, %s5987_s30 }
 0x27c   : > { %1693 = vrot.lane.b32.xlu1 %v4871_v10, %s5983_s20 }
 0x27e   : > { %1668 = vrot.lane.b32.xlu2 %v1534_v31, %s5981_s1  ;;  %1624 = vrot.lane.b32.xlu0 %v4875_v12, %s5994_s24 }
 0x284   : > { %1626 = vrot.lane.b32.xlu1 %v4890_v32, %s5994_s24 }
 0x286   : > { %1733 = vrot.lane.b32.xlu2 %v4875_v12, %s5985_s21  ;;  %1670 = vrot.lane.b32.xlu0 %v1538_v45, %s5981_s1  ;;  %v1595_v12 = vld [vmem:[#allocation4] sm:$0xf] }
 0x288   : > { %v1617_v0 = vpop.permute.xlu2 %1616 }
 0x28c   : > { %1731 = vrot.lane.b32.xlu1 %v4857_v62, %s5985_s21 }
 0x28e   : > { %1735 = vrot.lane.b32.xlu2 %v4890_v32, %s5985_s21  ;;  %1697 = vrot.lane.b32.xlu0 %v1423_v44, %s5983_s20 }
 0x290   : > { %v1473_v3 = vpop.permute.xlu2 %1472 }
 0x291   : > { %v1498_v4 = vsel %vm4955_vm11, %v1473_v3, %v1497_v2 }
 0x292   : > { %1499 = vst [vmem:[#allocation4 + $0x10] sm:$0xf] %v1498_v4 }
 0x294   : > { %1699 = vrot.lane.b32.xlu1 %v1430_v57, %s5983_s20 }
 0x296   : > { %1553 = vrot.lane.b32.xlu2 %v1538_v45, %s5989_s18  ;;  %1737 = vrot.lane.b32.xlu0 %v4904_v46, %s5985_s21 }
 0x298   : > { %v1690_v62 = vpop.permute.xlu2 %1689 }
 0x29c   : > { %1480 = vrot.lane.b32.xlu1 %v4890_v32, %s5991_s27  ;;  %v4408_v32 = vld [vmem:[%s5967_s5 + $0x18] sm:$0xff] }
 0x29d   : > { %1915 = vmatpush.bf16.msra.mxu2 %v4408_v32 }
 0x29e   : > { %1628 = vrot.lane.b32.xlu2 %v4904_v46, %s5994_s24  ;;  %1584 = vrot.lane.b32.xlu0 %v1430_v57, %s5987_s30  ;;  %s6023_s30 = smov 96  }
 0x2a0   : > { %v1475_v7 = vpop.permute.xlu2 %1474  ;;  %v1471_v8 = vpop.permute.xlu0 %1470 }
 0x2a1   : > { %v1501_v9 = vsel %vm4955_vm11, %v1475_v7, %v1500_v6  ;;  %v1495_v10 = vsel %vm4955_vm11, %v1471_v8, %v1494_v5  ;;  %1916 = vmatpush.bf16.msra.mxu2 %v4407_v41 }
 0x2a2   : > { %1502 = vst [vmem:[#allocation4 + $0x18] sm:$0xf] %v1501_v9 }
 0x2a3   : > { %1496 = vst [vmem:[#allocation4 + $0x8] sm:$0xf] %v1495_v10 }
 0x2a4   : > { %1482 = vrot.lane.b32.xlu1 %v4904_v46, %s5991_s27 }
 0x2a5   : > { %1917 = vmatpush.bf16.msra.mxu2 %v4406_v42 }
 0x2a6   : > { %1555 = vrot.lane.b32.xlu0 %v4918_v58, %s5989_s18  ;;  %v1573_v13 = vpop.permute.xlu1 %1572  ;;  %s6017_s18 = sadd.s32 4294967295, %s4558_s26   ;;  %s6024_s26 = smov 80  }
 0x2a7   : > { %v1596_v15 = vsel %vm4977_vm13, %v1573_v13, %v1595_v12  ;;  %p727_p8 = scmp.lt.s32.totalorder %s6017_s18, 1 }
 0x2a8   : > { %1597 = vst [vmem:[#allocation4] sm:$0xf] %v1596_v15  ;;  %v1663_v17 = vpop.permute.xlu2 %1662  ;;  %v1544_v18 = vpop.permute.xlu0 %1543 }
 0x2a9   : > { %1565 = vst.msk [vmem:[#allocation4 + $0x8] sm:$0x7] %vm1564_vm14, %v1544_v18  ;;  %1918 = vmatpush.bf16.msra.mxu2 %v4405_v49 }
 0x2ac   : > { %1672 = vrot.lane.b32.xlu1 %v4918_v58, %s5981_s1  ;;  %s6018_s1 = smov %s6017_s18  ;;  %s6019_s18 = smov 16  }
 0x2ad   : > { %s6044_s1 = smov (!%p727_p8, %s6018_s1), 1 }
 0x2ae   : > { %v1661_v21 = vpop.permute.xlu1 %1660  ;;  %s5993_s20 = sshll.u32 %s6044_s1, 6 }
 0x2af   : > { %v1639_v23 = vld [vmem:[#allocation4] sm:$0xf]  ;;  %s5138_s22 = scalar_lea.vmem %s5977_s15, %s5993_s20  ;;  %s6030_s20 = smov 64  }
 0x2b0   : > { %v1640_v24 = vsel %vm4995_vm0, %v1617_v0, %v1639_v23  ;;  %v1621_v25 = vpop.permute.xlu2 %1620  ;;  %v1619_v26 = vpop.permute.xlu0 %1618  ;;  %v1598_v30 = vld [vmem:[#allocation4 + $0x8] sm:$0xf] }
 0x2b1   : > { %1641 = vst [vmem:[#allocation4] sm:$0xf] %v1640_v24 }
 0x2b2   : > { %1682 = vst.msk [vmem:[#allocation4] sm:$0x7] %vm1681_vm1, %v1661_v21 }
 0x2b6   : > { %v1575_v31 = vpop.permute.xlu1 %1574 }
 0x2b7   : > { %v1599_v34 = vsel %vm4977_vm13, %v1575_v31, %v1598_v30 }
 0x2b8   : > { %1600 = vst [vmem:[#allocation4 + $0x8] sm:$0xf] %v1599_v34  ;;  %v1479_v36 = vpop.permute.xlu2 %1478  ;;  %v1728_v37 = vpop.permute.xlu0 %1727 }
 0x2b9   : > { %v1709_v38 = vld [vmem:[#allocation4] sm:$0xf]  ;;  %v1507_v39 = vsel %vm4955_vm11, %v1479_v36, %v1506_v35 }
 0x2ba   : > { %v1710_v40 = vsel %vm5012_vm3, %v1690_v62, %v1709_v38  ;;  %1508 = vst [vmem:[#allocation4 + $0x28] sm:$0xf] %v1507_v39 }
 0x2bb   : > { %1711 = vst [vmem:[#allocation4] sm:$0xf] %v1710_v40 }
 0x2be   : > { %v1730_v43 = vpop.permute.xlu1 %1729 }
 0x2bf   : > { %v1642_v44 = vld [vmem:[#allocation4 + $0x8] sm:$0xf] }
 0x2c0   : > { %v1643_v45 = vsel %vm4995_vm0, %v1619_v26, %v1642_v44  ;;  %v1546_v47 = vpop.permute.xlu0 %1545  ;;  %v1667_v59 = vpop.permute.xlu2 %1666 }
 0x2c1   : > { %1644 = vst [vmem:[#allocation4 + $0x8] sm:$0xf] %v1643_v45 }
 0x2c2   : > { %1683 = vst.msk [vmem:[#allocation4 + $0x8] sm:$0x7] %vm1681_vm1, %v1663_v17  ;;  %v1747_v48 = vld [vmem:[#allocation4] sm:$0xf] }
 0x2c3   : > { %v1748_v16 = vsel %vm5031_vm9, %v1728_v37, %v1747_v48  ;;  %1566 = vst.msk [vmem:[#allocation4 + $0x10] sm:$0x7] %vm1564_vm14, %v1546_v47 }
 0x2c4   : > { %1749 = vst [vmem:[#allocation4] sm:$0xf] %v1748_v16 }
 0x2c6   : > { %v1548_v50 = vpop.permute.xlu1 %1547 }
 0x2c7   : > { %1567 = vst.msk [vmem:[#allocation4 + $0x18] sm:$0x7] %vm1564_vm14, %v1548_v50 }
 0x2c8   : > { %v1577_v51 = vpop.permute.xlu0 %1576  ;;  %v1581_v4 = vpop.permute.xlu2 %1580 }
 0x2c9   : > { %v1712_v57 = vld [vmem:[#allocation4 + $0x8] sm:$0xf] }
 0x2ca   : > { %v1601_v52 = vld [vmem:[#allocation4 + $0x10] sm:$0xf] }
 0x2cb   : > { %v1602_v53 = vsel %vm4977_vm13, %v1577_v51, %v1601_v52  ;;  %v3957_v8 = vld [vmem:[#allocation4] sm:$0xf] }
 0x2cc   : > { %1603 = vst [vmem:[#allocation4 + $0x10] sm:$0xf] %v1602_v53 }
 0x2ce   : > { %v1477_v54 = vpop.permute.xlu1 %1476  ;;  %v1604_v62 = vld [vmem:[#allocation4 + $0x18] sm:$0xf] }
 0x2cf   : > { %v1504_v55 = vsel %vm4955_vm11, %v1477_v54, %v1503_v28 }
 0x2d0   : > { %1505 = vst [vmem:[#allocation4 + $0x20] sm:$0xf] %v1504_v55  ;;  %v1692_v56 = vpop.permute.xlu0 %1691  ;;  %v1696_v12 = vpop.permute.xlu2 %1695 }
 0x2d1   : > { %v1713_v58 = vsel %vm5012_vm3, %v1692_v56, %v1712_v57  ;;  %v1509_v57 = vld [vmem:[#allocation4 + $0x30] sm:$0xf] }
 0x2d2   : > { %1714 = vst [vmem:[#allocation4 + $0x8] sm:$0xf] %v1713_v58 }
 0x2d3   : > { %v1645_v60 = vld [vmem:[#allocation4 + $0x10] sm:$0xf] }
 0x2d4   : > { %v1646_v63 = vsel %vm4995_vm0, %v1621_v25, %v1645_v60 }
 0x2d5   : > { %1647 = vst [vmem:[#allocation4 + $0x10] sm:$0xf] %v1646_v63  ;;  %v4403_v63 = vld [vmem:[#allocation4 + $0x34] sm:$0xf] }
 0x2d6   : > { %v1665_v61 = vpop.permute.xlu1 %1664 }
 0x2d7   : > { %1684 = vst.msk [vmem:[#allocation4 + $0x10] sm:$0x7] %vm1681_vm1, %v1665_v61  ;;  %v3983_v61 = vld [vmem:[#allocation4 + $0x38] sm:$0xf0] }
 0x2d8   : > { %v1623_v0 = vpop.permute.xlu0 %1622  ;;  %v1669_v26 = vpop.permute.xlu2 %1668 }
 0x2d9   : > { %v1750_v2 = vld [vmem:[#allocation4 + $0x8] sm:$0xf] }
 0x2da   : > { %v1751_v3 = vsel %vm5031_vm9, %v1730_v43, %v1750_v2 }
 0x2db   : > { %1752 = vst [vmem:[#allocation4 + $0x8] sm:$0xf] %v1751_v3  ;;  %v3986_v3 = vor.u32 %v4403_v63, %v3983_v61 }
 0x2dd   : > { %4026 = vmatmul.msk.bf16.gmra.mxu3 %vm1898_vm8, %v3986_v3 }
 0x2de   : > { %v1579_v5 = vpop.permute.xlu1 %1578  ;;  %v1715_v22 = vld [vmem:[#allocation4 + $0x10] sm:$0xf] }
 0x2df   : > { %v1605_v6 = vsel %vm4977_vm13, %v1579_v5, %v1604_v62  ;;  %v4420_v5 = vld [vmem:[%s5969_s7 + $0x30] sm:$0xff] }
 0x2e0   : > { %1606 = vst [vmem:[#allocation4 + $0x18] sm:$0xf] %v1605_v6  ;;  %v1550_v7 = vpop.permute.xlu0 %1549  ;;  %v1734_v39 = vpop.permute.xlu2 %1733  ;;  %v1512_v6 = vld [vmem:[#allocation4 + $0x38] sm:$0xf] }
 0x2e1   : > { %1568 = vst.msk [vmem:[#allocation4 + $0x20] sm:$0x7] %vm1564_vm14, %v1550_v7 }
 0x2e2   : > { %v4398_v9 = vld [vmem:[#allocation4 + $0x4] sm:$0xf0] }
 0x2e3   : > { %v3958_v10 = vor.u32 %v4398_v9, %v3957_v8  ;;  %v4419_v9 = vld [vmem:[%s5969_s7 + $0x28] sm:$0xff] }
 0x2e5   : > { %1919 = vmatmul.bf16.vlgmr.msra.gmra.mxu2 %v3958_v10 }
 0x2e6   : > { %v1552_v13 = vpop.permute.xlu1 %1551 }
 0x2e7   : > { %v1648_v14 = vld [vmem:[#allocation4 + $0x18] sm:$0xf]  ;;  %1569 = vst.msk [vmem:[#allocation4 + $0x28] sm:$0x7] %vm1564_vm14, %v1552_v13 }
 0x2e8   : > { %v1649_v15 = vsel %vm4995_vm0, %v1623_v0, %v1648_v14  ;;  %v1607_v17 = vld [vmem:[#allocation4 + $0x20] sm:$0xf]  ;;  %v1583_v18 = vpop.permute.xlu0 %1582  ;;  %v1736_v50 = vpop.permute.xlu2 %1735 }
 0x2e9   : > { %1650 = vst [vmem:[#allocation4 + $0x18] sm:$0xf] %v1649_v15  ;;  %v1608_v19 = vsel %vm4977_vm13, %v1581_v4, %v1607_v17  ;;  %v4421_v4 = vld [vmem:[%s5969_s7 + $0x38] sm:$0xff] }
 0x2ea   : > { %1685 = vst.msk [vmem:[#allocation4 + $0x18] sm:$0x7] %vm1681_vm1, %v1667_v59  ;;  %2057 = vmatpush.bf16.msrb.mxu3 %v4421_v4 }
 0x2eb   : > { %1609 = vst [vmem:[#allocation4 + $0x20] sm:$0xf] %v1608_v19 }
 0x2ee   : > { %v1610_v21 = vld [vmem:[#allocation4 + $0x28] sm:$0xf]  ;;  %v1694_v23 = vpop.permute.xlu1 %1693  ;;  %2058 = vmatpush.bf16.msrb.mxu3 %v4420_v5 }
 0x2ef   : > { %v1611_v24 = vsel %vm4977_vm13, %v1583_v18, %v1610_v21  ;;  %v1716_v25 = vsel %vm5012_vm3, %v1694_v23, %v1715_v22  ;;  %v4418_v18 = vld [vmem:[%s5969_s7 + $0x20] sm:$0xff] }
 0x2f0   : > { %1612 = vst [vmem:[#allocation4 + $0x28] sm:$0xf] %v1611_v24  ;;  %v1625_v27 = vpop.permute.xlu0 %1624  ;;  %v1554_v62 = vpop.permute.xlu2 %1553 }
 0x2f1   : > { %v1718_v30 = vld [vmem:[#allocation4 + $0x18] sm:$0xf]  ;;  %1717 = vst [vmem:[#allocation4 + $0x10] sm:$0xf] %v1716_v25 }
 0x2f2   : > { %v1719_v31 = vsel %vm5012_vm3, %v1696_v12, %v1718_v30  ;;  %v1651_v32 = vld [vmem:[#allocation4 + $0x20] sm:$0xf]  ;;  %2059 = vmatpush.bf16.msrb.mxu3 %v4419_v9  ;;  %v4416_v30 = vld [vmem:[%s5969_s7 + $0x10] sm:$0xff] }
 0x2f3   : > { %1720 = vst [vmem:[#allocation4 + $0x18] sm:$0xf] %v1719_v31  ;;  %v1652_v34 = vsel %vm4995_vm0, %v1625_v27, %v1651_v32  ;;  %v4417_v27 = vld [vmem:[%s5969_s7 + $0x18] sm:$0xff]  ;;  %v4415_v31 = vld [vmem:[%s5969_s7 + $0x8] sm:$0xff]  ;;  %v4414_v32 = vld [vmem:[%s5969_s7] sm:$0xff] }
 0x2f4   : > { %1653 = vst [vmem:[#allocation4 + $0x20] sm:$0xf] %v1652_v34  ;;  %v4531_v34 = vld [vmem:[%s5968_s6] ss:$0 sm:$0xff] }
 0x2f5   : > { %1686 = vst.msk [vmem:[#allocation4 + $0x20] sm:$0x7] %vm1681_vm1, %v1669_v26 }
 0x2f6   : > { %v1627_v35 = vpop.permute.xlu1 %1626  ;;  %2060 = vmatpush.bf16.msrb.mxu3 %v4418_v18 }
 0x2f7   : > { %v1654_v36 = vld [vmem:[#allocation4 + $0x28] sm:$0xf] }
 0x2f8   : > { %v1655_v37 = vsel %vm4995_vm0, %v1627_v35, %v1654_v36  ;;  %v1671_v38 = vpop.permute.xlu0 %1670  ;;  %v1753_v42 = vld [vmem:[#allocation4 + $0x10] sm:$0xf]  ;;  %v1629_v19 = vpop.permute.xlu2 %1628 }
 0x2f9   : > { %1656 = vst [vmem:[#allocation4 + $0x28] sm:$0xf] %v1655_v37  ;;  %v1949_v35 = vpop.f32.mrf.mxu0 }
 0x2fa   : > { %v1756_v40 = vld [vmem:[#allocation4 + $0x18] sm:$0xf]  ;;  %1687 = vst.msk [vmem:[#allocation4 + $0x28] sm:$0x7] %vm1681_vm1, %v1671_v38  ;;  %2061 = vmatpush.bf16.msrb.mxu3 %v4417_v27 }
 0x2fb   : > { %v1757_v41 = vsel %vm5031_vm9, %v1734_v39, %v1756_v40 }
 0x2fc   : > { %1758 = vst [vmem:[#allocation4 + $0x18] sm:$0xf] %v1757_v41  ;;  %v1721_v47 = vld [vmem:[#allocation4 + $0x20] sm:$0xf] }
 0x2fe   : > { %v1732_v43 = vpop.permute.xlu1 %1731  ;;  %2062 = vmatpush.bf16.msrb.mxu3 %v4416_v30 }
 0x2ff   : > { %v1754_v44 = vsel %vm5031_vm9, %v1732_v43, %v1753_v42 }
 0x300   : > { %1755 = vst [vmem:[#allocation4 + $0x10] sm:$0xf] %v1754_v44  ;;  %v1698_v45 = vpop.permute.xlu0 %1697 }
 0x301   : > { %v1722_v48 = vsel %vm5012_vm3, %v1698_v45, %v1721_v47  ;;  %v1724_v49 = vld [vmem:[#allocation4 + $0x28] sm:$0xf]  ;;  %v1951_v42 = vpop.f32.mrf.mxu0 }
 0x302   : > { %1723 = vst [vmem:[#allocation4 + $0x20] sm:$0xf] %v1722_v48  ;;  %2063 = vmatpush.bf16.msrb.mxu3 %v4415_v31 }
 0x303   : > { %v4400_v53 = vld [vmem:[#allocation4 + $0x14] sm:$0xf0] }
 0x306   : > { %v1700_v16 = vpop.permute.xlu1 %1699  ;;  %2064 = vmatpush.bf16.msrb.mxu3 %v4414_v32 }
 0x307   : > { %v1725_v51 = vsel %vm5012_vm3, %v1700_v16, %v1724_v49  ;;  %v3965_v52 = vld [vmem:[#allocation4 + $0x10] sm:$0xf] }
 0x308   : > { %1726 = vst [vmem:[#allocation4 + $0x28] sm:$0xf] %v1725_v51  ;;  %v1738_v28 = vpop.permute.xlu0 %1737  ;;  %v3966_v54 = vor.u32 %v4400_v53, %v3965_v52 }
 0x309   : > { %v1759_v55 = vld [vmem:[#allocation4 + $0x20] sm:$0xf]  ;;  %v1954_v47 = vpop.f32.mrf.mxu0 }
 0x30a   : > { %v1760_v56 = vsel %vm5031_vm9, %v1736_v50, %v1759_v55  ;;  %1924 = vmatmul.bf16.gmra.mxu2 %v3966_v54 }
 0x30b   : > { %1761 = vst [vmem:[#allocation4 + $0x20] sm:$0xf] %v1760_v56  ;;  %v1959_v56 = vpop.f32.mrf.mxu3 }
 0x30e   : > { %v1481_v58 = vpop.permute.xlu1 %1480 }
 0x30f   : > { %v1762_v59 = vld [vmem:[#allocation4 + $0x28] sm:$0xf]  ;;  %v1510_v60 = vsel %vm4955_vm11, %v1481_v58, %v1509_v57 }
 0x310   : > { %v1763_v0 = vsel %vm5031_vm9, %v1738_v28, %v1762_v59  ;;  %1511 = vst [vmem:[#allocation4 + $0x30] sm:$0xf] %v1510_v60  ;;  %v1585_v2 = vpop.permute.xlu0 %1584 }
 0x311   : > { %1764 = vst [vmem:[#allocation4 + $0x28] sm:$0xf] %v1763_v0  ;;  %v1956_v53 = vpop.f32.mrf.mxu0 }
 0x312   : > { %1570 = vst.msk [vmem:[#allocation4 + $0x30] sm:$0x7] %vm1564_vm14, %v1554_v62  ;;  %v3973_v12 = vld [vmem:[#allocation4 + $0x20] sm:$0xf] }
 0x313   : > { %v1961_v0 = vpop.f32.mrf.mxu3 }
 0x316   : > { %v1483_v7 = vpop.permute.xlu1 %1482 }
 0x317   : > { %v1513_v8 = vsel %vm4955_vm11, %v1483_v7, %v1512_v6 }
 0x318   : > { %1514 = vst [vmem:[#allocation4 + $0x38] sm:$0xf] %v1513_v8  ;;  %v1556_v10 = vpop.permute.xlu0 %1555  ;;  %v4402_v13 = vld [vmem:[#allocation4 + $0x24] sm:$0xf0] }
 0x319   : > { %v1613_v14 = vld [vmem:[#allocation4 + $0x30] sm:$0xf]  ;;  %1571 = vst.msk [vmem:[#allocation4 + $0x38] sm:$0x7] %vm1564_vm14, %v1556_v10  ;;  %v3974_v15 = vor.u32 %v4402_v13, %v3973_v12 }
 0x31a   : > { %v1614_v17 = vsel %vm4977_vm13, %v1585_v2, %v1613_v14 }
 0x31b   : > { %1615 = vst [vmem:[#allocation4 + $0x30] sm:$0xf] %v1614_v17  ;;  %1929 = vmatmul.bf16.gmra.mxu2 %v3974_v15  ;;  %v5151_v17 = vld [vmem:[%s5970_s8] ss:$0 sm:$0xff] }
 0x31e   : > { %v1673_v23 = vpop.permute.xlu1 %1672 }
 0x320   : > { %v4404_v25 = vld [vmem:[#allocation4 + $0x34] sm:$0xf0] }
 0x322   : > { %v1657_v21 = vld [vmem:[#allocation4 + $0x30] sm:$0xf] }
 0x323   : > { %v1658_v22 = vsel %vm4995_vm0, %v1629_v19, %v1657_v21 }
 0x324   : > { %1659 = vst [vmem:[#allocation4 + $0x30] sm:$0xf] %v1658_v22 }
 0x325   : > { %1688 = vst.msk [vmem:[#allocation4 + $0x30] sm:$0x7] %vm1681_vm1, %v1673_v23 }
 0x32c   : > { %v3981_v24 = vld [vmem:[#allocation4 + $0x30] sm:$0xf] }
 0x32d   : > { %v3982_v26 = vor.u32 %v4404_v25, %v3981_v24 }
 0x32f   : > { %1934 = vmatmul.bf16.gmra.mxu2 %v3982_v26 }
 0x360   : > { %v1964_v62 = vpop.f32.mrf.mxu3 }
 0x368   : > { %v1920_v36 = vpop.f32.mrf.mxu2  ;;  %v1966_v10 = vpop.f32.mrf.mxu3 }
 0x369   : > { %v1921_v37 = vadd.f32 %v4531_v34, %v1920_v36  ;;  %v2155_v36 = vld [vmem:[#allocation4 + $0x8] sm:$0xf] }
 0x36b   : > { %v1950_v38 = vadd.f32 %v1949_v35, %v1921_v37 }
 0x36d   : > { %v1969_v39 = vmax.f32 %v1950_v38, 0.0 }
 0x36f   : > { %1977 = vst [vmem:[%s5138_s22] sm:$0xff] %v1969_v39 }
 0x370   : > { %v1922_v40 = vpop.f32.mrf.mxu2 }
 0x371   : > { %v1923_v41 = vadd.f32 %v4531_v34, %v1922_v40 }
 0x373   : > { %v1952_v43 = vadd.f32 %v1951_v42, %v1923_v41 }
 0x375   : > { %v1970_v44 = vmax.f32 %v1952_v43, 0.0 }
 0x377   : > { %1978 = vst [vmem:[%s5138_s22 + $0x8] sm:$0xff] %v1970_v44  ;;  %v1985_v45 = vpack.c.bf16 %v1970_v44, %v1969_v39 }
 0x379   : > { %2065 = vmatmul.bf16.vlgmr.msrb.gmra.mxu3 %v1985_v45 }
 0x38d   : > { %v1925_v48 = vpop.f32.mrf.mxu2 }
 0x38e   : > { %v1926_v49 = vadd.f32 %v4531_v34, %v1925_v48  ;;  %v2158_v48 = vld [vmem:[#allocation4 + $0x10] sm:$0xf] }
 0x390   : > { %v1955_v16 = vadd.f32 %v1954_v47, %v1926_v49 }
 0x392   : > { %v1971_v50 = vmax.f32 %v1955_v16, 0.0 }
 0x394   : > { %1979 = vst [vmem:[%s5138_s22 + $0x10] sm:$0xff] %v1971_v50 }
 0x395   : > { %v1927_v51 = vpop.f32.mrf.mxu2 }
 0x396   : > { %v1928_v52 = vadd.f32 %v4531_v34, %v1927_v51 }
 0x398   : > { %v1957_v28 = vadd.f32 %v1956_v53, %v1928_v52 }
 0x39a   : > { %v1972_v54 = vmax.f32 %v1957_v28, 0.0 }
 0x39c   : > { %1980 = vst [vmem:[%s5138_s22 + $0x18] sm:$0xff] %v1972_v54  ;;  %v1986_v55 = vpack.c.bf16 %v1972_v54, %v1971_v50  ;;  %v4438_v50 = vld [vmem:[%s5971_s9 + $0x40] sm:$0xff] }
 0x39d   : > { %2645 = vmatpush.bf16.msrb.mxu2 %v4438_v50 }
 0x39e   : > { %v1930_v57 = vpop.f32.mrf.mxu2  ;;  %2070 = vmatmul.bf16.gmra.mxu3 %v1986_v55 }
 0x39f   : > { %v1931_v58 = vadd.f32 %v4531_v34, %v1930_v57 }
 0x3a1   : > { %v1960_v59 = vadd.f32 %v1959_v56, %v1931_v58 }
 0x3a3   : > { %v1973_v60 = vmax.f32 %v1960_v59, 0.0 }
 0x3a5   : > { %1981 = vst [vmem:[%s5138_s22 + $0x20] sm:$0xff] %v1973_v60 }
 0x3a6   : > { %v1932_v63 = vpop.f32.mrf.mxu2 }
 0x3a7   : > { %v1933_v61 = vadd.f32 %v4531_v34, %v1932_v63 }
 0x3a9   : > { %v1962_v2 = vadd.f32 %v1961_v0, %v1933_v61 }
 0x3ab   : > { %v1974_v3 = vmax.f32 %v1962_v2, 0.0  ;;  %v2161_v2 = vld [vmem:[#allocation4 + $0x18] sm:$0xf] }
 0x3ad   : > { %1982 = vst [vmem:[%s5138_s22 + $0x28] sm:$0xff] %v1974_v3  ;;  %v1987_v4 = vpack.c.bf16 %v1974_v3, %v1973_v60 }
 0x3af   : > { %2075 = vmatmul.bf16.gmra.mxu3 %v1987_v4 }
 0x3b2   : > { %v1935_v5 = vpop.f32.mrf.mxu2 }
 0x3b3   : > { %v1936_v6 = vadd.f32 %v4531_v34, %v1935_v5 }
 0x3b5   : > { %v1965_v7 = vadd.f32 %v1964_v62, %v1936_v6 }
 0x3b7   : > { %v1975_v8 = vmax.f32 %v1965_v7, 0.0 }
 0x3b9   : > { %1983 = vst [vmem:[%s5138_s22 + $0x30] sm:$0xff] %v1975_v8 }
 0x3ba   : > { %v1937_v9 = vpop.f32.mrf.mxu2 }
 0x3bb   : > { %v1938_v12 = vadd.f32 %v4531_v34, %v1937_v9 }
 0x3bd   : > { %v1967_v13 = vadd.f32 %v1966_v10, %v1938_v12 }
 0x3bf   : > { %v1976_v14 = vmax.f32 %v1967_v13, 0.0 }
 0x3c1   : > { %1984 = vst [vmem:[%s5138_s22 + $0x38] sm:$0xff] %v1976_v14  ;;  %v1988_v15 = vpack.c.bf16 %v1976_v14, %v1975_v8 }
 0x3c3   : > { %2080 = vmatmul.bf16.gmra.mxu3 %v1988_v15 }
 0x3fc   : > { %v2066_v18 = vpop.f32.mrf.mxu3 }
 0x3fd   : > { %v2067_v19 = vadd.f32 %v5151_v17, %v2066_v18  ;;  %v2164_v18 = vld [vmem:[#allocation4 + $0x20] sm:$0xf] }
 0x3ff   : > { %v2085_v21 = vmax.f32 %v2067_v19, 0.0 }
 0x401   : > { %v2092_v22 = vpack.c.bf16 %v2085_v21, %v2085_v21 }
 0x403   : > { %2323 = vrot.lane.b32.xlu1 %v2092_v22, %s5994_s24  ;;  %2183 = vrot.lane.b32.xlu2 %v2092_v22, %s6019_s18  ;;  %v2100_v23 = vshrl.u32 %v2092_v22, 16  ;;  %v2103_v24 = vshll.u32 %v2092_v22, 16 }
 0x404   : > { %v2068_v25 = vpop.f32.mrf.mxu3 }
 0x405   : > { %v2069_v26 = vadd.f32 %v5151_v17, %v2068_v25  ;;  %v2225_v27 = vrot.slane %v2100_v23, 4  ;;  %v2226_v30 = vrot.slane %v2103_v24, 5  ;;  %v2102_v31 = vrot.slane %v2100_v23, 7 }
 0x407   : > { %v2086_v32 = vmax.f32 %v2069_v26, 0.0  ;;  %v2227_v34 = vor.u32 %v2226_v30, %v2225_v27  ;;  %v2105_v35 = vor.u32 %v2103_v24, %v2102_v31 }
 0x409   : > { %v2093_v37 = vpack.c.bf16 %v2086_v32, %v2086_v32  ;;  %v2228_v38 = vrot.slane %v2227_v34, 4  ;;  %v2156_v39 = vsel %vm4832_vm6, %v2105_v35, %v2155_v36 }
 0x40a   : > { %2157 = vst [vmem:[#allocation4 + $0x8] sm:$0xf] %v2156_v39  ;;  %v2167_v39 = vld [vmem:[#allocation4 + $0x28] sm:$0xf] }
 0x40b   : > { %2325 = vrot.lane.b32.xlu2 %v2093_v37, %s5994_s24  ;;  %2253 = vrot.lane.b32.xlu0 %v2228_v38, %s6020_s23  ;;  %v2107_v40 = vshrl.u32 %v2093_v37, 16  ;;  %v2110_v41 = vshll.u32 %v2093_v37, 16 }
 0x40c   : > { %2281 = vrot.lane.b32.xlu1 %v2105_v35, %s6021_s29 }
 0x40d   : > { %v2109_v42 = vrot.slane %v2107_v40, 7  ;;  %v2229_v43 = vrot.slane %v2107_v40, 4  ;;  %v2230_v44 = vrot.slane %v2110_v41, 5 }
 0x40f   : > { %v2112_v45 = vor.u32 %v2110_v41, %v2109_v42  ;;  %v2231_v47 = vor.u32 %v2230_v44, %v2229_v43 }
 0x411   : > { %v2159_v49 = vsel %vm4832_vm6, %v2112_v45, %v2158_v48  ;;  %v2232_v16 = vrot.slane %v2231_v47, 4 }
 0x412   : > { %2160 = vst [vmem:[#allocation4 + $0x10] sm:$0xf] %v2159_v49 }
 0x413   : > { %2429 = vrot.lane.b32.xlu2 %v2093_v37, %s6022_s0  ;;  %2185 = vrot.lane.b32.xlu0 %v2093_v37, %s6019_s18  ;;  %2471 = vst.msk [vmem:[#allocation4 + $0x4] sm:$0x7] %vm1771_vm7, %v2232_v16 }
 0x414   : > { %2393 = vrot.lane.b32.xlu1 %v2112_v45, %s6023_s30 }
 0x41a   : > { %v4422_v23 = vld [vmem:[#allocation4 + $0x4] sm:$0xf] }
 0x41b   : > { %2283 = vrot.lane.b32.xlu2 %v2112_v45, %s6021_s29  ;;  %2365 = vrot.lane.b32.xlu0 %v2228_v38, %s6024_s26 }
 0x421   : > { %v2071_v51 = vpop.f32.mrf.mxu3 }
 0x422   : > { %v2072_v52 = vadd.f32 %v5151_v17, %v2071_v51  ;;  %v2170_v51 = vld [vmem:[#allocation4 + $0x30] sm:$0xf] }
 0x423   : > { %2255 = vrot.lane.b32.xlu2 %v2232_v16, %s6020_s23 }
 0x424   : > { %v2087_v53 = vmax.f32 %v2072_v52, 0.0 }
 0x426   : > { %v2094_v28 = vpack.c.bf16 %v2087_v53, %v2087_v53 }
 0x428   : > { %2431 = vrot.lane.b32.xlu0 %v2094_v28, %s6022_s0  ;;  %2187 = vrot.lane.b32.xlu1 %v2094_v28, %s6019_s18  ;;  %v2114_v54 = vshrl.u32 %v2094_v28, 16  ;;  %v2117_v55 = vshll.u32 %v2094_v28, 16 }
 0x429   : > { %v2073_v56 = vpop.f32.mrf.mxu3 }
 0x42a   : > { %v2074_v57 = vadd.f32 %v5151_v17, %v2073_v56  ;;  %v2116_v58 = vrot.slane %v2114_v54, 7  ;;  %v2233_v59 = vrot.slane %v2114_v54, 4  ;;  %v2234_v60 = vrot.slane %v2117_v55, 5 }
 0x42c   : > { %v2088_v63 = vmax.f32 %v2074_v57, 0.0  ;;  %v2119_v61 = vor.u32 %v2117_v55, %v2116_v58  ;;  %v2235_v0 = vor.u32 %v2234_v60, %v2233_v59 }
 0x42e   : > { %v5178_v3 = vpack.c.bf16 %v2088_v63, %v2088_v63  ;;  %v2162_v4 = vsel %vm4832_vm6, %v2119_v61, %v2161_v2  ;;  %2285 = vrot.lane.b32.xlu2 %v2119_v61, %s6021_s29  ;;  %v2236_v62 = vrot.slane %v2235_v0, 4 }
 0x42f   : > { %2163 = vst [vmem:[#allocation4 + $0x18] sm:$0xf] %v2162_v4 }
 0x430   : > { %2472 = vst.msk [vmem:[#allocation4 + $0xc] sm:$0x7] %vm1771_vm7, %v2236_v62  ;;  %2257 = vrot.lane.b32.xlu0 %v2236_v62, %s6020_s23  ;;  %2367 = vrot.lane.b32.xlu1 %v2232_v16, %s6024_s26  ;;  %v2121_v5 = vshrl.u32 %v5178_v3, 16  ;;  %v2124_v6 = vshll.u32 %v5178_v3, 16 }
 0x432   : > { %v2076_v7 = vpop.f32.mrf.mxu3  ;;  %v2237_v8 = vrot.slane %v2121_v5, 4  ;;  %v2238_v9 = vrot.slane %v2124_v6, 5  ;;  %v2123_v10 = vrot.slane %v2121_v5, 7 }
 0x433   : > { %v2077_v12 = vadd.f32 %v5151_v17, %v2076_v7 }
 0x434   : > { %v2239_v13 = vor.u32 %v2238_v9, %v2237_v8  ;;  %v5189_v14 = vor.u32 %v2124_v6, %v2123_v10  ;;  %v2204_v10 = vld [vmem:[#allocation4 + $0x8] sm:$0xf] }
 0x435   : > { %v2089_v15 = vmax.f32 %v2077_v12, 0.0 }
 0x436   : > { %2395 = vrot.lane.b32.xlu2 %v2119_v61, %s6023_s30  ;;  %v2240_v19 = vrot.slane %v2239_v13, 4  ;;  %v2165_v21 = vsel %vm4832_vm6, %v5189_v14, %v2164_v18  ;;  %v4436_v18 = vld [vmem:[%s5971_s9 + $0x30] sm:$0xff] }
 0x437   : > { %v5195_v22 = vpack.c.bf16 %v2089_v15, %v2089_v15  ;;  %v4063_v24 = vld [vmem:[#allocation4 + $0x8] sm:$0xf0]  ;;  %2166 = vst [vmem:[#allocation4 + $0x20] sm:$0xf] %v2165_v21 }
 0x438   : > { %2189 = vrot.lane.b32.xlu0 %v5178_v3, %s6019_s18  ;;  %2327 = vrot.lane.b32.xlu1 %v2094_v28, %s5994_s24  ;;  %v4066_v25 = vor.u32 %v4422_v23, %v4063_v24  ;;  %2473 = vst.msk [vmem:[#allocation4 + $0x14] sm:$0x7] %vm1771_vm7, %v2240_v19 }
 0x439   : > { %v2128_v26 = vshrl.u32 %v5195_v22, 16  ;;  %v2131_v27 = vshll.u32 %v5195_v22, 16 }
 0x43a   : > { %v2078_v30 = vpop.f32.mrf.mxu3  ;;  %4127 = vmatmul.msk.bf16.vlgmr.msrb.gmra.mxu2 %vm1898_vm8, %v4066_v25 }
 0x43b   : > { %v2241_v31 = vrot.slane %v2128_v26, 4  ;;  %v2242_v32 = vrot.slane %v2131_v27, 5  ;;  %v2079_v34 = vadd.f32 %v5151_v17, %v2078_v30  ;;  %v2130_v35 = vrot.slane %v2128_v26, 7  ;;  %v2207_v26 = vld [vmem:[#allocation4 + $0x10] sm:$0xf] }
 0x43d   : > { %v2243_v36 = vor.u32 %v2242_v32, %v2241_v31  ;;  %v2090_v37 = vmax.f32 %v2079_v34, 0.0  ;;  %v2133_v38 = vor.u32 %v2131_v27, %v2130_v35 }
 0x43e   : > { %2329 = vrot.lane.b32.xlu2 %v5178_v3, %s5994_s24 }
 0x43f   : > { %v2244_v40 = vrot.slane %v2243_v36, 4  ;;  %v5207_v41 = vpack.c.bf16 %v2090_v37, %v2090_v37  ;;  %v2168_v42 = vsel %vm4832_vm6, %v2133_v38, %v2167_v39  ;;  %v4424_v54 = vld [vmem:[#allocation4 + $0x14] sm:$0xf]  ;;  %v4435_v36 = vld [vmem:[%s5971_s9 + $0x28] sm:$0xff] }
 0x440   : > { %2369 = vrot.lane.b32.xlu0 %v2236_v62, %s6024_s26  ;;  %2191 = vrot.lane.b32.xlu1 %v5195_v22, %s6019_s18  ;;  %2169 = vst [vmem:[#allocation4 + $0x28] sm:$0xf] %v2168_v42  ;;  %v2173_v62 = vld [vmem:[#allocation4 + $0x38] sm:$0xf] }
 0x441   : > { %2474 = vst.msk [vmem:[#allocation4 + $0x1c] sm:$0x7] %vm1771_vm7, %v2244_v40  ;;  %v2135_v43 = vshrl.u32 %v5207_v41, 16  ;;  %v2138_v44 = vshll.u32 %v5207_v41, 16  ;;  %v4433_v42 = vld [vmem:[%s5971_s9 + $0x18] sm:$0xff] }
 0x443   : > { %v2137_v45 = vrot.slane %v2135_v43, 7  ;;  %v2245_v47 = vrot.slane %v2135_v43, 4  ;;  %v2246_v48 = vrot.slane %v2138_v44, 5 }
 0x445   : > { %v2140_v49 = vor.u32 %v2138_v44, %v2137_v45  ;;  %v2247_v16 = vor.u32 %v2246_v48, %v2245_v47  ;;  %v4432_v47 = vld [vmem:[%s5971_s9 + $0x10] sm:$0xff] }
 0x446   : > { %v2081_v50 = vpop.f32.mrf.mxu3  ;;  %2259 = vrot.lane.b32.xlu2 %v2240_v19, %s6020_s23 }
 0x447   : > { %v2082_v52 = vadd.f32 %v5151_v17, %v2081_v50  ;;  %v2171_v53 = vsel %vm4832_vm6, %v2140_v49, %v2170_v51  ;;  %v2248_v28 = vrot.slane %v2247_v16, 4  ;;  %v4431_v16 = vld [vmem:[%s5971_s9 + $0x8] sm:$0xff] }
 0x448   : > { %2287 = vrot.lane.b32.xlu0 %v5189_v14, %s6021_s29  ;;  %2371 = vrot.lane.b32.xlu1 %v2240_v19, %s6024_s26  ;;  %v4071_v55 = vld [vmem:[#allocation4 + $0x18] sm:$0xf0]  ;;  %2172 = vst [vmem:[#allocation4 + $0x30] sm:$0xf] %v2171_v53 }
 0x449   : > { %v2091_v56 = vmax.f32 %v2082_v52, 0.0  ;;  %v4074_v57 = vor.u32 %v4424_v54, %v4071_v55  ;;  %2475 = vst.msk [vmem:[#allocation4 + $0x24] sm:$0x7] %vm1771_vm7, %v2248_v28  ;;  %v2210_v52 = vld [vmem:[#allocation4 + $0x18] sm:$0xf]  ;;  %v4430_v54 = vld [vmem:[%s5971_s9] sm:$0xff] }
 0x44b   : > { %v2098_v58 = vpack.c.bf16 %v2091_v56, %v2091_v56  ;;  %4128 = vmatmul.msk.bf16.gmra.mxu2 %vm1898_vm8, %v4074_v57 }
 0x44d   : > { %v2142_v17 = vshrl.u32 %v2098_v58, 16  ;;  %v2145_v59 = vshll.u32 %v2098_v58, 16 }
 0x44e   : > { %v2083_v60 = vpop.f32.mrf.mxu3  ;;  %2291 = vrot.lane.b32.xlu2 %v2140_v49, %s6021_s29 }
 0x44f   : > { %v2249_v63 = vrot.slane %v2142_v17, 4  ;;  %v2250_v61 = vrot.slane %v2145_v59, 5  ;;  %v2144_v0 = vrot.slane %v2142_v17, 7 }
 0x450   : > { %2261 = vrot.lane.b32.xlu0 %v2244_v40, %s6020_s23  ;;  %2289 = vrot.lane.b32.xlu1 %v2133_v38, %s6021_s29  ;;  %v4426_v7 = vld [vmem:[#allocation4 + $0x24] sm:$0xf] }
 0x451   : > { %v2251_v2 = vor.u32 %v2250_v61, %v2249_v63  ;;  %v2147_v4 = vor.u32 %v2145_v59, %v2144_v0  ;;  %v2213_v59 = vld [vmem:[#allocation4 + $0x20] sm:$0xf] }
 0x453   : > { %v2252_v5 = vrot.slane %v2251_v2, 4  ;;  %v2174_v6 = vsel %vm4832_vm6, %v2147_v4, %v2173_v62  ;;  %vm1256_vm6 = vcmask 257024  }
 0x454   : > { %2175 = vst [vmem:[#allocation4 + $0x38] sm:$0xf] %v2174_v6 }
 0x455   : > { %2476 = vst.msk [vmem:[#allocation4 + $0x2c] sm:$0x7] %vm1771_vm7, %v2252_v5  ;;  %vm5425_vm7 = vmand %vm1256_vm6, %vm1492_vm10 }
 0x456   : > { %2331 = vrot.lane.b32.xlu2 %v5195_v22, %s5994_s24 }
 0x458   : > { %2397 = vrot.lane.b32.xlu0 %v5189_v14, %s6023_s30  ;;  %2399 = vrot.lane.b32.xlu1 %v2133_v38, %s6023_s30  ;;  %v4434_v38 = vld [vmem:[%s5971_s9 + $0x20] sm:$0xff] }
 0x45c   : > { %v4079_v8 = vld [vmem:[#allocation4 + $0x28] sm:$0xf0] }
 0x45d   : > { %v2184_v9 = vpop.permute.xlu2 %2183  ;;  %v4082_v12 = vor.u32 %v4426_v7, %v4079_v8  ;;  %v2216_v7 = vld [vmem:[#allocation4 + $0x28] sm:$0xf] }
 0x45e   : > { %v2205_v29 = vsel %vm4955_vm11, %v2184_v9, %v2204_v10  ;;  %2375 = vrot.lane.b32.xlu2 %v2248_v28, %s6024_s26 }
 0x45f   : > { %2206 = vst [vmem:[#allocation4 + $0x8] sm:$0xf] %v2205_v29  ;;  %4129 = vmatmul.msk.bf16.gmra.mxu2 %vm1898_vm8, %v4082_v12 }
 0x460   : > { %2333 = vrot.lane.b32.xlu0 %v5207_v41, %s5994_s24  ;;  %2373 = vrot.lane.b32.xlu1 %v2244_v40, %s6024_s26 }
 0x465   : > { %v2326_v13 = vpop.permute.xlu2 %2325 }
 0x466   : > { %2401 = vrot.lane.b32.xlu2 %v2140_v49, %s6023_s30 }
 0x468   : > { %2433 = vrot.lane.b32.xlu0 %v5178_v3, %s6022_s0  ;;  %2435 = vrot.lane.b32.xlu1 %v5195_v22, %s6022_s0  ;;  %v4437_v3 = vld [vmem:[%s5971_s9 + $0x38] sm:$0xff]  ;;  %v2302_v22 = vld [vmem:[#allocation4] sm:$0xf] }
 0x469   : > { %2609 = vmatpush.bf16.msrb.mxu1 %v4437_v3 }
 0x46d   : > { %v5253_v14 = vpop.permute.xlu2 %2429  ;;  %2610 = vmatpush.bf16.msrb.mxu1 %v4436_v18 }
 0x46e   : > { %2263 = vrot.lane.b32.xlu2 %v2248_v28, %s6020_s23 }
 0x470   : > { %2403 = vrot.lane.b32.xlu0 %v2147_v4, %s6023_s30  ;;  %2193 = vrot.lane.b32.xlu1 %v5207_v41, %s6019_s18 }
 0x471   : > { %2611 = vmatpush.bf16.msrb.mxu1 %v4435_v36 }
 0x475   : > { %v2324_v15 = vpop.permute.xlu1 %2323  ;;  %v2284_v19 = vpop.permute.xlu2 %2283  ;;  %2612 = vmatpush.bf16.msrb.mxu1 %v4434_v38 }
 0x476   : > { %2293 = vrot.lane.b32.xlu2 %v2147_v4, %s6021_s29 }
 0x478   : > { %2437 = vrot.lane.b32.xlu0 %v5207_v41, %s6022_s0  ;;  %2439 = vrot.lane.b32.xlu1 %v2098_v58, %s6022_s0 }
 0x479   : > { %2613 = vmatpush.bf16.msrb.mxu1 %v4433_v42 }
 0x47d   : > { %v2254_v21 = vpop.permute.xlu0 %2253  ;;  %v2256_v32 = vpop.permute.xlu2 %2255  ;;  %2614 = vmatpush.bf16.msrb.mxu1 %v4432_v47 }
 0x47e   : > { %2274 = vst.msk [vmem:[#allocation4 + $0x8] sm:$0x7] %vm1564_vm14, %v2254_v21  ;;  %v2282_v23 = vpop.permute.xlu1 %2281  ;;  %2265 = vrot.lane.b32.xlu2 %v2252_v5, %s6020_s23 }
 0x47f   : > { %v2303_v24 = vsel %vm4977_vm13, %v2282_v23, %v2302_v22 }
 0x480   : > { %2304 = vst [vmem:[#allocation4] sm:$0xf] %v2303_v24  ;;  %2195 = vrot.lane.b32.xlu0 %v2098_v58, %s6019_s18  ;;  %2335 = vrot.lane.b32.xlu1 %v2098_v58, %s5994_s24 }
 0x481   : > { %2615 = vmatpush.bf16.msrb.mxu1 %v4431_v16 }
 0x485   : > { %v2305_v25 = vld [vmem:[#allocation4 + $0x8] sm:$0xf]  ;;  %v2186_v27 = vpop.permute.xlu0 %2185  ;;  %2616 = vmatpush.bf16.msrb.mxu1 %v4430_v54 }
 0x486   : > { %v2306_v30 = vsel %vm4977_vm13, %v2284_v19, %v2305_v25  ;;  %v2208_v31 = vsel %vm4955_vm11, %v2186_v27, %v2207_v26  ;;  %v2394_v44 = vpop.permute.xlu1 %2393 }
 0x487   : > { %2307 = vst [vmem:[#allocation4 + $0x8] sm:$0xf] %v2306_v30  ;;  %v2344_v34 = vld [vmem:[#allocation4] sm:$0xf] }
 0x488   : > { %v2345_v35 = vsel %vm4995_vm0, %v2324_v15, %v2344_v34  ;;  %2209 = vst [vmem:[#allocation4 + $0x10] sm:$0xf] %v2208_v31  ;;  %2377 = vrot.lane.b32.xlu0 %v2252_v5, %s6024_s26  ;;  %v2286_v40 = vpop.permute.xlu2 %2285  ;;  %s6025_s26 = sshll.u32 %s6044_s1, 6 }
 0x489   : > { %2346 = vst [vmem:[#allocation4] sm:$0xf] %v2345_v35  ;;  %s5399_s22 = scalar_lea.vmem %s5978_s16, %s6025_s26 }
 0x48a   : > { %2275 = vst.msk [vmem:[#allocation4 + $0x10] sm:$0x7] %vm1564_vm14, %v2256_v32 }
 0x48d   : > { %v2366_v37 = vpop.permute.xlu0 %2365 }
 0x48e   : > { %2386 = vst.msk [vmem:[#allocation4] sm:$0x7] %vm1681_vm1, %v2366_v37  ;;  %v2347_v39 = vld [vmem:[#allocation4 + $0x8] sm:$0xf] }
 0x48f   : > { %v2348_v41 = vsel %vm4995_vm0, %v2326_v13, %v2347_v39 }
 0x490   : > { %2349 = vst [vmem:[#allocation4 + $0x8] sm:$0xf] %v2348_v41  ;;  %v2396_v50 = vpop.permute.xlu2 %2395 }
 0x491   : > { %v2308_v43 = vld [vmem:[#allocation4 + $0x10] sm:$0xf] }
 0x492   : > { %v2309_v45 = vsel %vm4977_vm13, %v2286_v40, %v2308_v43 }
 0x493   : > { %2310 = vst [vmem:[#allocation4 + $0x10] sm:$0xf] %v2309_v45 }
 0x495   : > { %v2411_v48 = vld [vmem:[#allocation4] sm:$0xf] }
 0x496   : > { %v2412_v49 = vsel %vm5012_vm3, %v2394_v44, %v2411_v48 }
 0x497   : > { %2413 = vst [vmem:[#allocation4] sm:$0xf] %v2412_v49 }
 0x498   : > { %v2330_v17 = vpop.permute.xlu2 %2329 }
 0x49a   : > { %v2432_v51 = vpop.permute.xlu0 %2431  ;;  %v2188_v53 = vpop.permute.xlu1 %2187  ;;  %v2350_v2 = vld [vmem:[#allocation4 + $0x10] sm:$0xf] }
 0x49b   : > { %v2211_v28 = vsel %vm4955_vm11, %v2188_v53, %v2210_v52 }
 0x49c   : > { %2212 = vst [vmem:[#allocation4 + $0x18] sm:$0xf] %v2211_v28 }
 0x49e   : > { %v2447_v55 = vld [vmem:[#allocation4] sm:$0xf] }
 0x49f   : > { %v2448_v56 = vsel %vm5031_vm9, %v5253_v14, %v2447_v55  ;;  %v4428_v55 = vld [vmem:[#allocation4 + $0x34] sm:$0xf] }
 0x4a0   : > { %2449 = vst [vmem:[#allocation4] sm:$0xf] %v2448_v56  ;;  %v2260_v5 = vpop.permute.xlu2 %2259  ;;  %v4087_v56 = vld [vmem:[#allocation4 + $0x38] sm:$0xf0] }
 0x4a2   : > { %v2258_v57 = vpop.permute.xlu0 %2257  ;;  %v2368_v58 = vpop.permute.xlu1 %2367 }
 0x4a3   : > { %2276 = vst.msk [vmem:[#allocation4 + $0x18] sm:$0x7] %vm1564_vm14, %v2258_v57  ;;  %v4090_v57 = vor.u32 %v4428_v55, %v4087_v56 }
 0x4a4   : > { %2387 = vst.msk [vmem:[#allocation4 + $0x8] sm:$0x7] %vm1681_vm1, %v2368_v58 }
 0x4a5   : > { %4130 = vmatmul.msk.bf16.gmra.mxu2 %vm1898_vm8, %v4090_v57  ;;  %vm5435_vm8 = vmand %vm1256_vm6, %vm1440_vm5 }
 0x4a7   : > { %v4061_v18 = vld [vmem:[#allocation4] sm:$0xf] }
 0x4a8   : > { %v2292_v29 = vpop.permute.xlu2 %2291 }
 0x4aa   : > { %v2190_v60 = vpop.permute.xlu0 %2189  ;;  %v2328_v63 = vpop.permute.xlu1 %2327  ;;  %v2311_v14 = vld [vmem:[#allocation4 + $0x18] sm:$0xf] }
 0x4ab   : > { %v2414_v61 = vld [vmem:[#allocation4 + $0x8] sm:$0xf]  ;;  %v2214_v0 = vsel %vm4955_vm11, %v2190_v60, %v2213_v59  ;;  %v2351_v62 = vsel %vm4995_vm0, %v2328_v63, %v2350_v2  ;;  %v2219_v63 = vld [vmem:[#allocation4 + $0x30] sm:$0xf] }
 0x4ac   : > { %v2415_v4 = vsel %vm5012_vm3, %v2396_v50, %v2414_v61  ;;  %2215 = vst [vmem:[#allocation4 + $0x20] sm:$0xf] %v2214_v0 }
 0x4ad   : > { %2416 = vst [vmem:[#allocation4 + $0x8] sm:$0xf] %v2415_v4 }
 0x4ae   : > { %2277 = vst.msk [vmem:[#allocation4 + $0x20] sm:$0x7] %vm1564_vm14, %v2260_v5  ;;  %v4446_v5 = vld [vmem:[%s5973_s11 + $0x38] sm:$0xff] }
 0x4af   : > { %2352 = vst [vmem:[#allocation4 + $0x10] sm:$0xf] %v2351_v62  ;;  %2755 = vmatpush.bf16.msra.mxu3 %v4446_v5 }
 0x4b0   : > { %v2332_v22 = vpop.permute.xlu2 %2331 }
 0x4b2   : > { %v2370_v6 = vpop.permute.xlu0 %2369  ;;  %v2192_v8 = vpop.permute.xlu1 %2191 }
 0x4b3   : > { %2388 = vst.msk [vmem:[#allocation4 + $0x10] sm:$0x7] %vm1681_vm1, %v2370_v6  ;;  %v2217_v9 = vsel %vm4955_vm11, %v2192_v8, %v2216_v7  ;;  %v4445_v8 = vld [vmem:[%s5973_s11 + $0x30] sm:$0xff] }
 0x4b4   : > { %2218 = vst [vmem:[#allocation4 + $0x28] sm:$0xf] %v2217_v9  ;;  %v2450_v10 = vld [vmem:[#allocation4 + $0x8] sm:$0xf]  ;;  %2756 = vmatpush.bf16.msra.mxu3 %v4445_v8 }
 0x4b5   : > { %v2451_v12 = vsel %vm5031_vm9, %v2432_v51, %v2450_v10  ;;  %v2314_v24 = vld [vmem:[#allocation4 + $0x20] sm:$0xf] }
 0x4b6   : > { %2452 = vst [vmem:[#allocation4 + $0x8] sm:$0xf] %v2451_v12 }
 0x4b8   : > { %v2376_v39 = vpop.permute.xlu2 %2375 }
 0x4ba   : > { %v2288_v13 = vpop.permute.xlu0 %2287  ;;  %v2372_v15 = vpop.permute.xlu1 %2371  ;;  %v2417_v34 = vld [vmem:[#allocation4 + $0x10] sm:$0xf] }
 0x4bb   : > { %v2312_v3 = vsel %vm4977_vm13, %v2288_v13, %v2311_v14 }
 0x4bc   : > { %2313 = vst [vmem:[#allocation4 + $0x18] sm:$0xf] %v2312_v3  ;;  %v2222_v3 = vld [vmem:[#allocation4 + $0x38] sm:$0xf] }
 0x4bd   : > { %v4423_v19 = vld [vmem:[#allocation4 + $0x4] sm:$0xf0] }
 0x4be   : > { %v4062_v21 = vor.u32 %v4423_v19, %v4061_v18  ;;  %v4443_v19 = vld [vmem:[%s5973_s11 + $0x20] sm:$0xff] }
 0x4c0   : > { %2617 = vmatmul.bf16.vlgmr.msrb.gmra.mxu1 %v4062_v21  ;;  %v2402_v48 = vpop.permute.xlu2 %2401 }
 0x4c2   : > { %v2262_v23 = vpop.permute.xlu0 %2261  ;;  %v2290_v25 = vpop.permute.xlu1 %2289 }
 0x4c3   : > { %v2353_v26 = vld [vmem:[#allocation4 + $0x18] sm:$0xf]  ;;  %2278 = vst.msk [vmem:[#allocation4 + $0x28] sm:$0x7] %vm1564_vm14, %v2262_v23  ;;  %v2315_v27 = vsel %vm4977_vm13, %v2290_v25, %v2314_v24 }
 0x4c4   : > { %2316 = vst [vmem:[#allocation4 + $0x20] sm:$0xf] %v2315_v27  ;;  %v2354_v30 = vsel %vm4995_vm0, %v2330_v17, %v2353_v26 }
 0x4c5   : > { %2355 = vst [vmem:[#allocation4 + $0x18] sm:$0xf] %v2354_v30 }
 0x4c6   : > { %2389 = vst.msk [vmem:[#allocation4 + $0x18] sm:$0x7] %vm1681_vm1, %v2372_v15  ;;  %v4444_v15 = vld [vmem:[%s5973_s11 + $0x28] sm:$0xff] }
 0x4c7   : > { %2757 = vmatpush.bf16.msra.mxu3 %v4444_v15 }
 0x4c8   : > { %v2264_v58 = vpop.permute.xlu2 %2263 }
 0x4ca   : > { %v2317_v31 = vld [vmem:[#allocation4 + $0x28] sm:$0xf]  ;;  %v2398_v32 = vpop.permute.xlu0 %2397  ;;  %v2400_v35 = vpop.permute.xlu1 %2399 }
 0x4cb   : > { %v2318_v36 = vsel %vm4977_vm13, %v2292_v29, %v2317_v31  ;;  %v2356_v37 = vld [vmem:[#allocation4 + $0x20] sm:$0xf]  ;;  %v2418_v38 = vsel %vm5012_vm3, %v2398_v32, %v2417_v34  ;;  %2758 = vmatpush.bf16.msra.mxu3 %v4443_v19  ;;  %v4442_v32 = vld [vmem:[%s5973_s11 + $0x18] sm:$0xff]  ;;  %v4440_v34 = vld [vmem:[%s5973_s11 + $0x8] sm:$0xff] }
 0x4cc   : > { %2319 = vst [vmem:[#allocation4 + $0x28] sm:$0xf] %v2318_v36  ;;  %v2357_v40 = vsel %vm4995_vm0, %v2332_v22, %v2356_v37  ;;  %v4533_v36 = vld [vmem:[%s5972_s10] ss:$0 sm:$0xff]  ;;  %v2647_v37 = vpop.f32.mrf.mxu2 }
 0x4cd   : > { %2358 = vst [vmem:[#allocation4 + $0x20] sm:$0xf] %v2357_v40  ;;  %v2420_v41 = vld [vmem:[#allocation4 + $0x18] sm:$0xf] }
 0x4ce   : > { %2419 = vst [vmem:[#allocation4 + $0x10] sm:$0xf] %v2418_v38  ;;  %v2421_v42 = vsel %vm5012_vm3, %v2400_v35, %v2420_v41  ;;  %v4439_v35 = vld [vmem:[%s5973_s11] sm:$0xff] }
 0x4cf   : > { %2422 = vst [vmem:[#allocation4 + $0x18] sm:$0xf] %v2421_v42  ;;  %2759 = vmatpush.bf16.msra.mxu3 %v4442_v32 }
 0x4d0   : > { %v2294_v6 = vpop.permute.xlu2 %2293 }
 0x4d2   : > { %v2334_v43 = vpop.permute.xlu0 %2333  ;;  %v2374_v44 = vpop.permute.xlu1 %2373 }
 0x4d3   : > { %v2359_v45 = vld [vmem:[#allocation4 + $0x28] sm:$0xf]  ;;  %2390 = vst.msk [vmem:[#allocation4 + $0x20] sm:$0x7] %vm1681_vm1, %v2374_v44  ;;  %2760 = vmatpush.bf16.msra.mxu3 %v4441_v20  ;;  %v4351_v20 = vld [vmem:[%s5975_s13 + $0x118] sm:$0xf0] }
 0x4d4   : > { %v2360_v47 = vsel %vm4995_vm0, %v2334_v43, %v2359_v45  ;;  %v2649_v44 = vpop.f32.mrf.mxu2 }
 0x4d5   : > { %2361 = vst [vmem:[#allocation4 + $0x28] sm:$0xf] %v2360_v47  ;;  %v2453_v50 = vld [vmem:[#allocation4 + $0x10] sm:$0xf] }
 0x4d6   : > { %2391 = vst.msk [vmem:[#allocation4 + $0x28] sm:$0x7] %vm1681_vm1, %v2376_v39  ;;  %v2456_v51 = vld [vmem:[#allocation4 + $0x18] sm:$0xf] }
 0x4d7   : > { %2761 = vmatpush.bf16.msra.mxu3 %v4440_v34  ;;  %v2856_v34 = vld [vmem:[#allocation5 + $0xc] sm:$0xf] }
 0x4d8   : > { %v2266_v22 = vpop.permute.xlu2 %2265 }
 0x4da   : > { %v2423_v49 = vld [vmem:[#allocation4 + $0x20] sm:$0xf]  ;;  %v2434_v16 = vpop.permute.xlu0 %2433  ;;  %v2436_v52 = vpop.permute.xlu1 %2435 }
 0x4db   : > { %v2424_v53 = vsel %vm5012_vm3, %v2402_v48, %v2423_v49  ;;  %v2454_v28 = vsel %vm5031_vm9, %v2434_v16, %v2453_v50  ;;  %v2457_v54 = vsel %vm5031_vm9, %v2436_v52, %v2456_v51  ;;  %2762 = vmatpush.bf16.msra.mxu3 %v4439_v35 }
 0x4dc   : > { %2425 = vst [vmem:[#allocation4 + $0x20] sm:$0xf] %v2424_v53  ;;  %v2652_v49 = vpop.f32.mrf.mxu2 }
 0x4dd   : > { %2455 = vst [vmem:[#allocation4 + $0x10] sm:$0xf] %v2454_v28  ;;  %v2426_v59 = vld [vmem:[#allocation4 + $0x28] sm:$0xf] }
 0x4de   : > { %2458 = vst [vmem:[#allocation4 + $0x18] sm:$0xf] %v2457_v54 }
 0x4e2   : > { %v2404_v17 = vpop.permute.xlu0 %2403  ;;  %v2194_v61 = vpop.permute.xlu1 %2193 }
 0x4e3   : > { %v2427_v60 = vsel %vm5012_vm3, %v2404_v17, %v2426_v59  ;;  %v2220_v0 = vsel %vm4955_vm11, %v2194_v61, %v2219_v63  ;;  %v2459_v7 = vld [vmem:[#allocation4 + $0x20] sm:$0xf]  ;;  %vm3098_vm3 = vcmask 781824  }
 0x4e4   : > { %2428 = vst [vmem:[#allocation4 + $0x28] sm:$0xf] %v2427_v60  ;;  %v4069_v2 = vld [vmem:[#allocation4 + $0x10] sm:$0xf]  ;;  %v2654_v52 = vpop.f32.mrf.mxu2  ;;  %vm5710_vm4 = vmand %vm3098_vm3, %vm1440_vm5 }
 0x4e5   : > { %2221 = vst [vmem:[#allocation4 + $0x30] sm:$0xf] %v2220_v0  ;;  %v4425_v4 = vld [vmem:[#allocation4 + $0x14] sm:$0xf0] }
 0x4e6   : > { %2279 = vst.msk [vmem:[#allocation4 + $0x30] sm:$0x7] %vm1564_vm14, %v2264_v58  ;;  %v4070_v62 = vor.u32 %v4425_v4, %v4069_v2 }
 0x4e8   : > { %2622 = vmatmul.bf16.gmra.mxu1 %v4070_v62 }
 0x4ea   : > { %v2438_v33 = vpop.permute.xlu0 %2437  ;;  %v2440_v12 = vpop.permute.xlu1 %2439 }
 0x4eb   : > { %v2460_v9 = vsel %vm5031_vm9, %v2438_v33, %v2459_v7  ;;  %v2462_v10 = vld [vmem:[#allocation4 + $0x28] sm:$0xf] }
 0x4ec   : > { %2461 = vst [vmem:[#allocation4 + $0x20] sm:$0xf] %v2460_v9  ;;  %v2463_v29 = vsel %vm5031_vm9, %v2440_v12, %v2462_v10  ;;  %v2657_v56 = vpop.f32.mrf.mxu2 }
 0x4ed   : > { %v2320_v13 = vld [vmem:[#allocation4 + $0x30] sm:$0xf]  ;;  %2464 = vst [vmem:[#allocation4 + $0x28] sm:$0xf] %v2463_v29 }
 0x4ee   : > { %v2321_v14 = vsel %vm4977_vm13, %v2294_v6, %v2320_v13  ;;  %vm2905_vm13 = vcmask 519424  }
 0x4ef   : > { %2322 = vst [vmem:[#allocation4 + $0x30] sm:$0xf] %v2321_v14 }
 0x4f2   : > { %v2196_v18 = vpop.permute.xlu0 %2195  ;;  %v2336_v25 = vpop.permute.xlu1 %2335 }
 0x4f3   : > { %v2223_v46 = vsel %vm4955_vm11, %v2196_v18, %v2222_v3  ;;  %v4077_v21 = vld [vmem:[#allocation4 + $0x20] sm:$0xf]  ;;  %vm3161_vm11 = vcmask 256000  }
 0x4f4   : > { %2224 = vst [vmem:[#allocation4 + $0x38] sm:$0xf] %v2223_v46  ;;  %v4427_v11 = vld [vmem:[#allocation4 + $0x24] sm:$0xf0]  ;;  %v2659_v61 = vpop.f32.mrf.mxu2  ;;  %v4535_v3 = vld [vmem:[#allocation5] sm:$0xff] }
 0x4f5   : > { %2280 = vst.msk [vmem:[#allocation4 + $0x38] sm:$0x7] %vm1564_vm14, %v2266_v22  ;;  %v4078_v23 = vor.u32 %v4427_v11, %v4077_v21  ;;  %v5420_v18 = vld [vmem:[%s5974_s12] ss:$0 sm:$0xff]  ;;  %v3030_v11 = vld [vmem:[#allocation5 + $0x4] sm:$0xf]  ;;  %vm5579_vm14 = vmand %vm2905_vm13, %vm1492_vm10 }
 0x4f6   : > { %v2362_v24 = vld [vmem:[#allocation4 + $0x30] sm:$0xf]  ;;  %1257 = vst.msk [vmem:[#allocation5 + $0x8] sm:$0xf] %vm1256_vm6, %v4535_v3  ;;  %v4493_v22 = vld [vmem:[%s5975_s13 + $0x114] sm:$0xf] }
 0x4f7   : > { %v2363_v26 = vsel %vm4995_vm0, %v2336_v25, %v2362_v24  ;;  %1259 = vst.msk [vmem:[#allocation5 + $0x14] sm:$0xf] %vm1256_vm6, %v4535_v3  ;;  %vm5596_vm0 = vmand %vm3006_vm15, %vm1440_vm5 }
 0x4f8   : > { %2364 = vst [vmem:[#allocation4 + $0x30] sm:$0xf] %v2363_v26  ;;  %2627 = vmatmul.bf16.gmra.mxu1 %v4078_v23  ;;  %vm5733_vm5 = vmand %vm3006_vm15, %vm1492_vm10 }
 0x4f9   : > { %1261 = vst.msk [vmem:[#allocation5 + $0x20] sm:$0xf] %vm1256_vm6, %v4535_v3 }
 0x4fa   : > { %v2378_v27 = vpop.permute.xlu0 %2377  ;;  %1263 = vst.msk [vmem:[#allocation5 + $0x2c] sm:$0xf] %vm1256_vm6, %v4535_v3 }
 0x4fb   : > { %2392 = vst.msk [vmem:[#allocation4 + $0x30] sm:$0x7] %vm1681_vm1, %v2378_v27  ;;  %vm3072_vm1 = vcmask 518400  }
 0x4fc   : > { %v4429_v30 = vld [vmem:[#allocation4 + $0x34] sm:$0xf0]  ;;  %1265 = vst.msk [vmem:[#allocation5 + $0x38] sm:$0xf] %vm1256_vm6, %v4535_v3 }
 0x4fd   : > { %1267 = vst.msk [vmem:[#allocation5 + $0x44] sm:$0xf] %vm1256_vm6, %v4535_v3 }
 0x4fe   : > { %1269 = vst.msk [vmem:[#allocation5 + $0x50] sm:$0xf] %vm1256_vm6, %v4535_v3 }
 0x4ff   : > { %1271 = vst.msk [vmem:[#allocation5 + $0x5c] sm:$0xf] %vm1256_vm6, %v4535_v3 }
 0x502   : > { %v4085_v1 = vld [vmem:[#allocation4 + $0x30] sm:$0xf] }
 0x503   : > { %v4086_v31 = vor.u32 %v4429_v30, %v4085_v1 }
 0x508   : > { %2632 = vmatmul.bf16.gmra.mxu1 %v4086_v31 }
 0x528   : > { %v2662_v5 = vpop.f32.mrf.mxu2 }
 0x530   : > { %v2664_v12 = vpop.f32.mrf.mxu2 }
 0x53d   : > { %v2618_v38 = vpop.f32.mrf.mxu1 }
 0x53e   : > { %v2619_v39 = vadd.f32 %v4533_v36, %v2618_v38  ;;  %v3033_v38 = vld [vmem:[#allocation5 + $0x10] sm:$0xf] }
 0x540   : > { %v2648_v40 = vadd.f32 %v2647_v37, %v2619_v39 }
 0x542   : > { %v2667_v41 = vmax.f32 %v2648_v40, 0.0 }
 0x544   : > { %2675 = vst [vmem:[%s5399_s22] sm:$0xff] %v2667_v41 }
 0x545   : > { %v2620_v42 = vpop.f32.mrf.mxu1 }
 0x546   : > { %v2621_v43 = vadd.f32 %v4533_v36, %v2620_v42 }
 0x548   : > { %v2650_v45 = vadd.f32 %v2649_v44, %v2621_v43 }
 0x54a   : > { %v2668_v47 = vmax.f32 %v2650_v45, 0.0 }
 0x54c   : > { %2676 = vst [vmem:[%s5399_s22 + $0x8] sm:$0xff] %v2668_v47  ;;  %v2683_v48 = vpack.c.bf16 %v2668_v47, %v2667_v41 }
 0x54e   : > { %2763 = vmatmul.bf16.vlgmr.msra.gmra.mxu3 %v2683_v48 }
 0x565   : > { %v2623_v16 = vpop.f32.mrf.mxu1 }
 0x566   : > { %v2624_v50 = vadd.f32 %v4533_v36, %v2623_v16 }
 0x568   : > { %v2653_v51 = vadd.f32 %v2652_v49, %v2624_v50  ;;  %v2859_v49 = vld [vmem:[#allocation5 + $0x18] sm:$0xf] }
 0x56a   : > { %v2669_v53 = vmax.f32 %v2653_v51, 0.0 }
 0x56c   : > { %2677 = vst [vmem:[%s5399_s22 + $0x10] sm:$0xff] %v2669_v53 }
 0x56d   : > { %v2625_v28 = vpop.f32.mrf.mxu1 }
 0x56e   : > { %v2626_v54 = vadd.f32 %v4533_v36, %v2625_v28  ;;  %v4494_v28 = vld [vmem:[%s5975_s13 + $0x114] sm:$0xf0] }
 0x570   : > { %v2655_v55 = vadd.f32 %v2654_v52, %v2626_v54 }
 0x572   : > { %v2670_v57 = vmax.f32 %v2655_v55, 0.0  ;;  %v4341_v55 = vld [vmem:[%s5975_s13 + $0x100] sm:$0xf] }
 0x574   : > { %2678 = vst [vmem:[%s5399_s22 + $0x18] sm:$0xff] %v2670_v57  ;;  %v2684_v58 = vpack.c.bf16 %v2670_v57, %v2669_v53  ;;  %v4349_v53 = vld [vmem:[%s5975_s13 + $0x110] sm:$0xf] }
 0x575   : > { %v2628_v17 = vpop.f32.mrf.mxu1  ;;  %v4350_v54 = vor.u32 %v4494_v28, %v4349_v53 }
 0x576   : > { %v2629_v59 = vadd.f32 %v4533_v36, %v2628_v17  ;;  %2768 = vmatmul.bf16.gmra.mxu3 %v2684_v58 }
 0x577   : > { %3543 = vmatpush.bf16.msrb.mxu3 %v4350_v54 }
 0x578   : > { %v2658_v60 = vadd.f32 %v2657_v56, %v2629_v59  ;;  %v4492_v56 = vld [vmem:[%s5975_s13 + $0x104] sm:$0xf0] }
 0x579   : > { %v4342_v57 = vor.u32 %v4492_v56, %v4341_v55 }
 0x57a   : > { %v2671_v63 = vmax.f32 %v2658_v60, 0.0  ;;  %v3036_v60 = vld [vmem:[#allocation5 + $0x1c] sm:$0xf] }
 0x57b   : > { %3544 = vmatpush.bf16.msrb.mxu3 %v4342_v57 }
 0x57c   : > { %2679 = vst [vmem:[%s5399_s22 + $0x20] sm:$0xff] %v2671_v63 }
 0x57d   : > { %v2630_v0 = vpop.f32.mrf.mxu1 }
 0x57e   : > { %v2631_v2 = vadd.f32 %v4533_v36, %v2630_v0 }
 0x580   : > { %v2660_v4 = vadd.f32 %v2659_v61, %v2631_v2 }
 0x582   : > { %v2672_v62 = vmax.f32 %v2660_v4, 0.0 }
 0x584   : > { %2680 = vst [vmem:[%s5399_s22 + $0x28] sm:$0xff] %v2672_v62  ;;  %v2685_v6 = vpack.c.bf16 %v2672_v62, %v2671_v63 }
 0x585   : > { %v2633_v33 = vpop.f32.mrf.mxu1 }
 0x586   : > { %v2634_v7 = vadd.f32 %v4533_v36, %v2633_v33  ;;  %2773 = vmatmul.bf16.gmra.mxu3 %v2685_v6 }
 0x588   : > { %v2663_v8 = vadd.f32 %v2662_v5, %v2634_v7  ;;  %v2862_v7 = vld [vmem:[#allocation5 + $0x24] sm:$0xf] }
 0x58a   : > { %v2673_v9 = vmax.f32 %v2663_v8, 0.0 }
 0x58c   : > { %2681 = vst [vmem:[%s5399_s22 + $0x30] sm:$0xff] %v2673_v9 }
 0x58d   : > { %v2635_v10 = vpop.f32.mrf.mxu1 }
 0x58e   : > { %v2636_v29 = vadd.f32 %v4533_v36, %v2635_v10 }
 0x590   : > { %v2665_v13 = vadd.f32 %v2664_v12, %v2636_v29  ;;  %v3039_v12 = vld [vmem:[#allocation5 + $0x28] sm:$0xf] }
 0x592   : > { %v2674_v14 = vmax.f32 %v2665_v13, 0.0 }
 0x594   : > { %2682 = vst [vmem:[%s5399_s22 + $0x38] sm:$0xff] %v2674_v14  ;;  %v2686_v15 = vpack.c.bf16 %v2674_v14, %v2673_v9 }
 0x596   : > { %2778 = vmatmul.bf16.gmra.mxu3 %v2686_v15 }
 0x5d1   : > { %v2764_v19 = vpop.f32.mrf.mxu3 }
 0x5d2   : > { %v2765_v46 = vadd.f32 %v5420_v18, %v2764_v19 }
 0x5d4   : > { %v2783_v21 = vmax.f32 %v2765_v46, 0.0 }
 0x5d6   : > { %v2790_v23 = vpack.c.bf16 %v2783_v21, %v2783_v21 }
 0x5d8   : > { %2884 = vrot.lane.b32.xlu2 %v2790_v23, %s6020_s23  ;;  %v2798_v24 = vshrl.u32 %v2790_v23, 16  ;;  %v2801_v25 = vshll.u32 %v2790_v23, 16  ;;  %v3031_v26 = vsel %vm5425_vm7, %v2790_v23, %v3030_v11 }
 0x5d9   : > { %v2766_v27 = vpop.f32.mrf.mxu3  ;;  %3032 = vst [vmem:[#allocation5 + $0x4] sm:$0xf] %v3031_v26 }
 0x5da   : > { %v2767_v1 = vadd.f32 %v5420_v18, %v2766_v27  ;;  %v2928_v30 = vrot.slane %v2798_v24, 4  ;;  %v2929_v31 = vrot.slane %v2801_v25, 5  ;;  %v2800_v32 = vrot.slane %v2798_v24, 7 }
 0x5dc   : > { %v2784_v35 = vmax.f32 %v2767_v1, 0.0  ;;  %v2930_v36 = vor.u32 %v2929_v31, %v2928_v30  ;;  %v2803_v37 = vor.u32 %v2801_v25, %v2800_v32  ;;  %v2865_v25 = vld [vmem:[#allocation5 + $0x30] sm:$0xf]  ;;  %v3042_v30 = vld [vmem:[#allocation5 + $0x34] sm:$0xf] }
 0x5de   : > { %v2791_v39 = vpack.c.bf16 %v2784_v35, %v2784_v35  ;;  %v2931_v40 = vrot.slane %v2930_v36, 4  ;;  %v2857_v41 = vsel %vm5435_vm8, %v2803_v37, %v2856_v34 }
 0x5df   : > { %2858 = vst [vmem:[#allocation5 + $0xc] sm:$0xf] %v2857_v41 }
 0x5e0   : > { %2956 = vrot.lane.b32.xlu0 %v2931_v40, %s6030_s20  ;;  %3051 = vrot.lane.b32.xlu1 %v2931_v40, %s6020_s23  ;;  %v2805_v42 = vshrl.u32 %v2791_v39, 16  ;;  %v2808_v43 = vshll.u32 %v2791_v39, 16  ;;  %v3034_v44 = vsel %vm5425_vm7, %v2791_v39, %v3033_v38 }
 0x5e1   : > { %2985 = vrot.lane.b32.xlu2 %v2803_v37, %s6023_s30  ;;  %3035 = vst [vmem:[#allocation5 + $0x10] sm:$0xf] %v3034_v44 }
 0x5e2   : > { %v2932_v45 = vrot.slane %v2805_v42, 4  ;;  %v2933_v47 = vrot.slane %v2808_v43, 5  ;;  %v2807_v48 = vrot.slane %v2805_v42, 7 }
 0x5e4   : > { %v2934_v16 = vor.u32 %v2933_v47, %v2932_v45  ;;  %v2810_v50 = vor.u32 %v2808_v43, %v2807_v48  ;;  %v2868_v47 = vld [vmem:[#allocation5 + $0x3c] sm:$0xf] }
 0x5e6   : > { %v2935_v51 = vrot.slane %v2934_v16, 4  ;;  %v2860_v52 = vsel %vm5435_vm8, %v2810_v50, %v2859_v49 }
 0x5e7   : > { %2861 = vst [vmem:[#allocation5 + $0x18] sm:$0xf] %v2860_v52 }
 0x5e8   : > { %3118 = vrot.lane.b32.xlu0 %v2791_v39, %s6023_s30  ;;  %3162 = vst.msk [vmem:[#allocation5 + $0x8] sm:$0x7] %vm3161_vm11, %v2935_v51 }
 0x5e9   : > { %3053 = vrot.lane.b32.xlu2 %v2935_v51, %s6020_s23 }
 0x5ef   : > { %v4173_v34 = vld [vmem:[#allocation5 + $0x8] sm:$0xf] }
 0x5f0   : > { %2886 = vrot.lane.b32.xlu0 %v2791_v39, %s6020_s23 }
 0x5f1   : > { %2958 = vrot.lane.b32.xlu2 %v2935_v51, %s6030_s20 }
 0x5f8   : > { %3080 = vrot.lane.b32.xlu0 %v2810_v50, %s6030_s20 }
 0x5f9   : > { %v2769_v58 = vpop.f32.mrf.mxu3 }
 0x5fa   : > { %v2770_v17 = vadd.f32 %v5420_v18, %v2769_v58 }
 0x5fc   : > { %v2785_v59 = vmax.f32 %v2770_v17, 0.0 }
 0x5fe   : > { %v2792_v63 = vpack.c.bf16 %v2785_v59, %v2785_v59 }
 0x600   : > { %3120 = vrot.lane.b32.xlu1 %v2792_v63, %s6023_s30  ;;  %2987 = vrot.lane.b32.xlu0 %v2810_v50, %s6023_s30  ;;  %v2812_v61 = vshrl.u32 %v2792_v63, 16  ;;  %v2815_v0 = vshll.u32 %v2792_v63, 16  ;;  %v3037_v2 = vsel %vm5425_vm7, %v2792_v63, %v3036_v60  ;;  %v3045_v50 = vld [vmem:[#allocation5 + $0x40] sm:$0xf]  ;;  %v2871_v60 = vld [vmem:[#allocation5 + $0x48] sm:$0xf] }
 0x601   : > { %v2771_v4 = vpop.f32.mrf.mxu3  ;;  %3038 = vst [vmem:[#allocation5 + $0x1c] sm:$0xf] %v3037_v2  ;;  %v3048_v2 = vld [vmem:[#allocation5 + $0x4c] sm:$0xf] }
 0x602   : > { %v2772_v62 = vadd.f32 %v5420_v18, %v2771_v4  ;;  %v2814_v5 = vrot.slane %v2812_v61, 7  ;;  %v2936_v6 = vrot.slane %v2812_v61, 4  ;;  %v2937_v33 = vrot.slane %v2815_v0, 5 }
 0x604   : > { %v2786_v8 = vmax.f32 %v2772_v62, 0.0  ;;  %v2817_v9 = vor.u32 %v2815_v0, %v2814_v5  ;;  %v2938_v10 = vor.u32 %v2937_v33, %v2936_v6 }
 0x606   : > { %v2793_v29 = vpack.c.bf16 %v2786_v8, %v2786_v8  ;;  %v2863_v13 = vsel %vm5435_vm8, %v2817_v9, %v2862_v7  ;;  %2989 = vrot.lane.b32.xlu2 %v2817_v9, %s6023_s30  ;;  %v2939_v14 = vrot.slane %v2938_v10, 4 }
 0x607   : > { %2864 = vst [vmem:[#allocation5 + $0x24] sm:$0xf] %v2863_v13 }
 0x608   : > { %2888 = vrot.lane.b32.xlu1 %v2792_v63, %s6020_s23  ;;  %3163 = vst.msk [vmem:[#allocation5 + $0x14] sm:$0x7] %vm3161_vm11, %v2939_v14  ;;  %2960 = vrot.lane.b32.xlu0 %v2939_v14, %s6030_s20  ;;  %v2819_v15 = vshrl.u32 %v2793_v29, 16  ;;  %v2822_v3 = vshll.u32 %v2793_v29, 16  ;;  %v3040_v19 = vsel %vm5425_vm7, %v2793_v29, %v3039_v12 }
 0x609   : > { %v2774_v46 = vpop.f32.mrf.mxu3  ;;  %3041 = vst [vmem:[#allocation5 + $0x28] sm:$0xf] %v3040_v19 }
 0x60a   : > { %v2775_v21 = vadd.f32 %v5420_v18, %v2774_v46  ;;  %v2940_v11 = vrot.slane %v2819_v15, 4  ;;  %v2941_v23 = vrot.slane %v2822_v3, 5  ;;  %v2821_v24 = vrot.slane %v2819_v15, 7 }
 0x60c   : > { %v2787_v26 = vmax.f32 %v2775_v21, 0.0  ;;  %v2942_v27 = vor.u32 %v2941_v23, %v2940_v11  ;;  %v5481_v1 = vor.u32 %v2822_v3, %v2821_v24  ;;  %v4354_v21 = vor.u32 %v4493_v22, %v4351_v20  ;;  %v4491_v11 = vld [vmem:[%s5975_s13 + $0x104] sm:$0xf]  ;;  %v4343_v23 = vld [vmem:[%s5975_s13 + $0x108] sm:$0xf0] }
 0x60d   : > { %v4346_v24 = vor.u32 %v4491_v11, %v4343_v23  ;;  %v2910_v22 = vld [vmem:[#allocation5 + $0x18] sm:$0xf] }
 0x60e   : > { %v5483_v31 = vpack.c.bf16 %v2787_v26, %v2787_v26  ;;  %v5485_v32 = vrot.slane %v2942_v27, 4  ;;  %v2866_v35 = vsel %vm5435_vm8, %v5481_v1, %v2865_v25  ;;  %3630 = vmatpush.bf16.msra.mxu3 %v4354_v21  ;;  %v4482_v11 = vld [vmem:[%s5975_s13 + $0xb4] sm:$0xf0] }
 0x60f   : > { %v4449_v36 = vld [vmem:[#allocation5 + $0x10] sm:$0xf0]  ;;  %2867 = vst [vmem:[#allocation5 + $0x30] sm:$0xf] %v2866_v35  ;;  %v3008_v35 = vld [vmem:[#allocation5] sm:$0xf] }
 0x610   : > { %3082 = vrot.lane.b32.xlu1 %v2817_v9, %s6030_s20  ;;  %3164 = vst.msk [vmem:[#allocation5 + $0x20] sm:$0x7] %vm3161_vm11, %v5485_v32  ;;  %3057 = vrot.lane.b32.xlu2 %v5485_v32, %s6020_s23  ;;  %v5495_v37 = vor.u32 %v4449_v36, %v4173_v34  ;;  %v2826_v38 = vshrl.u32 %v5483_v31, 16  ;;  %v2829_v39 = vshll.u32 %v5483_v31, 16  ;;  %v3043_v40 = vsel %vm5425_vm7, %v5483_v31, %v3042_v30  ;;  %v2907_v34 = vld [vmem:[#allocation5 + $0xc] sm:$0xf] }
 0x611   : > { %3122 = vrot.lane.b32.xlu0 %v2793_v29, %s6023_s30  ;;  %v2776_v41 = vpop.f32.mrf.mxu3  ;;  %3044 = vst [vmem:[#allocation5 + $0x34] sm:$0xf] %v3043_v40  ;;  %v4269_v36 = vld [vmem:[%s5975_s13 + $0x70] sm:$0xf] }
 0x612   : > { %v2777_v42 = vadd.f32 %v5420_v18, %v2776_v41  ;;  %4355 = vmatmul.msk.bf16.vlgmr.msrb.gmra.mxu3 %vm3466_vm12, %v5495_v37  ;;  %v2828_v43 = vrot.slane %v2826_v38, 7  ;;  %v2944_v44 = vrot.slane %v2826_v38, 4  ;;  %v2945_v45 = vrot.slane %v2829_v39, 5  ;;  %v4474_v38 = vld [vmem:[%s5975_s13 + $0x74] sm:$0xf0] }
 0x613   : > { %3631 = vmatpush.bf16.msra.mxu3 %v4346_v24  ;;  %v4209_v40 = vld [vmem:[#allocation5 + $0x50] sm:$0xf]  ;;  %v4458_v41 = vld [vmem:[#allocation5 + $0x58] sm:$0xf0] }
 0x614   : > { %v2788_v48 = vmax.f32 %v2777_v42, 0.0  ;;  %v5506_v49 = vor.u32 %v2829_v39, %v2828_v43  ;;  %v2946_v16 = vor.u32 %v2945_v45, %v2944_v44  ;;  %v4270_v42 = vor.u32 %v4474_v38, %v4269_v36  ;;  %v4261_v45 = vld [vmem:[%s5975_s13 + $0x60] sm:$0xf] }
 0x615   : > { %v5608_v44 = vor.u32 %v4458_v41, %v4209_v40  ;;  %v4478_v40 = vld [vmem:[%s5975_s13 + $0x94] sm:$0xf0] }
 0x616   : > { %v5508_v51 = vpack.c.bf16 %v2788_v48, %v2788_v48  ;;  %v2869_v52 = vsel %vm5435_vm8, %v5506_v49, %v2868_v47  ;;  %v5513_v53 = vrot.slane %v2946_v16, 4  ;;  %3479 = vmatpush.bf16.msra.mxu1 %v4270_v42  ;;  %v4472_v47 = vld [vmem:[%s5975_s13 + $0x64] sm:$0xf0]  ;;  %v4253_v16 = vld [vmem:[%s5975_s13 + $0x50] sm:$0xf] }
 0x617   : > { %2870 = vst [vmem:[#allocation5 + $0x3c] sm:$0xf] %v2869_v52  ;;  %v4185_v6 = vld [vmem:[#allocation5 + $0x20] sm:$0xf]  ;;  %v4459_v42 = vld [vmem:[%s5975_s13 + $0x4] sm:$0xf] }
 0x618   : > { %3055 = vrot.lane.b32.xlu1 %v2939_v14, %s6020_s23  ;;  %3165 = vst.msk [vmem:[#allocation5 + $0x2c] sm:$0x7] %vm3161_vm11, %v5513_v53  ;;  %3086 = vrot.lane.b32.xlu2 %v5506_v49, %s6030_s20  ;;  %v2833_v28 = vshrl.u32 %v5508_v51, 16  ;;  %v2836_v54 = vshll.u32 %v5508_v51, 16  ;;  %v3046_v55 = vsel %vm5425_vm7, %v5508_v51, %v3045_v50  ;;  %v2874_v14 = vld [vmem:[#allocation5 + $0x54] sm:$0xf] }
 0x619   : > { %2890 = vrot.lane.b32.xlu0 %v2793_v29, %s6020_s23  ;;  %v2779_v56 = vpop.f32.mrf.mxu3  ;;  %3047 = vst [vmem:[#allocation5 + $0x40] sm:$0xf] %v3046_v55  ;;  %v4470_v50 = vld [vmem:[%s5975_s13 + $0x54] sm:$0xf0]  ;;  %v4333_v55 = vld [vmem:[%s5975_s13 + $0xf0] sm:$0xf] }
 0x61a   : > { %v2780_v57 = vadd.f32 %v5420_v18, %v2779_v56  ;;  %v2948_v58 = vrot.slane %v2833_v28, 4  ;;  %v2949_v17 = vrot.slane %v2836_v54, 5  ;;  %v2835_v59 = vrot.slane %v2833_v28, 7  ;;  %v4468_v28 = vld [vmem:[%s5975_s13 + $0x44] sm:$0xf0] }
 0x61b   : > { %v4254_v52 = vor.u32 %v4470_v50, %v4253_v16 }
 0x61c   : > { %v2789_v63 = vmax.f32 %v2780_v57, 0.0  ;;  %v2950_v61 = vor.u32 %v2949_v17, %v2948_v58  ;;  %v5527_v0 = vor.u32 %v2836_v54, %v2835_v59  ;;  %v4237_v57 = vld [vmem:[%s5975_s13 + $0x30] sm:$0xf]  ;;  %v4466_v58 = vld [vmem:[%s5975_s13 + $0x34] sm:$0xf0] }
 0x61d   : > { %v4238_v17 = vor.u32 %v4466_v58, %v4237_v57 }
 0x61e   : > { %v5529_v4 = vpack.c.bf16 %v2789_v63, %v2789_v63  ;;  %v2951_v62 = vrot.slane %v2950_v61, 4  ;;  %v2872_v5 = vsel %vm5435_vm8, %v5527_v0, %v2871_v60  ;;  %v4229_v63 = vld [vmem:[%s5975_s13 + $0x20] sm:$0xf]  ;;  %v4464_v61 = vld [vmem:[%s5975_s13 + $0x24] sm:$0xf0] }
 0x61f   : > { %v4452_v33 = vld [vmem:[#allocation5 + $0x28] sm:$0xf0]  ;;  %2873 = vst [vmem:[#allocation5 + $0x48] sm:$0xf] %v2872_v5  ;;  %v4462_v5 = vld [vmem:[%s5975_s13 + $0x14] sm:$0xf0] }
 0x620   : > { %3084 = vrot.lane.b32.xlu1 %v5481_v1, %s6030_s20  ;;  %3166 = vst.msk [vmem:[#allocation5 + $0x38] sm:$0x7] %vm3161_vm11, %v2951_v62  ;;  %3061 = vrot.lane.b32.xlu2 %v2951_v62, %s6020_s23  ;;  %v5538_v18 = vor.u32 %v4452_v33, %v4185_v6  ;;  %v2840_v7 = vshrl.u32 %v5529_v4, 16  ;;  %v2843_v8 = vshll.u32 %v5529_v4, 16  ;;  %v3049_v9 = vsel %vm5425_vm7, %v5529_v4, %v3048_v2  ;;  %v4488_v2 = vld [vmem:[%s5975_s13 + $0xe4] sm:$0xf0] }
 0x621   : > { %2991 = vrot.lane.b32.xlu0 %v5481_v1, %s6023_s30  ;;  %v2781_v10 = vpop.f32.mrf.mxu3  ;;  %3050 = vst [vmem:[#allocation5 + $0x4c] sm:$0xf] %v3049_v9  ;;  %v4317_v6 = vld [vmem:[%s5975_s13 + $0xd0] sm:$0xf]  ;;  %v4481_v1 = vld [vmem:[%s5975_s13 + $0xb4] sm:$0xf] }
 0x622   : > { %4356 = vmatmul.msk.bf16.gmra.mxu3 %vm3466_vm12, %v5538_v18  ;;  %v2842_v12 = vrot.slane %v2840_v7, 7  ;;  %v2952_v29 = vrot.slane %v2840_v7, 4  ;;  %v2953_v13 = vrot.slane %v2843_v8, 5  ;;  %v4486_v7 = vld [vmem:[%s5975_s13 + $0xd4] sm:$0xf0] }
 0x624   : > { %v2845_v15 = vor.u32 %v2843_v8, %v2842_v12  ;;  %v2954_v3 = vor.u32 %v2953_v13, %v2952_v29  ;;  %v4318_v8 = vor.u32 %v4486_v7, %v4317_v6  ;;  %v4213_v12 = vld [vmem:[%s5975_s13] sm:$0xf]  ;;  %v4460_v29 = vld [vmem:[%s5975_s13 + $0x4] sm:$0xf0]  ;;  %v4335_v6 = vld [vmem:[%s5975_s13 + $0xf8] sm:$0xf0] }
 0x625   : > { %v4214_v13 = vor.u32 %v4460_v29, %v4213_v12 }
 0x626   : > { %v2875_v19 = vsel %vm5435_vm8, %v2845_v15, %v2874_v14  ;;  %v5551_v46 = vrot.slane %v2954_v3, 4  ;;  %v4309_v14 = vld [vmem:[%s5975_s13 + $0xc0] sm:$0xf] }
 0x627   : > { %2876 = vst [vmem:[#allocation5 + $0x54] sm:$0xf] %v2875_v19  ;;  %v4197_v25 = vld [vmem:[#allocation5 + $0x38] sm:$0xf] }
 0x628   : > { %3124 = vrot.lane.b32.xlu1 %v5483_v31, %s6023_s30  ;;  %3167 = vst.msk [vmem:[#allocation5 + $0x44] sm:$0x7] %vm3161_vm11, %v5551_v46  ;;  %3090 = vrot.lane.b32.xlu2 %v2845_v15, %s6030_s20 }
 0x629   : > { %2964 = vrot.lane.b32.xlu0 %v5513_v53, %s6030_s20 }
 0x62f   : > { %v4455_v26 = vld [vmem:[#allocation5 + $0x40] sm:$0xf0] }
 0x630   : > { %2892 = vrot.lane.b32.xlu1 %v5483_v31, %s6020_s23  ;;  %2962 = vrot.lane.b32.xlu2 %v5485_v32, %s6030_s20  ;;  %v5576_v27 = vor.u32 %v4455_v26, %v4197_v25 }
 0x631   : > { %2993 = vrot.lane.b32.xlu0 %v5506_v49, %s6023_s30  ;;  %v4262_v49 = vor.u32 %v4472_v47, %v4261_v45 }
 0x632   : > { %4357 = vmatmul.msk.bf16.gmra.mxu3 %vm3466_vm12, %v5576_v27  ;;  %v2885_v30 = vpop.permute.xlu2 %2884 }
 0x633   : > { %v2908_v31 = vsel %vm5579_vm14, %v2885_v30, %v2907_v34  ;;  %3480 = vmatpush.bf16.msra.mxu1 %v4262_v49  ;;  %v4293_v30 = vld [vmem:[%s5975_s13 + $0xa0] sm:$0xf]  ;;  %v4480_v34 = vld [vmem:[%s5975_s13 + $0xa4] sm:$0xf0] }
 0x634   : > { %2909 = vst [vmem:[#allocation5 + $0xc] sm:$0xf] %v2908_v31  ;;  %v4476_v49 = vld [vmem:[%s5975_s13 + $0x84] sm:$0xf0] }
 0x637   : > { %3481 = vmatpush.bf16.msra.mxu1 %v4254_v52 }
 0x638   : > { %3059 = vrot.lane.b32.xlu1 %v5513_v53, %s6020_s23  ;;  %3128 = vrot.lane.b32.xlu2 %v5529_v4, %s6023_s30  ;;  %v4245_v53 = vld [vmem:[%s5975_s13 + $0x40] sm:$0xf] }
 0x639   : > { %2966 = vrot.lane.b32.xlu0 %v2951_v62, %s6030_s20  ;;  %v4246_v54 = vor.u32 %v4468_v28, %v4245_v53  ;;  %v4221_v62 = vld [vmem:[%s5975_s13 + $0x10] sm:$0xf] }
 0x63a   : > { %v4222_v33 = vor.u32 %v4462_v5, %v4221_v62  ;;  %v4489_v5 = vld [vmem:[%s5975_s13 + $0xf4] sm:$0xf] }
 0x63b   : > { %v2986_v39 = vpop.permute.xlu2 %2985  ;;  %3482 = vmatpush.bf16.msra.mxu1 %v4246_v54 }
 0x63c   : > { %v3009_v43 = vsel %vm5596_vm0, %v2986_v39, %v3008_v35  ;;  %v4294_v35 = vor.u32 %v4480_v34, %v4293_v30  ;;  %v4285_v39 = vld [vmem:[%s5975_s13 + $0x90] sm:$0xf] }
 0x63d   : > { %3010 = vst [vmem:[#allocation5] sm:$0xf] %v3009_v43  ;;  %v4286_v41 = vor.u32 %v4478_v40, %v4285_v39  ;;  %v4485_v40 = vld [vmem:[%s5975_s13 + $0xd4] sm:$0xf] }
 0x63f   : > { %3483 = vmatpush.bf16.msra.mxu1 %v4238_v17 }
 0x640   : > { %3088 = vrot.lane.b32.xlu1 %v5527_v0, %s6030_s20  ;;  %2894 = vrot.lane.b32.xlu2 %v5508_v51, %s6020_s23 }
 0x641   : > { %2997 = vrot.lane.b32.xlu0 %v2845_v15, %s6023_s30  ;;  %v4484_v15 = vld [vmem:[%s5975_s13 + $0xc4] sm:$0xf0] }
 0x642   : > { %4358 = vmatmul.msk.bf16.gmra.mxu3 %vm3466_vm12, %v5608_v44  ;;  %v4310_v3 = vor.u32 %v4484_v15, %v4309_v14  ;;  %v4271_v14 = vld [vmem:[%s5975_s13 + $0x78] sm:$0xf0] }
 0x643   : > { %v3054_v48 = vpop.permute.xlu2 %3053 }
 0x644   : > { %3074 = vst.msk [vmem:[#allocation5 + $0x10] sm:$0x7] %vm3072_vm1, %v3054_v48  ;;  %v4277_v48 = vld [vmem:[%s5975_s13 + $0x80] sm:$0xf] }
 0x645   : > { %v4278_v28 = vor.u32 %v4476_v49, %v4277_v48  ;;  %v4165_v17 = vld [vmem:[#allocation5] sm:$0xf]  ;;  %v2922_v48 = vld [vmem:[#allocation5 + $0x48] sm:$0xf] }
 0x648   : > { %3126 = vrot.lane.b32.xlu1 %v5508_v51, %s6023_s30  ;;  %2896 = vrot.lane.b32.xlu2 %v5529_v4, %s6020_s23  ;;  %v4490_v51 = vld [vmem:[%s5975_s13 + $0xf4] sm:$0xf0] }
 0x649   : > { %v4334_v56 = vor.u32 %v4490_v51, %v4333_v55  ;;  %v2913_v55 = vld [vmem:[#allocation5 + $0x24] sm:$0xf] }
 0x64b   : > { %3508 = vmatpush.bf16.msra.mxu2 %v4334_v56  ;;  %v2959_v9 = vpop.permute.xlu2 %2958 }
 0x650   : > { %2995 = vrot.lane.b32.xlu1 %v5527_v0, %s6023_s30  ;;  %v4230_v0 = vor.u32 %v4464_v61, %v4229_v63  ;;  %v3103_v61 = vld [vmem:[#allocation5 + $0x10] sm:$0xf]  ;;  %s4368_s30 = sshll.u32 %s6044_s1, 7 }
 0x651   : > { %s5926_s24 = scalar_lea.vmem %s5979_s17, %s4368_s30 }
 0x652   : > { %4359 = vmatmul.msk.bf16.vlgmr.msra.gmra.mxu3 %vm3466_vm12, %v5495_v37  ;;  %v2957_v59 = vpop.permute.xlu0 %2956  ;;  %v3052_v60 = vpop.permute.xlu1 %3051  ;;  %v4325_v37 = vld [vmem:[%s5975_s13 + $0xe0] sm:$0xf]  ;;  %3484 = vmatpush.bf16.msra.mxu1 %v4230_v0 }
 0x653   : > { %2978 = vst.msk [vmem:[#allocation5 + $0xc] sm:$0x7] %vm2977_vm2, %v2957_v59  ;;  %v4326_v4 = vor.u32 %v4488_v2, %v4325_v37 }
 0x654   : > { %3073 = vst.msk [vmem:[#allocation5 + $0x4] sm:$0x7] %vm3072_vm1, %v3052_v60 }
 0x655   : > { %3509 = vmatpush.bf16.msra.mxu2 %v4326_v4 }
 0x656   : > { %3485 = vmatpush.bf16.msra.mxu1 %v4222_v33  ;;  %v4338_v33 = vor.u32 %v4489_v5, %v4335_v6 }
 0x658   : > { %3063 = vrot.lane.b32.xlu1 %v5551_v46, %s6020_s23 }
 0x659   : > { %3510 = vmatpush.bf16.msra.mxu2 %v4318_v8 }
 0x65a   : > { %v3119_v10 = vpop.permute.xlu0 %3118  ;;  %3486 = vmatpush.bf16.msra.mxu1 %v4214_v13  ;;  %v3011_v53 = vld [vmem:[#allocation5 + $0xc] sm:$0xf]  ;;  %v4473_v13 = vld [vmem:[%s5975_s13 + $0x74] sm:$0xf] }
 0x65b   : > { %v3100_v26 = vld [vmem:[#allocation5 + $0x4] sm:$0xf]  ;;  %v4274_v15 = vor.u32 %v4473_v13, %v4271_v14 }
 0x65d   : > { %3511 = vmatpush.bf16.msra.mxu2 %v4310_v3  ;;  %v4487_v3 = vld [vmem:[%s5975_s13 + $0xe4] sm:$0xf] }
 0x65e   : > { %3566 = vmatpush.bf16.msrb.mxu1 %v4274_v15  ;;  %v4465_v15 = vld [vmem:[%s5975_s13 + $0x34] sm:$0xf] }
 0x660   : > { %2968 = vrot.lane.b32.xlu1 %v5551_v46, %s6030_s20  ;;  %v2990_v19 = vpop.permute.xlu2 %2989  ;;  %v4301_v46 = vld [vmem:[%s5975_s13 + $0xb0] sm:$0xf] }
 0x661   : > { %v4302_v23 = vor.u32 %v4482_v11, %v4301_v46 }
 0x662   : > { %4360 = vmatmul.msk.bf16.gmra.mxu3 %vm3466_vm12, %v5538_v18  ;;  %v2887_v20 = vpop.permute.xlu0 %2886  ;;  %v4477_v18 = vld [vmem:[%s5975_s13 + $0x94] sm:$0xf] }
 0x663   : > { %v2911_v21 = vsel %vm5579_vm14, %v2887_v20, %v2910_v22  ;;  %3512 = vmatpush.bf16.msra.mxu2 %v4302_v23 }
 0x664   : > { %2912 = vst [vmem:[#allocation5 + $0x18] sm:$0xf] %v2911_v21 }
 0x665   : > { %2979 = vst.msk [vmem:[#allocation5 + $0x18] sm:$0x7] %vm2977_vm2, %v2959_v9  ;;  %v2916_v9 = vld [vmem:[#allocation5 + $0x30] sm:$0xf] }
 0x667   : > { %3513 = vmatpush.bf16.msra.mxu2 %v4294_v35 }
 0x66a   : > { %v3058_v24 = vpop.permute.xlu2 %3057  ;;  %v3081_v25 = vpop.permute.xlu0 %3080 }
 0x66b   : > { %3076 = vst.msk [vmem:[#allocation5 + $0x28] sm:$0x7] %vm3072_vm1, %v3058_v24  ;;  %v3101_v31 = vsel %vm5710_vm4, %v3081_v25, %v3100_v26  ;;  %3514 = vmatpush.bf16.msra.mxu2 %v4286_v41  ;;  %v4319_v41 = vld [vmem:[%s5975_s13 + $0xd8] sm:$0xf0] }
 0x66c   : > { %v3014_v36 = vld [vmem:[#allocation5 + $0x18] sm:$0xf]  ;;  %3102 = vst [vmem:[#allocation5 + $0x4] sm:$0xf] %v3101_v31 }
 0x66d   : > { %v3015_v38 = vsel %vm5596_vm0, %v2990_v19, %v3014_v36  ;;  %v4327_v19 = vld [vmem:[%s5975_s13 + $0xe8] sm:$0xf0]  ;;  %v4471_v36 = vld [vmem:[%s5975_s13 + $0x64] sm:$0xf] }
 0x66e   : > { %3016 = vst [vmem:[#allocation5 + $0x18] sm:$0xf] %v3015_v38  ;;  %v4330_v22 = vor.u32 %v4487_v3, %v4327_v19  ;;  %v4263_v38 = vld [vmem:[%s5975_s13 + $0x68] sm:$0xf0]  ;;  %v4239_v3 = vld [vmem:[%s5975_s13 + $0x38] sm:$0xf0] }
 0x66f   : > { %3515 = vmatpush.bf16.msra.mxu2 %v4278_v28  ;;  %v4266_v39 = vor.u32 %v4471_v36, %v4263_v38  ;;  %v4479_v19 = vld [vmem:[%s5975_s13 + $0xa4] sm:$0xf]  ;;  %v4287_v36 = vld [vmem:[%s5975_s13 + $0x98] sm:$0xf0] }
 0x670   : > { %v4290_v38 = vor.u32 %v4477_v18, %v4287_v36 }
 0x671   : > { %3567 = vmatpush.bf16.msrb.mxu1 %v4266_v39 }
 0x672   : > { %v3121_v43 = vpop.permute.xlu1 %3120  ;;  %v3109_v45 = vld [vmem:[#allocation5 + $0x28] sm:$0xf]  ;;  %v3087_v47 = vpop.permute.xlu2 %3086  ;;  %4361 = vmatmul.msk.bf16.gmra.mxu3 %vm3466_vm12, %v5576_v27 }
 0x673   : > { %v3137_v16 = vld [vmem:[#allocation5 + $0x4] sm:$0xf]  ;;  %v3110_v50 = vsel %vm5710_vm4, %v3087_v47, %v3109_v45  ;;  %v2988_v52 = vpop.permute.xlu0 %2987  ;;  %3595 = vmatpush.bf16.msrb.mxu2 %v4338_v33 }
 0x674   : > { %v3138_v54 = vsel %vm5733_vm5, %v3119_v10, %v3137_v16  ;;  %3111 = vst [vmem:[#allocation5 + $0x28] sm:$0xf] %v3110_v50  ;;  %v3012_v27 = vsel %vm5596_vm0, %v2988_v52, %v3011_v53 }
 0x675   : > { %3139 = vst [vmem:[#allocation5 + $0x4] sm:$0xf] %v3138_v54  ;;  %v4177_v54 = vld [vmem:[#allocation5 + $0x18] sm:$0xf] }
 0x676   : > { %3013 = vst [vmem:[#allocation5 + $0xc] sm:$0xf] %v3012_v27 }
 0x677   : > { %3596 = vmatpush.bf16.msrb.mxu2 %v4330_v22  ;;  %v4242_v22 = vor.u32 %v4465_v15, %v4239_v3 }
 0x67a   : > { %v2889_v51 = vpop.permute.xlu1 %2888  ;;  %v3062_v56 = vpop.permute.xlu2 %3061 }
 0x67b   : > { %v2914_v57 = vsel %vm5579_vm14, %v2889_v51, %v2913_v55  ;;  %v2961_v58 = vpop.permute.xlu0 %2960  ;;  %3078 = vst.msk [vmem:[#allocation5 + $0x40] sm:$0x7] %vm3072_vm1, %v3062_v56  ;;  %v3146_v47 = vld [vmem:[#allocation5 + $0x28] sm:$0xf]  ;;  %v4469_v51 = vld [vmem:[%s5975_s13 + $0x54] sm:$0xf] }
 0x67c   : > { %2915 = vst [vmem:[#allocation5 + $0x24] sm:$0xf] %v2914_v57  ;;  %v4447_v34 = vld [vmem:[#allocation5 + $0x4] sm:$0xf]  ;;  %v4255_v56 = vld [vmem:[%s5975_s13 + $0x58] sm:$0xf0] }
 0x67d   : > { %2980 = vst.msk [vmem:[#allocation5 + $0x24] sm:$0x7] %vm2977_vm2, %v2961_v58  ;;  %v4448_v59 = vld [vmem:[#allocation5 + $0x8] sm:$0xf0]  ;;  %v4258_v57 = vor.u32 %v4469_v51, %v4255_v56  ;;  %v4483_v58 = vld [vmem:[%s5975_s13 + $0xc4] sm:$0xf] }
 0x67e   : > { %v5755_v60 = vor.u32 %v4448_v59, %v4165_v17  ;;  %v4311_v17 = vld [vmem:[%s5975_s13 + $0xc8] sm:$0xf0] }
 0x67f   : > { %v4314_v59 = vor.u32 %v4483_v58, %v4311_v17  ;;  %3568 = vmatpush.bf16.msrb.mxu1 %v4258_v57 }
 0x680   : > { %3487 = vmatmul.bf16.vlgmr.msra.gmra.mxu1 %v5755_v60 }
 0x682   : > { %v3083_v63 = vpop.permute.xlu1 %3082  ;;  %v3115_v0 = vld [vmem:[#allocation5 + $0x40] sm:$0xf]  ;;  %v3091_v37 = vpop.permute.xlu2 %3090  ;;  %4362 = vmatmul.msk.bf16.gmra.mxu3 %vm3466_vm12, %v5608_v44 }
 0x683   : > { %v3104_v2 = vsel %vm5710_vm4, %v3083_v63, %v3103_v61  ;;  %v5762_v4 = vpop.permute.xlu0 %3122  ;;  %v3116_v62 = vsel %vm5710_vm4, %v3091_v37, %v3115_v0  ;;  %v2919_v63 = vld [vmem:[#allocation5 + $0x3c] sm:$0xf] }
 0x684   : > { %3105 = vst [vmem:[#allocation5 + $0x10] sm:$0xf] %v3104_v2  ;;  %v3017_v25 = vld [vmem:[#allocation5 + $0x24] sm:$0xf] }
 0x685   : > { %3117 = vst [vmem:[#allocation5 + $0x40] sm:$0xf] %v3116_v62  ;;  %v2925_v62 = vld [vmem:[#allocation5 + $0x54] sm:$0xf] }
 0x68a   : > { %v3056_v44 = vpop.permute.xlu1 %3055  ;;  %v2963_v7 = vpop.permute.xlu2 %2962 }
 0x68b   : > { %v3140_v8 = vld [vmem:[#allocation5 + $0x10] sm:$0xf]  ;;  %3075 = vst.msk [vmem:[#allocation5 + $0x1c] sm:$0x7] %vm3072_vm1, %v3056_v44  ;;  %v2891_v10 = vpop.permute.xlu0 %2890 }
 0x68c   : > { %v3141_v12 = vsel %vm5733_vm5, %v3121_v43, %v3140_v8  ;;  %v2917_v29 = vsel %vm5579_vm14, %v2891_v10, %v2916_v9  ;;  %v3152_v46 = vld [vmem:[#allocation5 + $0x40] sm:$0xf]  ;;  %v4322_v43 = vor.u32 %v4485_v40, %v4319_v41  ;;  %v4467_v8 = vld [vmem:[%s5975_s13 + $0x44] sm:$0xf]  ;;  %v4247_v9 = vld [vmem:[%s5975_s13 + $0x48] sm:$0xf0] }
 0x68d   : > { %3142 = vst [vmem:[#allocation5 + $0x10] sm:$0xf] %v3141_v12  ;;  %v4250_v10 = vor.u32 %v4467_v8, %v4247_v9  ;;  %v4303_v12 = vld [vmem:[%s5975_s13 + $0xb8] sm:$0xf0] }
 0x68e   : > { %2918 = vst [vmem:[#allocation5 + $0x30] sm:$0xf] %v2917_v29  ;;  %3597 = vmatpush.bf16.msrb.mxu2 %v4322_v43  ;;  %v4306_v29 = vor.u32 %v4481_v1, %v4303_v12  ;;  %v4461_v43 = vld [vmem:[%s5975_s13 + $0x14] sm:$0xf] }
 0x68f   : > { %2981 = vst.msk [vmem:[#allocation5 + $0x30] sm:$0x7] %vm2977_vm2, %v2963_v7  ;;  %3569 = vmatpush.bf16.msrb.mxu1 %v4250_v10 }
 0x692   : > { %v3106_v20 = vld [vmem:[#allocation5 + $0x1c] sm:$0xf]  ;;  %v3085_v21 = vpop.permute.xlu1 %3084  ;;  %v3129_v11 = vpop.permute.xlu2 %3128  ;;  %3598 = vmatpush.bf16.msrb.mxu2 %v4314_v59 }
 0x693   : > { %v3107_v23 = vsel %vm5710_vm4, %v3085_v21, %v3106_v20  ;;  %v2992_v24 = vpop.permute.xlu0 %2991  ;;  %v3153_v26 = vsel %vm5733_vm5, %v3129_v11, %v3152_v46  ;;  %v4295_v20 = vld [vmem:[%s5975_s13 + $0xa8] sm:$0xf0]  ;;  %3570 = vmatpush.bf16.msrb.mxu1 %v4242_v22 }
 0x694   : > { %3108 = vst [vmem:[#allocation5 + $0x1c] sm:$0xf] %v3107_v23  ;;  %v3018_v30 = vsel %vm5596_vm0, %v2992_v24, %v3017_v25  ;;  %v4167_v31 = vld [vmem:[#allocation5 + $0xc] sm:$0xf0]  ;;  %v4298_v21 = vor.u32 %v4479_v19, %v4295_v20 }
 0x695   : > { %3019 = vst [vmem:[#allocation5 + $0x24] sm:$0xf] %v3018_v30  ;;  %v5796_v35 = vor.u32 %v4447_v34, %v4167_v31  ;;  %v4231_v30 = vld [vmem:[%s5975_s13 + $0x28] sm:$0xf0] }
 0x696   : > { %3154 = vst [vmem:[#allocation5 + $0x40] sm:$0xf] %v3153_v26  ;;  %3599 = vmatpush.bf16.msrb.mxu2 %v4306_v29  ;;  %v4463_v26 = vld [vmem:[%s5975_s13 + $0x24] sm:$0xf] }
 0x697   : > { %3516 = vmatmul.bf16.vlgmr.msra.gmra.mxu2 %v5796_v35  ;;  %v4234_v31 = vor.u32 %v4463_v26, %v4231_v30 }
 0x699   : > { %3571 = vmatpush.bf16.msrb.mxu1 %v4234_v31 }
 0x69a   : > { %v3125_v45 = vpop.permute.xlu1 %3124  ;;  %v2895_v49 = vpop.permute.xlu2 %2894  ;;  %3600 = vmatpush.bf16.msrb.mxu2 %v4298_v21 }
 0x69b   : > { %v3143_v16 = vld [vmem:[#allocation5 + $0x1c] sm:$0xf]  ;;  %v3147_v50 = vsel %vm5733_vm5, %v3125_v45, %v3146_v47  ;;  %v2965_v52 = vpop.permute.xlu0 %2964  ;;  %v2923_v53 = vsel %vm5579_vm14, %v2895_v49, %v2922_v48  ;;  %v4475_v47 = vld [vmem:[%s5975_s13 + $0x84] sm:$0xf]  ;;  %v4279_v49 = vld [vmem:[%s5975_s13 + $0x88] sm:$0xf0] }
 0x69c   : > { %v3144_v28 = vsel %vm5733_vm5, %v5762_v4, %v3143_v16  ;;  %3148 = vst [vmem:[#allocation5 + $0x28] sm:$0xf] %v3147_v50  ;;  %v4451_v27 = vld [vmem:[#allocation5 + $0x20] sm:$0xf0]  ;;  %v3020_v4 = vld [vmem:[#allocation5 + $0x30] sm:$0xf]  ;;  %v4282_v50 = vor.u32 %v4475_v47, %v4279_v49 }
 0x69d   : > { %3145 = vst [vmem:[#allocation5 + $0x1c] sm:$0xf] %v3144_v28  ;;  %v5818_v55 = vor.u32 %v4451_v27, %v4177_v54  ;;  %v4223_v45 = vld [vmem:[%s5975_s13 + $0x18] sm:$0xf0]  ;;  %v4215_v16 = vld [vmem:[%s5975_s13 + $0x8] sm:$0xf0] }
 0x69e   : > { %2924 = vst [vmem:[#allocation5 + $0x48] sm:$0xf] %v2923_v53  ;;  %3601 = vmatpush.bf16.msrb.mxu2 %v4290_v38  ;;  %v4226_v48 = vor.u32 %v4461_v43, %v4223_v45  ;;  %v4191_v51 = vld [vmem:[#allocation5 + $0x3c] sm:$0xf0] }
 0x69f   : > { %3492 = vmatmul.bf16.gmra.mxu1 %v5818_v55 }
 0x6a0   : > { %3572 = vmatpush.bf16.msrb.mxu1 %v4226_v48 }
 0x6a2   : > { %v2893_v61 = vpop.permute.xlu1 %2892  ;;  %v2897_v0 = vpop.permute.xlu2 %2896  ;;  %3602 = vmatpush.bf16.msrb.mxu2 %v4282_v50 }
 0x6a3   : > { %v2920_v37 = vsel %vm5579_vm14, %v2893_v61, %v2919_v63  ;;  %v2994_v2 = vpop.permute.xlu0 %2993  ;;  %v4179_v5 = vld [vmem:[#allocation5 + $0x24] sm:$0xf0]  ;;  %v2926_v33 = vsel %vm5579_vm14, %v2897_v0, %v2925_v62  ;;  %v4203_v0 = vld [vmem:[#allocation5 + $0x54] sm:$0xf0]  ;;  %v5916_v62 = vld [vmem:[%s5976_s14] sm:$0x3] }
 0x6a4   : > { %2921 = vst [vmem:[#allocation5 + $0x3c] sm:$0xf] %v2920_v37  ;;  %v3021_v6 = vsel %vm5596_vm0, %v2994_v2, %v3020_v4  ;;  %v4450_v44 = vld [vmem:[#allocation5 + $0x1c] sm:$0xf] }
 0x6a5   : > { %2982 = vst.msk [vmem:[#allocation5 + $0x3c] sm:$0x7] %vm2977_vm2, %v2965_v52  ;;  %v5840_v7 = vor.u32 %v4450_v44, %v4179_v5  ;;  %v4218_v52 = vor.u32 %v4459_v42, %v4215_v16 }
 0x6a6   : > { %3022 = vst [vmem:[#allocation5 + $0x30] sm:$0xf] %v3021_v6  ;;  %v3546_v6 = vpop.f32.mrf.mxu3 }
 0x6a7   : > { %2927 = vst [vmem:[#allocation5 + $0x54] sm:$0xf] %v2926_v33  ;;  %3521 = vmatmul.bf16.gmra.mxu2 %v5840_v7  ;;  %3573 = vmatpush.bf16.msrb.mxu1 %v4218_v52  ;;  %v5919_v33 = vperm.slane %v5916_v62, 0 }
 0x6aa   : > { %v3060_v13 = vpop.permute.xlu1 %3059 }
 0x6ab   : > { %3077 = vst.msk [vmem:[#allocation5 + $0x34] sm:$0x7] %vm3072_vm1, %v3060_v13  ;;  %v2967_v14 = vpop.permute.xlu0 %2966 }
 0x6ac   : > { %2983 = vst.msk [vmem:[#allocation5 + $0x48] sm:$0x7] %vm2977_vm2, %v2967_v14  ;;  %v3023_v53 = vld [vmem:[#allocation5 + $0x3c] sm:$0xf] }
 0x6ad   : > { %v4189_v58 = vld [vmem:[#allocation5 + $0x30] sm:$0xf] }
 0x6b2   : > { %v3112_v46 = vld [vmem:[#allocation5 + $0x34] sm:$0xf]  ;;  %v3089_v11 = vpop.permute.xlu1 %3088 }
 0x6b3   : > { %v3113_v23 = vsel %vm5710_vm4, %v3089_v11, %v3112_v46  ;;  %v2998_v24 = vpop.permute.xlu0 %2997  ;;  %v3026_v25 = vld [vmem:[#allocation5 + $0x48] sm:$0xf] }
 0x6b4   : > { %3114 = vst [vmem:[#allocation5 + $0x34] sm:$0xf] %v3113_v23  ;;  %v3027_v34 = vsel %vm5596_vm0, %v2998_v24, %v3026_v25 }
 0x6b5   : > { %3028 = vst [vmem:[#allocation5 + $0x48] sm:$0xf] %v3027_v34 }
 0x6ba   : > { %v3127_v39 = vpop.permute.xlu1 %3126 }
 0x6bb   : > { %v3149_v40 = vld [vmem:[#allocation5 + $0x34] sm:$0xf] }
 0x6bc   : > { %v3150_v41 = vsel %vm5733_vm5, %v3127_v39, %v3149_v40  ;;  %v4201_v37 = vld [vmem:[#allocation5 + $0x48] sm:$0xf] }
 0x6bd   : > { %3151 = vst [vmem:[#allocation5 + $0x34] sm:$0xf] %v3150_v41 }
 0x6c2   : > { %v2996_v28 = vpop.permute.xlu1 %2995 }
 0x6c3   : > { %v3024_v54 = vsel %vm5596_vm0, %v2996_v28, %v3023_v53 }
 0x6c4   : > { %3025 = vst [vmem:[#allocation5 + $0x3c] sm:$0xf] %v3024_v54  ;;  %v4453_v27 = vld [vmem:[#allocation5 + $0x34] sm:$0xf] }
 0x6c5   : > { %v4194_v56 = vor.u32 %v4453_v27, %v4191_v51 }
 0x6c7   : > { %3526 = vmatmul.bf16.gmra.mxu2 %v4194_v56 }
 0x6ca   : > { %v3064_v57 = vpop.permute.xlu1 %3063 }
 0x6cb   : > { %3079 = vst.msk [vmem:[#allocation5 + $0x4c] sm:$0x7] %vm3072_vm1, %v3064_v57  ;;  %v4454_v17 = vld [vmem:[#allocation5 + $0x38] sm:$0xf0] }
 0x6cc   : > { %v4190_v59 = vor.u32 %v4454_v17, %v4189_v58 }
 0x6ce   : > { %3497 = vmatmul.bf16.gmra.mxu1 %v4190_v59 }
 0x6d2   : > { %v2969_v63 = vpop.permute.xlu1 %2968  ;;  %v4456_v61 = vld [vmem:[#allocation5 + $0x4c] sm:$0xf] }
 0x6d3   : > { %2984 = vst.msk [vmem:[#allocation5 + $0x54] sm:$0x7] %vm2977_vm2, %v2969_v63  ;;  %v4206_v32 = vor.u32 %v4456_v61, %v4203_v0  ;;  %v3223_v61 = vperm.slane %v5916_v62, 1 }
 0x6d7   : > { %3531 = vmatmul.bf16.gmra.mxu2 %v4206_v32 }
 0x6da   : > { %v4457_v2 = vld [vmem:[#allocation5 + $0x50] sm:$0xf0] }
 0x6db   : > { %v4202_v4 = vor.u32 %v4457_v2, %v4201_v37 }
 0x6de   : > { %3502 = vmatmul.bf16.gmra.mxu1 %v4202_v4 }
 0x6e7   : > { %3603 = vmatmul.bf16.vlgmr.msrb.gmra.mxu2 %v5796_v35 }
 0x6ee   : > { %3574 = vmatmul.bf16.vlgmr.msrb.gmra.mxu1 %v5755_v60 }
 0x6f7   : > { %3608 = vmatmul.bf16.gmra.mxu2 %v5840_v7 }
 0x6fd   : > { %v3488_v5 = vpop.f32.mrf.mxu1 }
 0x6fe   : > { %3579 = vmatmul.bf16.gmra.mxu1 %v5818_v55  ;;  %v3489_v35 = vadd.f32 %v3488_v5, %v5919_v33  ;;  %v3548_v55 = vpop.f32.mrf.mxu3 }
 0x705   : > { %v3490_v7 = vpop.f32.mrf.mxu1 }
 0x706   : > { %v3491_v10 = vadd.f32 %v3490_v7, %v5919_v33  ;;  %v3551_v14 = vpop.f32.mrf.mxu3 }
 0x707   : > { %3613 = vmatmul.bf16.gmra.mxu2 %v4194_v56 }
 0x70e   : > { %3584 = vmatmul.bf16.gmra.mxu1 %v4190_v59  ;;  %v3553_v11 = vpop.f32.mrf.mxu3 }
 0x716   : > { %v3556_v34 = vpop.f32.mrf.mxu3 }
 0x717   : > { %3618 = vmatmul.bf16.gmra.mxu2 %v4206_v32 }
 0x71a   : > { %v3517_v60 = vpop.f32.mrf.mxu2 }
 0x71b   : > { %v3518_v44 = vadd.f32 %v3517_v60, %v3489_v35 }
 0x71c   : > { %v3493_v29 = vpop.f32.mrf.mxu1 }
 0x71d   : > { %v3547_v8 = vadd.f32 %v3546_v6, %v3518_v44  ;;  %v3494_v3 = vadd.f32 %v3493_v29, %v5919_v33 }
 0x71e   : > { %3589 = vmatmul.bf16.gmra.mxu1 %v4202_v4  ;;  %v3558_v31 = vpop.f32.mrf.mxu3 }
 0x71f   : > { %v3653_v9 = vmax.f32 %v3547_v8, 0.0 }
 0x721   : > { %3669 = vst [vmem:[%s5926_s24] sm:$0xff] %v3653_v9 }
 0x722   : > { %v3519_v1 = vpop.f32.mrf.mxu2 }
 0x723   : > { %v3520_v12 = vadd.f32 %v3519_v1, %v3491_v10 }
 0x724   : > { %v3495_v21 = vpop.f32.mrf.mxu1 }
 0x725   : > { %v3549_v13 = vadd.f32 %v3548_v55, %v3520_v12  ;;  %v3496_v23 = vadd.f32 %v3495_v21, %v5919_v33 }
 0x726   : > { %v3561_v40 = vpop.f32.mrf.mxu3 }
 0x727   : > { %v3655_v15 = vmax.f32 %v3549_v13, 0.0 }
 0x729   : > { %3671 = vst [vmem:[%s5926_s24 + $0x10] sm:$0xff] %v3655_v15 }
 0x72a   : > { %v3522_v19 = vpop.f32.mrf.mxu2 }
 0x72b   : > { %v3523_v22 = vadd.f32 %v3522_v19, %v3494_v3 }
 0x72d   : > { %v3552_v20 = vadd.f32 %v3551_v14, %v3523_v22 }
 0x72e   : > { %v3563_v16 = vpop.f32.mrf.mxu3 }
 0x72f   : > { %v3657_v46 = vmax.f32 %v3552_v20, 0.0 }
 0x731   : > { %3673 = vst [vmem:[%s5926_s24 + $0x20] sm:$0xff] %v3657_v46 }
 0x732   : > { %v3524_v24 = vpop.f32.mrf.mxu2 }
 0x733   : > { %v3525_v25 = vadd.f32 %v3524_v24, %v3496_v23 }
 0x735   : > { %v3554_v26 = vadd.f32 %v3553_v11, %v3525_v25 }
 0x736   : > { %v3633_v57 = vpop.f32.mrf.mxu3 }
 0x737   : > { %v3659_v30 = vmax.f32 %v3554_v26, 0.0 }
 0x739   : > { %3675 = vst [vmem:[%s5926_s24 + $0x30] sm:$0xff] %v3659_v30 }
 0x73e   : > { %v3635_v4 = vpop.f32.mrf.mxu3 }
 0x746   : > { %v3638_v55 = vpop.f32.mrf.mxu3 }
 0x74a   : > { %v3527_v18 = vpop.f32.mrf.mxu2 }
 0x74b   : > { %v3498_v36 = vpop.f32.mrf.mxu1 }
 0x74c   : > { %v3499_v38 = vadd.f32 %v3498_v36, %v5919_v33 }
 0x74e   : > { %v3528_v39 = vadd.f32 %v3527_v18, %v3499_v38  ;;  %v3640_v13 = vpop.f32.mrf.mxu3 }
 0x750   : > { %v3557_v41 = vadd.f32 %v3556_v34, %v3528_v39 }
 0x752   : > { %v3661_v43 = vmax.f32 %v3557_v41, 0.0  ;;  %v3529_v45 = vpop.f32.mrf.mxu2 }
 0x753   : > { %v3500_v47 = vpop.f32.mrf.mxu1 }
 0x754   : > { %3677 = vst [vmem:[%s5926_s24 + $0x40] sm:$0xff] %v3661_v43  ;;  %v3501_v48 = vadd.f32 %v3500_v47, %v5919_v33 }
 0x756   : > { %v3530_v49 = vadd.f32 %v3529_v45, %v3501_v48  ;;  %v3643_v11 = vpop.f32.mrf.mxu3 }
 0x758   : > { %v3559_v42 = vadd.f32 %v3558_v31, %v3530_v49 }
 0x75a   : > { %v3663_v50 = vmax.f32 %v3559_v42, 0.0  ;;  %v3532_v52 = vpop.f32.mrf.mxu2 }
 0x75b   : > { %v3503_v53 = vpop.f32.mrf.mxu1 }
 0x75c   : > { %3679 = vst [vmem:[%s5926_s24 + $0x50] sm:$0xff] %v3663_v50  ;;  %v3504_v28 = vadd.f32 %v3503_v53, %v5919_v33 }
 0x75e   : > { %v3533_v54 = vadd.f32 %v3532_v52, %v3504_v28  ;;  %v3645_v36 = vpop.f32.mrf.mxu3 }
 0x760   : > { %v3562_v27 = vadd.f32 %v3561_v40, %v3533_v54 }
 0x762   : > { %v3665_v51 = vmax.f32 %v3562_v27, 0.0  ;;  %v3534_v56 = vpop.f32.mrf.mxu2 }
 0x763   : > { %v3505_v58 = vpop.f32.mrf.mxu1 }
 0x764   : > { %3681 = vst [vmem:[%s5926_s24 + $0x60] sm:$0xff] %v3665_v51  ;;  %v3506_v17 = vadd.f32 %v3505_v58, %v5919_v33 }
 0x766   : > { %v3535_v59 = vadd.f32 %v3534_v56, %v3506_v17  ;;  %v3648_v47 = vpop.f32.mrf.mxu3 }
 0x768   : > { %v3564_v63 = vadd.f32 %v3563_v16, %v3535_v59 }
 0x76a   : > { %v3667_v0 = vmax.f32 %v3564_v63, 0.0  ;;  %v3604_v32 = vpop.f32.mrf.mxu2 }
 0x76b   : > { %v3575_v37 = vpop.f32.mrf.mxu1 }
 0x76c   : > { %3683 = vst [vmem:[%s5926_s24 + $0x70] sm:$0xff] %v3667_v0  ;;  %v3576_v2 = vadd.f32 %v3575_v37, %v3223_v61 }
 0x76e   : > { %v3605_v5 = vadd.f32 %v3604_v32, %v3576_v2  ;;  %v3650_v28 = vpop.f32.mrf.mxu3 }
 0x770   : > { %v3634_v6 = vadd.f32 %v3633_v57, %v3605_v5 }
 0x772   : > { %v3654_v35 = vmax.f32 %v3634_v6, 0.0  ;;  %v3606_v60 = vpop.f32.mrf.mxu2 }
 0x773   : > { %v3577_v44 = vpop.f32.mrf.mxu1 }
 0x774   : > { %3670 = vst [vmem:[%s5926_s24 + $0x8] sm:$0xff] %v3654_v35  ;;  %v3578_v7 = vadd.f32 %v3577_v44, %v3223_v61 }
 0x776   : > { %v3607_v33 = vadd.f32 %v3606_v60, %v3578_v7 }
 0x778   : > { %v3636_v8 = vadd.f32 %v3635_v4, %v3607_v33 }
 0x77a   : > { %v3656_v9 = vmax.f32 %v3636_v8, 0.0  ;;  %v3609_v62 = vpop.f32.mrf.mxu2 }
 0x77b   : > { %v3580_v10 = vpop.f32.mrf.mxu1 }
 0x77c   : > { %3672 = vst [vmem:[%s5926_s24 + $0x18] sm:$0xff] %v3656_v9  ;;  %v3581_v1 = vadd.f32 %v3580_v10, %v3223_v61 }
 0x77e   : > { %v3610_v12 = vadd.f32 %v3609_v62, %v3581_v1 }
 0x780   : > { %v3639_v29 = vadd.f32 %v3638_v55, %v3610_v12 }
 0x782   : > { %v3658_v14 = vmax.f32 %v3639_v29, 0.0  ;;  %v3611_v15 = vpop.f32.mrf.mxu2 }
 0x783   : > { %v3582_v3 = vpop.f32.mrf.mxu1 }
 0x784   : > { %3674 = vst [vmem:[%s5926_s24 + $0x28] sm:$0xff] %v3658_v14  ;;  %v3583_v19 = vadd.f32 %v3582_v3, %v3223_v61 }
 0x786   : > { %v3612_v22 = vadd.f32 %v3611_v15, %v3583_v19 }
 0x788   : > { %v3641_v20 = vadd.f32 %v3640_v13, %v3612_v22 }
 0x78a   : > { %v3660_v21 = vmax.f32 %v3641_v20, 0.0  ;;  %v3614_v46 = vpop.f32.mrf.mxu2 }
 0x78b   : > { %v3585_v23 = vpop.f32.mrf.mxu1 }
 0x78c   : > { %3676 = vst [vmem:[%s5926_s24 + $0x38] sm:$0xff] %v3660_v21  ;;  %v3586_v24 = vadd.f32 %v3585_v23, %v3223_v61 }
 0x78e   : > { %v3615_v25 = vadd.f32 %v3614_v46, %v3586_v24 }
 0x790   : > { %v3644_v26 = vadd.f32 %v3643_v11, %v3615_v25 }
 0x792   : > { %v3662_v30 = vmax.f32 %v3644_v26, 0.0  ;;  %v3616_v34 = vpop.f32.mrf.mxu2 }
 0x793   : > { %v3587_v31 = vpop.f32.mrf.mxu1 }
 0x794   : > { %3678 = vst [vmem:[%s5926_s24 + $0x48] sm:$0xff] %v3662_v30  ;;  %v3588_v18 = vadd.f32 %v3587_v31, %v3223_v61 }
 0x796   : > { %v3617_v38 = vadd.f32 %v3616_v34, %v3588_v18 }
 0x798   : > { %v3646_v39 = vadd.f32 %v3645_v36, %v3617_v38 }
 0x79a   : > { %v3664_v40 = vmax.f32 %v3646_v39, 0.0  ;;  %v3619_v41 = vpop.f32.mrf.mxu2 }
 0x79b   : > { %v3590_v43 = vpop.f32.mrf.mxu1 }
 0x79c   : > { %3680 = vst [vmem:[%s5926_s24 + $0x58] sm:$0xff] %v3664_v40  ;;  %v3591_v45 = vadd.f32 %v3590_v43, %v3223_v61 }
 0x79e   : > { %v3620_v48 = vadd.f32 %v3619_v41, %v3591_v45 }
 0x7a0   : > { %v3649_v49 = vadd.f32 %v3648_v47, %v3620_v48 }
 0x7a2   : > { %v3666_v42 = vmax.f32 %v3649_v49, 0.0  ;;  %v3621_v52 = vpop.f32.mrf.mxu2 }
 0x7a3   : > { %v3592_v16 = vpop.f32.mrf.mxu1 }
 0x7a4   : > { %3682 = vst [vmem:[%s5926_s24 + $0x68] sm:$0xff] %v3666_v42  ;;  %v3593_v50 = vadd.f32 %v3592_v16, %v3223_v61 }
 0x7a6   : > { %v3622_v53 = vadd.f32 %v3621_v52, %v3593_v50 }
 0x7a8   : > { %v3651_v54 = vadd.f32 %v3650_v28, %v3622_v53 }
 0x7aa   : > { %v3668_v27 = vmax.f32 %v3651_v54, 0.0 }
 0x7ac   : > { %3684 = vst [vmem:[%s5926_s24 + $0x78] sm:$0xff] %v3668_v27 }
 0x7ad PF: > { %s6039_s1 = sld [smem:[#allocation7_spill]]  ;;  %p25_p9 = scmp.ge.s32.totalorder %s4676_s28, 4  }
 0x7ae   : > { %s6040_s24 = smov %s4554_s25  ;;  %s6042_s26 = smov %s4676_s28 }
 0x7af   :  { %27 = sbr.rel (!%p25_p9) target bundleno = 7 (0x7), region = 187 }
 0x7b3   : > { %s6041_s25 = smov %s6039_s1 }

</bundles_post_ra>
